<compile_context>
chip_gen: v7x
topology: tpu7x:2x2x1
jax: 0.10.0
libtpu: 0.0.40
codegen_flags: <defaults>
</compile_context>

<pallas_src>
import jax
import jax.numpy as jnp
from jax import lax
from jax.experimental import pallas as pl
from jax.experimental.pallas import tpu as pltpu


def _round_up(x, m):
    return ((x + m - 1) // m) * m


def snp_mlp_kernel(x_ref, w1_ref, b1_ref, w2t_ref, b2_ref, w3_ref, b3_ref,
                   o_ref, acc_ref):
    k = pl.program_id(1)

    @pl.when(k == 0)
    def _init():
        acc_ref[...] = jnp.zeros_like(acc_ref)

    # Layer 1 partial product: (tb, tk) @ (tk, 512), accumulated in f32.
    acc_ref[...] += jnp.dot(x_ref[...], w1_ref[...],
                            preferred_element_type=jnp.float32)

    @pl.when(k == pl.num_programs(1) - 1)
    def _finalize():
        h1 = jnp.maximum(acc_ref[...] + b1_ref[...], 0.0)        # (tb, 512) f32
        h1 = h1.astype(w2t_ref.dtype)                            # bf16 for MXU
        # Layer 2, transposed so batch lands on lanes:
        #   (64, 512) . (tb, 512)^T -> (64, tb)   (A @ B^T contraction)
        h2t = lax.dot_general(
            w2t_ref[...], h1,
            dimension_numbers=(((1,), (1,)), ((), ())),
            preferred_element_type=jnp.float32)                  # (64, tb)
        h2t = jnp.maximum(h2t + b2_ref[...], 0.0)                # + (64,1) bias
        # Layer 3 on VPU (multiply) + XLU (sublane reduce): no N=1 MXU matmul,
        # result is already a lane-dense (1, tb) row.
        y = jnp.sum(h2t * w3_ref[...], axis=0, keepdims=True) + b3_ref[0]
        o_ref[...] = y.astype(o_ref.dtype)


def double_layer_simple_mlp(x, params, *, tb=256, tk=512,
                            compute_dtype=jnp.bfloat16):
    """x: (B, snp_number) float32. params: dict of w1,b1,w2,b2,w3,b3.

    Returns (B, 1) float32, identical math to the PyTorch module
    (y = relu(relu(x @ W1 + b1) @ W2 + b2) @ W3 + b3 with (in, out) weights).
    """
    B, snp = x.shape
    w1, b1 = params["w1"], params["b1"]   # (snp, 512), (1, 512)
    w2, b2 = params["w2"], params["b2"]   # (512, 64),  (1, 64)
    w3, b3 = params["w3"], params["b3"]   # (64, 1),    (1, 1)
    h1_dim = w1.shape[1]                  # 512
    h2_dim = w2.shape[1]                  # 64

    bp = _round_up(B, tb)
    kp = _round_up(snp, tk)
    nb, nk = bp // tb, kp // tk

    # Zero padding is exact: padded K rows of W1 are zero, padded batch rows
    # are sliced off after the kernel.
    x_p = jnp.pad(x, ((0, bp - B), (0, kp - snp))).astype(compute_dtype)
    w1_p = jnp.pad(w1, ((0, kp - snp), (0, 0))).astype(compute_dtype)
    w2_t = jnp.transpose(w2).astype(compute_dtype)        # (64, 512)
    b1_f = b1.astype(jnp.float32)                         # (1, 512)
    b2_c = jnp.transpose(b2).astype(jnp.float32)          # (64, 1) column bias
    w3_c = w3.astype(jnp.float32)                         # (64, 1) column weight
    b3_s = b3.reshape(1).astype(jnp.float32)              # (1,) SMEM scalar

    itemsize = jnp.finfo(compute_dtype).bits // 8
    vmem_est = (2 * tb * tk * itemsize            # x tiles (double buffered)
                + 2 * tk * h1_dim * itemsize      # W1 K-slices
                + 2 * h2_dim * h1_dim * itemsize  # W2^T
                + tb * h1_dim * 4                 # f32 accumulator scratch
                + 2 * tb * 4                      # output tiles
                + (h1_dim + 2 * h2_dim) * 4 * 2)  # biases / w3
    vmem_limit = int(min(100 * 2**20, max(32 * 2**20, 2 * vmem_est)))

    out = pl.pallas_call(
        snp_mlp_kernel,
        out_shape=jax.ShapeDtypeStruct((1, bp), jnp.float32),
        grid_spec=pltpu.PrefetchScalarGridSpec(
            num_scalar_prefetch=0,
            grid=(nb, nk),                                        # K axis last
            in_specs=[
                pl.BlockSpec((tb, tk), lambda i, k: (i, k)),          # x tile
                pl.BlockSpec((tk, h1_dim), lambda i, k: (k, 0)),      # W1 slice
                pl.BlockSpec((1, h1_dim), lambda i, k: (0, 0)),       # b1
                pl.BlockSpec((h2_dim, h1_dim), lambda i, k: (0, 0)),  # W2^T
                pl.BlockSpec((h2_dim, 1), lambda i, k: (0, 0)),       # b2 col
                pl.BlockSpec((h2_dim, 1), lambda i, k: (0, 0)),       # w3 col
                pl.BlockSpec(memory_space=pltpu.MemorySpace.SMEM),    # b3
            ],
            out_specs=pl.BlockSpec((1, tb), lambda i, k: (0, i)),     # lane-dense
            scratch_shapes=[pltpu.VMEM((tb, h1_dim), jnp.float32)],
        ),
        compiler_params=pltpu.CompilerParams(
            dimension_semantics=("parallel", "arbitrary"),
            vmem_limit_bytes=vmem_limit,
        ),
    )(x_p, w1_p, b1_f, w2_t, b2_c, w3_c, b3_s)

    return out.reshape(-1)[:B, None]


def init_params(key, snp_number):
    """Deterministic init matching PyTorch nn.Linear's default uniform scheme
    (U(-1/sqrt(fan_in), 1/sqrt(fan_in))), stored as (in, out)."""
    ks = jax.random.split(key, 6)

    def lin(kw, kb, fan_in, fan_out):
        bound = 1.0 / (fan_in ** 0.5)
        w = jax.random.uniform(kw, (fan_in, fan_out), jnp.float32, -bound, bound)
        b = jax.random.uniform(kb, (1, fan_out), jnp.float32, -bound, bound)
        return w, b

    w1, b1 = lin(ks[0], ks[1], snp_number, 512)
    w2, b2 = lin(ks[2], ks[3], 512, 64)
    w3, b3 = lin(ks[4], ks[5], 64, 1)
    return dict(w1=w1, b1=b1, w2=w2, b2=b2, w3=w3, b3=b3)


def reference_mlp(x, p):
    hi = lax.Precision.HIGHEST
    h1 = jnp.maximum(jnp.dot(x, p["w1"], precision=hi) + p["b1"], 0.0)
    h2 = jnp.maximum(jnp.dot(h1, p["w2"], precision=hi) + p["b2"], 0.0)
    return jnp.dot(h2, p["w3"], precision=hi) + p["b3"]


if __name__ == "__main__":
    key = jax.random.PRNGKey(0)
    k_x, k_p = jax.random.split(key)

    snp_number = 1000   # not a multiple of tk=512 -> exercises K padding
    batch = 512         # 2 batch tiles of tb=256 -> exercises the grid + padding path

    x = jax.random.normal(k_x, (batch, snp_number), jnp.float32)
    params = init_params(k_p, snp_number)

    ref = reference_mlp(x, params)

    # f32 path: tight structural check of the kernel (tiling / transposes / biases).
    out_f32 = jax.block_until_ready(
        double_layer_simple_mlp(x, params, compute_dtype=jnp.float32))
    assert out_f32.shape == (batch, 1)
    assert jnp.allclose(out_f32, ref, atol=5e-3, rtol=5e-3)

    # Default bf16 path (per perf review): looser tolerance vs the f32 reference.
    out = jax.block_until_ready(double_layer_simple_mlp(x, params))
    assert out.shape == (batch, 1)
    err = float(jnp.max(jnp.abs(out - ref)))
    scale = float(jnp.max(jnp.abs(ref)))
    assert err <= 5e-2 * max(scale, 1.0), (err, scale)

    print("KERNEL_OK")
</pallas_src>

<mosaic_0001>
module attributes {stable_mosaic.version = 11 : i64} {
  func.func @snp_mlp_kernel(%arg0: i32, %arg1: i32, %arg2: memref<256x512xf32, #tpu.memory_space<vmem>>, %arg3: memref<512x512xf32, #tpu.memory_space<vmem>>, %arg4: memref<1x512xf32, #tpu.memory_space<vmem>>, %arg5: memref<64x512xf32, #tpu.memory_space<vmem>>, %arg6: memref<64x1xf32, #tpu.memory_space<vmem>>, %arg7: memref<64x1xf32, #tpu.memory_space<vmem>>, %arg8: memref<1xf32, #tpu.memory_space<smem>>, %arg9: memref<1x256xf32, #tpu.memory_space<vmem>>, %arg10: memref<256x512xf32, #tpu.memory_space<vmem>>) attributes {dimension_semantics = [#tpu.dimension_semantics<parallel>, #tpu.dimension_semantics<arbitrary>], iteration_bounds = array<i64: 2, 2>, scalar_prefetch = 0 : i64, scratch_operands = 1 : i64, tpu.core_type = #tpu.core_type<tc>, window_params = [{transform_indices = @transform_0, window_bounds = array<i64: 256, 512>}, {transform_indices = @transform_1, window_bounds = array<i64: 512, 512>}, {pipeline_mode = #tpu.pipeline_mode<synchronous>, transform_indices = @transform_2, window_bounds = array<i64: 1, 512>}, {pipeline_mode = #tpu.pipeline_mode<synchronous>, transform_indices = @transform_3, window_bounds = array<i64: 64, 512>}, {pipeline_mode = #tpu.pipeline_mode<synchronous>, transform_indices = @transform_4, window_bounds = array<i64: 64, 1>}, {pipeline_mode = #tpu.pipeline_mode<synchronous>, transform_indices = @transform_5, window_bounds = array<i64: 64, 1>}, {transform_indices = @transform_6, window_bounds = array<i64: 1>}, {transform_indices = @transform_7, window_bounds = array<i64: 1, 256>}]} {
    %c0_i32 = arith.constant 0 : i32
    %0 = arith.cmpi eq, %arg1, %c0_i32 : i32
    %1 = arith.extui %0 : i1 to i32
    %c0_i32_0 = arith.constant 0 : i32
    %2 = arith.cmpi ne, %1, %c0_i32_0 : i32
    scf.if %2 {
      %cst_9 = arith.constant 0.000000e+00 : f32
      %12 = vector.broadcast %cst_9 : f32 to vector<256x512xf32>
      %c0_10 = arith.constant 0 : index
      %c0_11 = arith.constant 0 : index
      %13 = vector.load %arg10[%c0_10, %c0_11] : memref<256x512xf32, #tpu.memory_space<vmem>>, vector<256x512xf32>
      tpu.vector_store %arg10[%c0_10, %c0_11], %12 {strides = array<i32>} : memref<256x512xf32, #tpu.memory_space<vmem>>, vector<256x512xf32>,
    } else {
    }
    %c0 = arith.constant 0 : index
    %c0_1 = arith.constant 0 : index
    %3 = vector.load %arg10[%c0, %c0_1] : memref<256x512xf32, #tpu.memory_space<vmem>>, vector<256x512xf32>
    %c0_2 = arith.constant 0 : index
    %c0_3 = arith.constant 0 : index
    %4 = vector.load %arg2[%c0_2, %c0_3] : memref<256x512xf32, #tpu.memory_space<vmem>>, vector<256x512xf32>
    %c0_4 = arith.constant 0 : index
    %c0_5 = arith.constant 0 : index
    %5 = vector.load %arg3[%c0_4, %c0_5] : memref<512x512xf32, #tpu.memory_space<vmem>>, vector<512x512xf32>
    %cst = arith.constant dense<0.000000e+00> : vector<256x512xf32>
    %6 = tpu.matmul %4, %5, %cst {dimension_numbers = #tpu.dot_dimension_numbers<[1], [0], [0], [1], [0, 0, 1, 1], [], []>} : vector<256x512xf32>, vector<512x512xf32>, vector<256x512xf32> -> vector<256x512xf32>
    %7 = arith.addf %3, %6 : vector<256x512xf32>
    %c0_6 = arith.constant 0 : index
    %c0_7 = arith.constant 0 : index
    %8 = vector.load %arg10[%c0_6, %c0_7] : memref<256x512xf32, #tpu.memory_space<vmem>>, vector<256x512xf32>
    tpu.vector_store %arg10[%c0_6, %c0_7], %7 {strides = array<i32>} : memref<256x512xf32, #tpu.memory_space<vmem>>, vector<256x512xf32>,
    %c1_i32 = arith.constant 1 : i32
    %9 = arith.cmpi eq, %arg1, %c1_i32 : i32
    %10 = arith.extui %9 : i1 to i32
    %c0_i32_8 = arith.constant 0 : i32
    %11 = arith.cmpi ne, %10, %c0_i32_8 : i32
    scf.if %11 {
      %c0_9 = arith.constant 0 : index
      %c0_10 = arith.constant 0 : index
      %12 = vector.load %arg10[%c0_9, %c0_10] : memref<256x512xf32, #tpu.memory_space<vmem>>, vector<256x512xf32>
      %c0_11 = arith.constant 0 : index
      %c0_12 = arith.constant 0 : index
      %13 = vector.load %arg4[%c0_11, %c0_12] : memref<1x512xf32, #tpu.memory_space<vmem>>, vector<1x512xf32>
      %14 = vector.broadcast %13 : vector<1x512xf32> to vector<256x512xf32>
      %15 = arith.addf %12, %14 : vector<256x512xf32>
      %cst_13 = arith.constant 0.000000e+00 : f32
      %16 = vector.broadcast %cst_13 : f32 to vector<256x512xf32>
      %17 = arith.maximumf %15, %16 : vector<256x512xf32>
      %c0_14 = arith.constant 0 : index
      %c0_15 = arith.constant 0 : index
      %18 = vector.load %arg5[%c0_14, %c0_15] : memref<64x512xf32, #tpu.memory_space<vmem>>, vector<64x512xf32>
      %cst_16 = arith.constant dense<0.000000e+00> : vector<64x256xf32>
      %19 = tpu.matmul %18, %17, %cst_16 {dimension_numbers = #tpu.dot_dimension_numbers<[1], [1], [0], [0], [0, 0, 1, 0], [], []>} : vector<64x512xf32>, vector<256x512xf32>, vector<64x256xf32> -> vector<64x256xf32>
      %c0_17 = arith.constant 0 : index
      %c0_18 = arith.constant 0 : index
      %20 = vector.load %arg6[%c0_17, %c0_18] : memref<64x1xf32, #tpu.memory_space<vmem>>, vector<64x1xf32>
      %21 = vector.broadcast %20 : vector<64x1xf32> to vector<64x256xf32>
      %22 = arith.addf %19, %21 : vector<64x256xf32>
      %cst_19 = arith.constant 0.000000e+00 : f32
      %23 = vector.broadcast %cst_19 : f32 to vector<64x256xf32>
      %24 = arith.maximumf %22, %23 : vector<64x256xf32>
      %c0_20 = arith.constant 0 : index
      %c0_21 = arith.constant 0 : index
      %25 = vector.load %arg7[%c0_20, %c0_21] : memref<64x1xf32, #tpu.memory_space<vmem>>, vector<64x1xf32>
      %26 = vector.broadcast %25 : vector<64x1xf32> to vector<64x256xf32>
      %27 = arith.mulf %24, %26 : vector<64x256xf32>
      %cst_22 = arith.constant dense<0.000000e+00> : vector<256xf32>
      %28 = vector.multi_reduction <add>, %27, %cst_22 [0] : vector<64x256xf32> to vector<256xf32>
      %29 = vector.shape_cast %28 : vector<256xf32> to vector<1x256xf32>
      %c0_23 = arith.constant 0 : index
      %30 = memref.load %arg8[%c0_23] : memref<1xf32, #tpu.memory_space<smem>>
      %31 = vector.broadcast %30 : f32 to vector<1x256xf32>
      %32 = arith.addf %29, %31 : vector<1x256xf32>
      %c0_24 = arith.constant 0 : index
      %c0_25 = arith.constant 0 : index
      %33 = vector.load %arg9[%c0_24, %c0_25] : memref<1x256xf32, #tpu.memory_space<vmem>>, vector<1x256xf32>
      tpu.vector_store %arg9[%c0_24, %c0_25], %32 {strides = array<i32>} : memref<1x256xf32, #tpu.memory_space<vmem>>, vector<1x256xf32>,
    } else {
    }
    return
  }
  func.func @transform_0(%arg0: i32, %arg1: i32) -> (i32, i32) {
    %c0_i32 = arith.constant 0 : i32
    return %arg0, %arg1 : i32, i32
  }
  func.func @transform_1(%arg0: i32, %arg1: i32) -> (i32, i32) {
    %c0_i32 = arith.constant 0 : i32
    %c0_i32_0 = arith.constant 0 : i32
    return %arg1, %c0_i32 : i32, i32
  }
  func.func @transform_2(%arg0: i32, %arg1: i32) -> (i32, i32) {
    %c0_i32 = arith.constant 0 : i32
    %c0_i32_0 = arith.constant 0 : i32
    %c0_i32_1 = arith.constant 0 : i32
    return %c0_i32, %c0_i32_0 : i32, i32
  }
  func.func @transform_3(%arg0: i32, %arg1: i32) -> (i32, i32) {
    %c0_i32 = arith.constant 0 : i32
    %c0_i32_0 = arith.constant 0 : i32
    %c0_i32_1 = arith.constant 0 : i32
    return %c0_i32, %c0_i32_0 : i32, i32
  }
  func.func @transform_4(%arg0: i32, %arg1: i32) -> (i32, i32) {
    %c0_i32 = arith.constant 0 : i32
    %c0_i32_0 = arith.constant 0 : i32
    %c0_i32_1 = arith.constant 0 : i32
    return %c0_i32, %c0_i32_0 : i32, i32
  }
  func.func @transform_5(%arg0: i32, %arg1: i32) -> (i32, i32) {
    %c0_i32 = arith.constant 0 : i32
    %c0_i32_0 = arith.constant 0 : i32
    %c0_i32_1 = arith.constant 0 : i32
    return %c0_i32, %c0_i32_0 : i32, i32
  }
  func.func @transform_6(%arg0: i32, %arg1: i32) -> i32 {
    %c0_i32 = arith.constant 0 : i32
    %c0_i32_0 = arith.constant 0 : i32
    return %c0_i32 : i32
  }
  func.func @transform_7(%arg0: i32, %arg1: i32) -> (i32, i32) {
    %c0_i32 = arith.constant 0 : i32
    %c0_i32_0 = arith.constant 0 : i32
    return %c0_i32, %arg0 : i32, i32
  }
}

</mosaic_0001>

<bundles_post_ra>
// kernel: tpu_custom_call.1
= control target key start
LH: loop header
LB: loop body
LE: loop exit
PB: predicated region body
PF: predicated region fallthrough
CT: control target
= control target key end

     0   :  { %s5494_s0 = inlined_call_operand.hbm [shape: f32[512,1024], index: 0, kind: input, shape index: {}]   ;;  %s5495_s1 = inlined_call_operand.hbm [shape: f32[1024,512], index: 1, kind: input, shape index: {}]   ;;  %s5496_s2 = inlined_call_operand.hbm [shape: f32[1,512], index: 2, kind: input, shape index: {}]   ;;  %s5497_s3 = inlined_call_operand.hbm [shape: f32[64,512], index: 3, kind: input, shape index: {}]   ;;  %s5498_s4 = inlined_call_operand.vmem [shape: f32[64,1], index: 4, kind: input, shape index: {}]   ;;  %s5499_s5 = inlined_call_operand.vmem [shape: f32[64,1], index: 5, kind: input, shape index: {}]   ;;  %s5500_s6 = inlined_call_operand.<no memory space> [shape: f32[1], index: 6, kind: input, shape index: {}]   ;;  %s5501_s7 = inlined_call_operand.hbm [shape: f32[1,512], index: 7, kind: output, shape index: {}]  }
   0x1   :  { %5524 = sst [smem:[#allocation26_spill]] %s5494_s0 }
   0x2   :  { %5525 = sst [smem:[#allocation27_spill]] %s5496_s2 }
   0x3   :  { %5526 = sst [smem:[#allocation28_spill]] %s5497_s3 }
   0x4   :  { %5527 = sst [smem:[#allocation29_spill]] %s5498_s4 }
   0x5   :  { %5528 = sst [smem:[#allocation30_spill]] %s5499_s5 }
   0x6   :  { %5529 = sst [smem:[#allocation31_spill]] %s5501_s7 }
   0x7   :  { %12 = sst [smem:[#allocation3]] %s5500_s6 }
   0x8   :  { %13 = vsyncpa [#allocation5], 0 }
   0x9   :  { %15 = vsyncpa [#allocation5 + $0x1], 0 }
   0xa   :  { %16 = vsyncpa [#allocation8], 0 }
   0xb   :  { %18 = vsyncpa [#allocation8 + $0x1], 0 }
   0xc   :  { %19 = vsyncpa [#allocation11], 0 }
   0xd   :  { %20 = vsyncpa [#allocation6], 0 }
   0xe   :  { %22 = vsyncpa [#allocation6 + $0x1], 0  ;;  %s4371_s26 = smov 0   ;;  %s4373_s27 = smov 0  }
   0xf   :  { %s4375_s28 = smov 0   ;;  %s4377_s29 = smov 0  }
  0x10   :  { %s4379_s30 = smov 0   ;;  %s4381_s8 = smov 0  }
  0x11   :  { %s4383_s6 = smov 0   ;;  %s4385_s9 = smov 0  }
  0x12   :  { %s4387_s10 = smov 0   ;;  %s4389_s11 = smov 0  }
  0x13   :  { %s4391_s12 = smov 0   ;;  %s4393_s13 = smov 0  }
  0x14   :  { %s4395_s14 = smov 0   ;;  %s4397_s15 = smov 0  }
  0x15 LB: > { %5530 = sst [smem:[#allocation18_spill]] %s4263_s26  ;;  %s4438_s16 = sadd.s32 4294967295, %s4315_s15   ;;  %s4315_s15 = sphi %s4397_s15, %s28_s15   ;;  %s4311_s14 = sphi %s4395_s14, %s5591_s14   ;;  %s4307_s13 = sphi %s4393_s13, %s5590_s13   ;;  %s4303_s12 = sphi %s4391_s12, %s5589_s12   ;;  %s4299_s11 = sphi %s4389_s11, %s5588_s11   ;;  %s4295_s10 = sphi %s4387_s10, %s5587_s10   ;;  %s4291_s9 = sphi %s4385_s9, %s5586_s9   ;;  %s4287_s6 = sphi %s4383_s6, %s5585_s6   ;;  %s4283_s8 = sphi %s4381_s8, %s5584_s8   ;;  %s4279_s30 = sphi %s4379_s30, %s5583_s30   ;;  %s4275_s29 = sphi %s4377_s29, %s5582_s29   ;;  %s4271_s28 = sphi %s4375_s28, %s5581_s28   ;;  %s4267_s27 = sphi %s4373_s27, %s5580_s27   ;;  %s4263_s26 = sphi %s4371_s26, %s5576_s26  }
  0x16   : > { %5531 = sst [smem:[#allocation19_spill]] %s4267_s27  ;;  %s3306_s17 = sadd.s32 4294967294, %s4315_s15  }
  0x17   : > { %5532 = sst [smem:[#allocation20_spill]] %s4299_s11  ;;  %p62_p0 = scmp.ne.s32.totalorder %s4291_s9, %s4287_s6 }
  0x18   : > { %5533 = sst [smem:[#allocation21_spill]] %s4303_s12  ;;  %p5507_p1 = scmp.eq.s32.totalorder %s4438_s16, 0 }
  0x19   : > { %p88_p2 = scmp.ne.s32.totalorder %s4279_s30, %s4275_s29  ;;  %p216_p4 = scmp.ne.s32.totalorder %s4271_s28, %s4267_s27 }
  0x1a   : > { %p4447_p3 = por %p5507_p1, %p62_p0  ;;  %p217_p6 = scmp.eq.s32.totalorder %s4438_s16, 3 }
  0x1b   : > { %p4455_p5 = por %p88_p2, %p5507_p1  ;;  %p222_p7 = scmp.ne.s32.totalorder %s4267_s27, %s4263_s26 }
  0x1c   : > { %s5534_s19 = scalar_select %p4447_p3, 1, 0 }
  0x1d   : > { %s5535_s20 = scalar_select %p4455_p5, 1, 0 }
  0x1e   : > { %p223_p8 = scmp.eq.s32.totalorder %s3306_s17, 3  ;;  %p4462_p9 = por %p217_p6, %p216_p4 }
  0x1f   : > { %p3307_p10 = scmp.ge.s32.totalorder %s4315_s15, 1  ;;  %p230_p12 = scmp.lt.s32.totalorder %s4315_s15, 5 }
  0x20   : > { %s5536_s21 = scalar_select %p4462_p9, 1, 0 }
  0x21   : > { %p4467_p11 = por %p223_p8, %p222_p7  ;;  %p4472_p13 = pnand %p3307_p10, %p230_p12 }
  0x22   : > { %5537 = sst [smem:[#allocation22_spill]] %s5536_s21  ;;  %s4317_s24 = smov [#allocation9]  }
  0x23   : > { %s5538_s22 = scalar_select %p4467_p11, 1, 0 }
  0x24   : > { %s5540_s23 = scalar_select %p4472_p13, 1, 0 }
  0x25   : > { %5539 = sst [smem:[#allocation23_spill]] %s5538_s22  ;;  %s243_s25 = sshll.u32 %s4317_s24, 4  ;;  %s244_s25 = int_to_ptr.vmem [resolvable:$true] %s243_s25 }
  0x26   : > { %p3895_p0 = pneg %p4472_p13  ;;  %s4318_s29 = smov [#allocation10]  }
  0x27   : > { %s253_s6 = sshll.u32 %s4318_s29, 4  ;;  %s5542_s2 = sld [smem:[#allocation27_spill]]  ;;  %s4484_s6 = int_to_ptr.vmem [resolvable:$true] %s253_s6 }
  0x28   : > { %p4480_p2 = pnand %p3895_p0, %p5507_p1 }
  0x2a   : > { %p4043_p6 = pneg %p4480_p2 }
  0x2d   : > { %s4041_s26 = scalar_lea.hbm %s5542_s2, 64 }
  0x2e   : > { %p4042_p4 = scmp.ne.s32.totalorder %s5542_s2, %s4041_s26  ;;  %p4048_p10 = scmp.lt.u32.totalorder %s4041_s26, %s5542_s2 }
  0x30   : > { %p4044_p7 = pnand %p4043_p6, %p4042_p4 }
  0x32   : > { %p4045_p8 = pneg %p4044_p7 }
  0x34   : > { %p4050_p12 = pnand %p4048_p10, %p4045_p8 }
  0x36   : > { %4053 = shalt.err (!%p4050_p12)
}
  0x37   : > { %s4054_s12 = scalar_lea.vmem %s244_s25, 64  ;;  %p4062_p9 = scmp.lt.s32.totalorder %s244_s25, %s244_s25 }
  0x38   : > { %p4055_p0 = scmp.ne.s32.totalorder %s244_s25, %s4054_s12  ;;  %p4063_p5 = scmp.lt.s32.totalorder %s4054_s12, %s4054_s12 }
  0x3a   : > { %p4057_p1 = pnand %p4055_p0, %p4043_p6  ;;  %p4064_p3 = por %p4063_p5, %p4062_p9 }
  0x3c   : > { %p4058_p11 = pneg %p4057_p1 }
  0x3e   : > { %p4065_p13 = pnand %p4064_p3, %p4058_p11 }
  0x40   : > { %4068 = shalt.err (!%p4065_p13)
}
  0x41   : > { %3898 = dma.hbm_to_vmem [thread:$0]  (!%p4480_p2), %s5542_s2, 64, %s244_s25, [#allocation8]  }
  0x42   : > { %s5543_s3 = sld [smem:[#allocation28_spill]] }
  0x48   : > { %s4069_s22 = scalar_lea.hbm %s5543_s3, 4096 }
  0x49   : > { %p4070_p1 = scmp.ne.s32.totalorder %s5543_s3, %s4069_s22  ;;  %p4076_p9 = scmp.lt.u32.totalorder %s4069_s22, %s5543_s3 }
  0x4b   : > { %p4072_p5 = pnand %p4070_p1, %p4043_p6 }
  0x4d   : > { %p4073_p3 = pneg %p4072_p5 }
  0x4f   : > { %p4078_p11 = pnand %p4076_p9, %p4073_p3 }
  0x51   : > { %4081 = shalt.err (!%p4078_p11)
}
  0x52   : > { %s4082_s25 = scalar_lea.vmem %s4484_s6, 4096  ;;  %p4090_p8 = scmp.lt.s32.totalorder %s4484_s6, %s4484_s6 }
  0x53   : > { %p4083_p13 = scmp.ne.s32.totalorder %s4484_s6, %s4082_s25  ;;  %p4091_p10 = scmp.lt.s32.totalorder %s4082_s25, %s4082_s25 }
  0x55   : > { %p4085_p4 = pnand %p4083_p13, %p4043_p6  ;;  %p4092_p12 = por %p4091_p10, %p4090_p8 }
  0x57   : > { %p4086_p7 = pneg %p4085_p4 }
  0x59   : > { %p4093_p0 = pnand %p4092_p12, %p4086_p7 }
  0x5b   : > { %4096 = shalt.err (!%p4093_p0)
}
  0x5c   : > { %s5513_s5 = smov 512   ;;  %s5515_s7 = smov 32  }
  0x5d   : > { %3901 = dma.hbm_to_vmem [thread:$0]  (!%p4480_p2), %s5543_s3, 4096, %s4484_s6, [#allocation11], %s5513_s5, %s5513_s5, %s5515_s7  }
  0x5e   : > { %s37_s21 = sadd.s32 1, %s4307_s13  ;;  %s40_s22 = sadd.s32 1, %s4311_s14 }
  0x5f   : > { %p38_p6 = scmp.ge.s32.totalorder %s37_s21, 2  ;;  %s49_s24 = sadd.s32 1, %s4295_s10 }
  0x60   : > { %p56_p1 = scmp.ne.s32.totalorder %s4295_s10, %s4291_s9  ;;  %p5523_p5 = scmp.eq.s32.totalorder %s4315_s15, 0 }
  0x61   : > { %s5593_s21 = smov (%p38_p6, %s37_s21), 0  ;;  %s5595_s22 = smov (!%p38_p6, %s40_s22), %s4311_s14 }
  0x62   : > { %5544 = sst [smem:[#allocation24_spill]] %s5593_s21  ;;  %s4547_s17 = ssub.s32 %s4307_s13, %s5593_s21 }
  0x63   : > { %p4551_p2 = por %p5523_p5, %p56_p1  ;;  %p42_p3 = scmp.ge.s32.totalorder %s5595_s22, 2 }
  0x64   : > { %p73_p9 = scmp.eq.s32.totalorder %s4547_s17, 0  ;;  %p5522_p11 = scmp.lt.s32.totalorder %s4315_s15, 4 }
  0x65   : > { %s276_s29 = sand.u32 1, %s4295_s10   ;;  %s5597_s22 = smov (%p42_p3, %s5595_s22), 0 }
  0x66   : > { %5546 = sst [smem:[#allocation25_spill]] %s5597_s22  ;;  %s3311_s12 = sshll.u32 %s276_s29, 10 }
  0x67   : > { %s44_s25 = ssub.s32 %s4311_s14, %s5597_s22  ;;  %s3313_s26 = sshll.u32 %s4307_s13, 2 }
  0x68   : > { %s46_s18 = sor.u32 %s4547_s17, %s44_s25  ;;  %p204_p13 = scmp.eq.s32.totalorder %s44_s25, 0 }
  0x69   : > { %p47_p4 = scmp.eq.s32.totalorder %s46_s18, 0  ;;  %s5547_s5 = sadd.s32 1, %s4271_s28 }
  0x6a   : > { %s4567_s7 = scalar_select %p204_p13, %s4271_s28, %s5547_s5  }
  0x6b   : > { %s4570_s2 = scalar_select %p47_p4, %s4295_s10, %s49_s24  }
  0x6c   : > { %s3333_s3 = sshll.u32 %s4311_s14, 8  ;;  %s280_s21 = scalar_lea.vmem [#allocation4], %s3311_s12 }
  0x6d   : > { %s290_s4 = sshll.u32 %s280_s21, 4  ;;  %s287_s11 = sadd.s32 %s3333_s3, %s3313_s26  ;;  %s4573_s4 = int_to_ptr.vmem [resolvable:$true] %s290_s4 }
  0x6e   : > { %s3315_s27 = sshll.u32 %s287_s11, 7  ;;  %p4579_p7 = pnand %p5522_p11, %p4551_p2 }
  0x6f   : > { %s5549_s0 = sld [smem:[#allocation26_spill]]  ;;  %s4588_s3 = scalar_lea.sflag [#allocation5], %s276_s29 }
  0x70   : > { %p4099_p10 = pneg %p4579_p7 }
  0x75   : > { %s4586_s5 = scalar_lea.hbm %s5549_s0, %s3315_s27  ;;  %s4102_s6 = scalar_lea.hbm %s5549_s0, 65536 }
  0x76   : > { %s4097_s11 = scalar_lea.hbm %s4586_s5, 16384  ;;  %p4103_p6 = scmp.lt.u32.totalorder %s4586_s5, %s5549_s0 }
  0x77   : > { %p4098_p8 = scmp.ne.s32.totalorder %s4586_s5, %s4097_s11  ;;  %p4104_p1 = scmp.lt.u32.totalorder %s4102_s6, %s4097_s11 }
  0x78   : > { %p4106_p3 = scmp.lt.u32.totalorder %s4097_s11, %s4586_s5 }
  0x79   : > { %p4100_p12 = pnand %p4099_p10, %p4098_p8  ;;  %p4105_p2 = por %p4104_p1, %p4103_p6 }
  0x7b   : > { %p4101_p0 = pneg %p4100_p12  ;;  %p4107_p13 = por %p4106_p3, %p4105_p2 }
  0x7d   : > { %p4108_p4 = pnand %p4107_p13, %p4101_p0 }
  0x7f   : > { %4111 = shalt.err (!%p4108_p4)
}
  0x80   : > { %s4112_s29 = scalar_lea.vmem %s4573_s4, 16384  ;;  %s4321_s26 = smov [#allocation4]  }
  0x81   : > { %p4113_p8 = scmp.ne.s32.totalorder %s4573_s4, %s4112_s29  ;;  %s4117_s25 = sshll.u32 %s4321_s26, 4  ;;  %s4118_s25 = int_to_ptr.vmem [resolvable:$false] %s4117_s25 }
  0x82   : > { %s4119_s18 = scalar_lea.vmem %s4118_s25, 32768  ;;  %p4120_p5 = scmp.lt.s32.totalorder %s4573_s4, %s4118_s25 }
  0x83   : > { %p4115_p12 = pnand %p4113_p8, %p4099_p10  ;;  %p4121_p6 = scmp.lt.s32.totalorder %s4119_s18, %s4112_s29 }
  0x85   : > { %p4116_p11 = pneg %p4115_p12  ;;  %p4122_p1 = por %p4121_p6, %p4120_p5 }
  0x87   : > { %p4123_p2 = pnand %p4122_p1, %p4116_p11 }
  0x89   : > { %4126 = shalt.err (!%p4123_p2)
}
  0x8a   : > { %s4322_s11 = smov 1024   ;;  %s5550_s21 = smov 32  }
  0x8b   : > { %s5551_s24 = smov 512   ;;  %s300_s6 = sand.u32 1, %s4315_s15  }
  0x8c   : > { %3905 = dma.hbm_to_vmem [thread:$0]  (!%p4579_p7), %s4586_s5, 16384, %s4573_s4, %s4588_s3, %s4322_s11, %s5551_s24, %s5550_s21  }
  0x8d   : > { %s75_s27 = sadd.s32 1, %s4283_s8  ;;  %p82_p5 = scmp.ne.s32.totalorder %s4283_s8, %s4279_s30 }
  0x8e   : > { %s4625_s22 = scalar_select %p73_p9, %s4283_s8, %s75_s27  }
  0x8f   : > { %p5552_p11 = scmp.eq.s32.totalorder %s4315_s15, 0  ;;  %s302_s12 = sand.u32 1, %s4283_s8  }
  0x90   : > { %s3335_s29 = sshll.u32 %s4307_s13, 15  ;;  %s3316_s26 = sshll.u32 %s302_s12, 11 }
  0x91   : > { %p84_p10 = por %p82_p5, %p5552_p11  ;;  %s4634_s0 = scalar_lea.hbm %s5495_s1, %s3335_s29 }
  0x92   : > { %p5553_p0 = scmp.lt.s32.totalorder %s4315_s15, 4  ;;  %s304_s17 = scalar_lea.vmem [#allocation7], %s3316_s26 }
  0x93   : > { %s312_s5 = sshll.u32 %s304_s17, 4  ;;  %s4644_s3 = scalar_lea.sflag [#allocation8], %s300_s6  ;;  %s4642_s5 = int_to_ptr.vmem [resolvable:$true] %s312_s5 }
  0x94   : > { %p4638_p7 = pnand %p5553_p0, %p84_p10  ;;  %s4127_s11 = scalar_lea.hbm %s4634_s0, 32768 }
  0x95   : > { %p4128_p9 = scmp.ne.s32.totalorder %s4634_s0, %s4127_s11  ;;  %s4132_s29 = scalar_lea.hbm %s5495_s1, 65536 }
  0x96   : > { %p4129_p3 = pneg %p4638_p7  ;;  %p4133_p8 = scmp.lt.u32.totalorder %s4634_s0, %s5495_s1 }
  0x97   : > { %p4134_p12 = scmp.lt.u32.totalorder %s4132_s29, %s4127_s11  ;;  %p4136_p1 = scmp.lt.u32.totalorder %s4127_s11, %s4634_s0 }
  0x98   : > { %p4130_p13 = pnand %p4129_p3, %p4128_p9 }
  0x99   : > { %p4135_p6 = por %p4134_p12, %p4133_p8 }
  0x9a   : > { %p4131_p4 = pneg %p4130_p13 }
  0x9b   : > { %p4137_p2 = por %p4136_p1, %p4135_p6 }
  0x9d   : > { %p4138_p5 = pnand %p4137_p2, %p4131_p4 }
  0x9f   : > { %4141 = shalt.err (!%p4138_p5)
}
  0xa0   : > { %s4142_s6 = scalar_lea.vmem %s4642_s5, 32768  ;;  %s4323_s26 = smov [#allocation7]  }
  0xa1   : > { %p4143_p11 = scmp.ne.s32.totalorder %s4642_s5, %s4142_s6  ;;  %s4147_s17 = sshll.u32 %s4323_s26, 4  ;;  %s4148_s17 = int_to_ptr.vmem [resolvable:$false] %s4147_s17 }
  0xa2   : > { %s4149_s27 = scalar_lea.vmem %s4148_s17, 65536  ;;  %p4150_p9 = scmp.lt.s32.totalorder %s4642_s5, %s4148_s17 }
  0xa3   : > { %p4145_p10 = pnand %p4143_p11, %p4129_p3  ;;  %p4151_p13 = scmp.lt.s32.totalorder %s4149_s27, %s4142_s6 }
  0xa5   : > { %p4146_p0 = pneg %p4145_p10  ;;  %p4152_p8 = por %p4151_p13, %p4150_p9 }
  0xa7   : > { %p4153_p12 = pnand %p4152_p8, %p4146_p0 }
  0xa9   : > { %4156 = shalt.err (!%p4153_p12)
}
  0xaa   : > { %3908 = dma.hbm_to_vmem [thread:$0]  (!%p4638_p7), %s4634_s0, 32768, %s4642_s5, %s4644_s3, %s5551_s24, %s5551_s24, %s5550_s21  }
  0xab   : > { %p5555_p3 = scmp.ne.s32.totalorder %s5540_s23, 0 }
  0xac   : > { %s326_s11 = sand.u32 (!%p5555_p3), 1, %s4291_s9   ;;  %p5556_p4 = scmp.ne.s32.totalorder (!%p5555_p3), %s5534_s19, 0 }
  0xad   : > { %324 = sbr.rel (%p5555_p3) target bundleno = 1223 (0x4c7), region = 48  ;;  %s3321_s12 = sshll.u32 (!%p5555_p3), %s326_s11, 10 }
  0xae   : > { %s327_s29 = scalar_lea.sflag (!%p5555_p3), [#allocation5], %s326_s11  ;;  %s4678_s25 = scalar_lea.vmem (!%p5555_p3), [#allocation4], %s3321_s12 }
  0xb4   : > { %4242 = dma.done.wait (%p5556_p4), %s327_s29, 16384  }
  0xb5   : > { %4244 = vsyncadd (%p5556_p4), %s327_s29, 4294950912  ;;  %s335_s4 = sand.u32 1, %s4438_s16   ;;  %s337_s0 = sand.u32 1, %s4279_s30  }
  0xb6   : > { %s3322_s21 = sshll.u32 %s337_s0, 11  ;;  %s336_s23 = scalar_lea.sflag [#allocation8], %s335_s4 }
  0xb7   : > { %s4686_s24 = scalar_lea.vmem [#allocation7], %s3322_s21  ;;  %p5557_p7 = scmp.ne.s32.totalorder %s5535_s20, 0 }
  0xb9   : > { %4246 = dma.done.wait (%p5557_p7), %s336_s23, 32768  }
  0xba   : > { %4248 = vsyncadd (%p5557_p7), %s336_s23, 4294934528  ;;  %p5558_p6 = scmp.eq.s32.totalorder %s4438_s16, 0 }
  0xbc   : > { %4250 = dma.done.wait (%p5558_p6), [#allocation8], 64   ;;  %p5559_p1 = pmov %p5558_p6 }
  0xbe   : > { %4252 = vsyncadd (%p5559_p1), [#allocation8], 4294967232  ;;  %p5560_p2 = pmov %p5559_p1 }
  0xbf   : > { %p5561_p5 = pmov %p5559_p1 }
  0xc0   : > { %4254 = dma.done.wait (%p5560_p2), [#allocation11], 4096  }
  0xc1   : > { %4256 = vsyncadd (%p5561_p5), [#allocation11], 4294963200  ;;  %s5562_s19 = sld [smem:[#allocation19_spill]]  ;;  %s5563_s18 = sld [smem:[#allocation20_spill]] }
  0xc7   : > { %s380_s5 = sand.u32 1, %s5562_s19   ;;  %p3326_p11 = scmp.ne.s32.totalorder %s5563_s18, 0 }
  0xc8   : > { %s4703_s3 = sshll.u32 %s380_s5, 1  ;;  %v4324_v0 = vmov (!%p3326_p11), 0.0  }
  0xc9   : > { %s382_s20 = scalar_lea.vmem [#allocation12], %s4703_s3  ;;  %390 = sbr.rel (%p3326_p11) target bundleno = 265 (0x109), region = 68  ;;  %391 = vst [vmem:[#allocation2] sm:$0xff] (!%p3326_p11), %v4324_v0  ;;  %392 = vst [vmem:[#allocation2 + $0x8] sm:$0xff] (!%p3326_p11), %v4324_v0 }
  0xca   : > { %393 = vst [vmem:[#allocation2 + $0x10] sm:$0xff] (!%p3326_p11), %v4324_v0  ;;  %394 = vst [vmem:[#allocation2 + $0x18] sm:$0xff] (!%p3326_p11), %v4324_v0 }
  0xcb   : > { %395 = vst [vmem:[#allocation2 + $0x20] sm:$0xff] (!%p3326_p11), %v4324_v0  ;;  %396 = vst [vmem:[#allocation2 + $0x28] sm:$0xff] (!%p3326_p11), %v4324_v0 }
  0xcc   : > { %397 = vst [vmem:[#allocation2 + $0x30] sm:$0xff] (!%p3326_p11), %v4324_v0  ;;  %398 = vst [vmem:[#allocation2 + $0x38] sm:$0xff] (!%p3326_p11), %v4324_v0 }
  0xcd   : > { %399 = vst [vmem:[#allocation2 + $0x40] sm:$0xff] (!%p3326_p11), %v4324_v0  ;;  %400 = vst [vmem:[#allocation2 + $0x48] sm:$0xff] (!%p3326_p11), %v4324_v0 }
  0xce   : > { %401 = vst [vmem:[#allocation2 + $0x50] sm:$0xff] (!%p3326_p11), %v4324_v0  ;;  %402 = vst [vmem:[#allocation2 + $0x58] sm:$0xff] (!%p3326_p11), %v4324_v0 }
  0xcf   : > { %403 = vst [vmem:[#allocation2 + $0x60] sm:$0xff] (!%p3326_p11), %v4324_v0  ;;  %404 = vst [vmem:[#allocation2 + $0x68] sm:$0xff] (!%p3326_p11), %v4324_v0 }
  0xd0   : > { %405 = vst [vmem:[#allocation2 + $0x70] sm:$0xff] %v4324_v0  ;;  %406 = vst [vmem:[#allocation2 + $0x78] sm:$0xff] %v4324_v0 }
  0xd1   : > { %407 = vst [vmem:[#allocation2 + $0x80] sm:$0xff] %v4324_v0  ;;  %408 = vst [vmem:[#allocation2 + $0x88] sm:$0xff] %v4324_v0 }
  0xd2   : > { %409 = vst [vmem:[#allocation2 + $0x90] sm:$0xff] %v4324_v0  ;;  %410 = vst [vmem:[#allocation2 + $0x98] sm:$0xff] %v4324_v0 }
  0xd3   : > { %411 = vst [vmem:[#allocation2 + $0xa0] sm:$0xff] %v4324_v0  ;;  %412 = vst [vmem:[#allocation2 + $0xa8] sm:$0xff] %v4324_v0 }
  0xd4   : > { %413 = vst [vmem:[#allocation2 + $0xb0] sm:$0xff] %v4324_v0  ;;  %414 = vst [vmem:[#allocation2 + $0xb8] sm:$0xff] %v4324_v0 }
  0xd5   : > { %415 = vst [vmem:[#allocation2 + $0xc0] sm:$0xff] %v4324_v0  ;;  %416 = vst [vmem:[#allocation2 + $0xc8] sm:$0xff] %v4324_v0 }
  0xd6   : > { %417 = vst [vmem:[#allocation2 + $0xd0] sm:$0xff] %v4324_v0  ;;  %418 = vst [vmem:[#allocation2 + $0xd8] sm:$0xff] %v4324_v0 }
  0xd7   : > { %419 = vst [vmem:[#allocation2 + $0xe0] sm:$0xff] %v4324_v0  ;;  %420 = vst [vmem:[#allocation2 + $0xe8] sm:$0xff] %v4324_v0 }
  0xd8   : > { %421 = vst [vmem:[#allocation2 + $0xf0] sm:$0xff] %v4324_v0  ;;  %422 = vst [vmem:[#allocation2 + $0xf8] sm:$0xff] %v4324_v0 }
  0xd9   : > { %423 = vst [vmem:[#allocation2 + $0x100] sm:$0xff] %v4324_v0  ;;  %424 = vst [vmem:[#allocation2 + $0x108] sm:$0xff] %v4324_v0 }
  0xda   : > { %425 = vst [vmem:[#allocation2 + $0x110] sm:$0xff] %v4324_v0  ;;  %426 = vst [vmem:[#allocation2 + $0x118] sm:$0xff] %v4324_v0 }
  0xdb   : > { %427 = vst [vmem:[#allocation2 + $0x120] sm:$0xff] %v4324_v0  ;;  %428 = vst [vmem:[#allocation2 + $0x128] sm:$0xff] %v4324_v0 }
  0xdc   : > { %429 = vst [vmem:[#allocation2 + $0x130] sm:$0xff] %v4324_v0  ;;  %430 = vst [vmem:[#allocation2 + $0x138] sm:$0xff] %v4324_v0 }
  0xdd   : > { %431 = vst [vmem:[#allocation2 + $0x140] sm:$0xff] %v4324_v0  ;;  %432 = vst [vmem:[#allocation2 + $0x148] sm:$0xff] %v4324_v0 }
  0xde   : > { %433 = vst [vmem:[#allocation2 + $0x150] sm:$0xff] %v4324_v0  ;;  %434 = vst [vmem:[#allocation2 + $0x158] sm:$0xff] %v4324_v0 }
  0xdf   : > { %435 = vst [vmem:[#allocation2 + $0x160] sm:$0xff] %v4324_v0  ;;  %436 = vst [vmem:[#allocation2 + $0x168] sm:$0xff] %v4324_v0 }
  0xe0   : > { %437 = vst [vmem:[#allocation2 + $0x170] sm:$0xff] %v4324_v0  ;;  %438 = vst [vmem:[#allocation2 + $0x178] sm:$0xff] %v4324_v0 }
  0xe1   : > { %439 = vst [vmem:[#allocation2 + $0x180] sm:$0xff] %v4324_v0  ;;  %440 = vst [vmem:[#allocation2 + $0x188] sm:$0xff] %v4324_v0 }
  0xe2   : > { %441 = vst [vmem:[#allocation2 + $0x190] sm:$0xff] %v4324_v0  ;;  %442 = vst [vmem:[#allocation2 + $0x198] sm:$0xff] %v4324_v0 }
  0xe3   : > { %443 = vst [vmem:[#allocation2 + $0x1a0] sm:$0xff] %v4324_v0  ;;  %444 = vst [vmem:[#allocation2 + $0x1a8] sm:$0xff] %v4324_v0 }
  0xe4   : > { %445 = vst [vmem:[#allocation2 + $0x1b0] sm:$0xff] %v4324_v0  ;;  %446 = vst [vmem:[#allocation2 + $0x1b8] sm:$0xff] %v4324_v0 }
  0xe5   : > { %447 = vst [vmem:[#allocation2 + $0x1c0] sm:$0xff] %v4324_v0  ;;  %448 = vst [vmem:[#allocation2 + $0x1c8] sm:$0xff] %v4324_v0 }
  0xe6   : > { %449 = vst [vmem:[#allocation2 + $0x1d0] sm:$0xff] %v4324_v0  ;;  %450 = vst [vmem:[#allocation2 + $0x1d8] sm:$0xff] %v4324_v0 }
  0xe7   : > { %451 = vst [vmem:[#allocation2 + $0x1e0] sm:$0xff] %v4324_v0  ;;  %452 = vst [vmem:[#allocation2 + $0x1e8] sm:$0xff] %v4324_v0 }
  0xe8   : > { %453 = vst [vmem:[#allocation2 + $0x1f0] sm:$0xff] %v4324_v0  ;;  %454 = vst [vmem:[#allocation2 + $0x1f8] sm:$0xff] %v4324_v0 }
  0xe9   : > { %455 = vst [vmem:[#allocation2 + $0x200] sm:$0xff] %v4324_v0  ;;  %456 = vst [vmem:[#allocation2 + $0x208] sm:$0xff] %v4324_v0 }
  0xea   : > { %457 = vst [vmem:[#allocation2 + $0x210] sm:$0xff] %v4324_v0  ;;  %458 = vst [vmem:[#allocation2 + $0x218] sm:$0xff] %v4324_v0 }
  0xeb   : > { %459 = vst [vmem:[#allocation2 + $0x220] sm:$0xff] %v4324_v0  ;;  %460 = vst [vmem:[#allocation2 + $0x228] sm:$0xff] %v4324_v0 }
  0xec   : > { %461 = vst [vmem:[#allocation2 + $0x230] sm:$0xff] %v4324_v0  ;;  %462 = vst [vmem:[#allocation2 + $0x238] sm:$0xff] %v4324_v0 }
  0xed   : > { %463 = vst [vmem:[#allocation2 + $0x240] sm:$0xff] %v4324_v0  ;;  %464 = vst [vmem:[#allocation2 + $0x248] sm:$0xff] %v4324_v0 }
  0xee   : > { %465 = vst [vmem:[#allocation2 + $0x250] sm:$0xff] %v4324_v0  ;;  %466 = vst [vmem:[#allocation2 + $0x258] sm:$0xff] %v4324_v0 }
  0xef   : > { %467 = vst [vmem:[#allocation2 + $0x260] sm:$0xff] %v4324_v0  ;;  %468 = vst [vmem:[#allocation2 + $0x268] sm:$0xff] %v4324_v0 }
  0xf0   : > { %469 = vst [vmem:[#allocation2 + $0x270] sm:$0xff] %v4324_v0  ;;  %470 = vst [vmem:[#allocation2 + $0x278] sm:$0xff] %v4324_v0 }
  0xf1   : > { %471 = vst [vmem:[#allocation2 + $0x280] sm:$0xff] %v4324_v0  ;;  %472 = vst [vmem:[#allocation2 + $0x288] sm:$0xff] %v4324_v0 }
  0xf2   : > { %473 = vst [vmem:[#allocation2 + $0x290] sm:$0xff] %v4324_v0  ;;  %474 = vst [vmem:[#allocation2 + $0x298] sm:$0xff] %v4324_v0 }
  0xf3   : > { %475 = vst [vmem:[#allocation2 + $0x2a0] sm:$0xff] %v4324_v0  ;;  %476 = vst [vmem:[#allocation2 + $0x2a8] sm:$0xff] %v4324_v0 }
  0xf4   : > { %477 = vst [vmem:[#allocation2 + $0x2b0] sm:$0xff] %v4324_v0  ;;  %478 = vst [vmem:[#allocation2 + $0x2b8] sm:$0xff] %v4324_v0 }
  0xf5   : > { %479 = vst [vmem:[#allocation2 + $0x2c0] sm:$0xff] %v4324_v0  ;;  %480 = vst [vmem:[#allocation2 + $0x2c8] sm:$0xff] %v4324_v0 }
  0xf6   : > { %481 = vst [vmem:[#allocation2 + $0x2d0] sm:$0xff] %v4324_v0  ;;  %482 = vst [vmem:[#allocation2 + $0x2d8] sm:$0xff] %v4324_v0 }
  0xf7   : > { %483 = vst [vmem:[#allocation2 + $0x2e0] sm:$0xff] %v4324_v0  ;;  %484 = vst [vmem:[#allocation2 + $0x2e8] sm:$0xff] %v4324_v0 }
  0xf8   : > { %485 = vst [vmem:[#allocation2 + $0x2f0] sm:$0xff] %v4324_v0  ;;  %486 = vst [vmem:[#allocation2 + $0x2f8] sm:$0xff] %v4324_v0 }
  0xf9   : > { %487 = vst [vmem:[#allocation2 + $0x300] sm:$0xff] %v4324_v0  ;;  %488 = vst [vmem:[#allocation2 + $0x308] sm:$0xff] %v4324_v0 }
  0xfa   : > { %489 = vst [vmem:[#allocation2 + $0x310] sm:$0xff] %v4324_v0  ;;  %490 = vst [vmem:[#allocation2 + $0x318] sm:$0xff] %v4324_v0 }
  0xfb   : > { %491 = vst [vmem:[#allocation2 + $0x320] sm:$0xff] %v4324_v0  ;;  %492 = vst [vmem:[#allocation2 + $0x328] sm:$0xff] %v4324_v0 }
  0xfc   : > { %493 = vst [vmem:[#allocation2 + $0x330] sm:$0xff] %v4324_v0  ;;  %494 = vst [vmem:[#allocation2 + $0x338] sm:$0xff] %v4324_v0 }
  0xfd   : > { %495 = vst [vmem:[#allocation2 + $0x340] sm:$0xff] %v4324_v0  ;;  %496 = vst [vmem:[#allocation2 + $0x348] sm:$0xff] %v4324_v0 }
  0xfe   : > { %497 = vst [vmem:[#allocation2 + $0x350] sm:$0xff] %v4324_v0  ;;  %498 = vst [vmem:[#allocation2 + $0x358] sm:$0xff] %v4324_v0 }
  0xff   : > { %499 = vst [vmem:[#allocation2 + $0x360] sm:$0xff] %v4324_v0  ;;  %500 = vst [vmem:[#allocation2 + $0x368] sm:$0xff] %v4324_v0 }
 0x100   : > { %501 = vst [vmem:[#allocation2 + $0x370] sm:$0xff] %v4324_v0  ;;  %502 = vst [vmem:[#allocation2 + $0x378] sm:$0xff] %v4324_v0 }
 0x101   : > { %503 = vst [vmem:[#allocation2 + $0x380] sm:$0xff] %v4324_v0  ;;  %504 = vst [vmem:[#allocation2 + $0x388] sm:$0xff] %v4324_v0 }
 0x102   : > { %505 = vst [vmem:[#allocation2 + $0x390] sm:$0xff] %v4324_v0  ;;  %506 = vst [vmem:[#allocation2 + $0x398] sm:$0xff] %v4324_v0 }
 0x103   : > { %507 = vst [vmem:[#allocation2 + $0x3a0] sm:$0xff] %v4324_v0  ;;  %508 = vst [vmem:[#allocation2 + $0x3a8] sm:$0xff] %v4324_v0 }
 0x104   : > { %509 = vst [vmem:[#allocation2 + $0x3b0] sm:$0xff] %v4324_v0  ;;  %510 = vst [vmem:[#allocation2 + $0x3b8] sm:$0xff] %v4324_v0 }
 0x105   : > { %511 = vst [vmem:[#allocation2 + $0x3c0] sm:$0xff] %v4324_v0  ;;  %512 = vst [vmem:[#allocation2 + $0x3c8] sm:$0xff] %v4324_v0 }
 0x106   : > { %513 = vst [vmem:[#allocation2 + $0x3d0] sm:$0xff] %v4324_v0  ;;  %514 = vst [vmem:[#allocation2 + $0x3d8] sm:$0xff] %v4324_v0 }
 0x107   : > { %515 = vst [vmem:[#allocation2 + $0x3e0] sm:$0xff] %v4324_v0  ;;  %516 = vst [vmem:[#allocation2 + $0x3e8] sm:$0xff] %v4324_v0 }
 0x108   : > { %517 = vst [vmem:[#allocation2 + $0x3f0] sm:$0xff] %v4324_v0  ;;  %518 = vst [vmem:[#allocation2 + $0x3f8] sm:$0xff] %v4324_v0 }
 0x109 PF: > { %v776_v1 = vld [vmem:[%s4686_s24 + $0x8] sm:$0xff]  ;;  %v778_v3 = vld [vmem:[%s4686_s24 + $0x18] sm:$0xff]  ;;  %v775_v6 = vld [vmem:[%s4686_s24] sm:$0xff]  ;;  %s5564_s16 = sld [smem:[#allocation20_spill]] }
 0x10a   : > { %v780_v2 = vld [vmem:[%s4686_s24 + $0x28] sm:$0xff]  ;;  %v782_v5 = vld [vmem:[%s4686_s24 + $0x38] sm:$0xff]  ;;  %v779_v7 = vld [vmem:[%s4686_s24 + $0x20] sm:$0xff] }
 0x10b   : > { %v3337_v4 = vpack.c.bf16 %v780_v2, %v776_v1  ;;  %v3465_v8 = vpack.c.bf16 %v782_v5, %v778_v3  ;;  %v3339_v9 = vpack.c.bf16 %v779_v7, %v775_v6  ;;  %v777_v10 = vld [vmem:[%s4686_s24 + $0x10] sm:$0xff]  ;;  %v784_v12 = vld [vmem:[%s4686_s24 + $0x48] sm:$0xff]  ;;  %v786_v15 = vld [vmem:[%s4686_s24 + $0x58] sm:$0xff] }
 0x10c   : > { %v781_v11 = vld [vmem:[%s4686_s24 + $0x30] sm:$0xff]  ;;  %v788_v14 = vld [vmem:[%s4686_s24 + $0x68] sm:$0xff]  ;;  %v790_v16 = vld [vmem:[%s4686_s24 + $0x78] sm:$0xff] }
 0x10d   : > { %3338 = vmatprep.subr.bf16.mxu0 %v3337_v4  ;;  %v3467_v13 = vpack.c.bf16 %v781_v11, %v777_v10  ;;  %3466 = vmatprep.subr.bf16.mxu1 %v3465_v8  ;;  %v3341_v17 = vpack.c.bf16 %v788_v14, %v784_v12  ;;  %v3469_v18 = vpack.c.bf16 %v790_v16, %v786_v15  ;;  %v783_v19 = vld [vmem:[%s4686_s24 + $0x40] sm:$0xff]  ;;  %v785_v21 = vld [vmem:[%s4686_s24 + $0x50] sm:$0xff]  ;;  %v792_v24 = vld [vmem:[%s4686_s24 + $0x88] sm:$0xff] }
 0x10e   : > { %3340 = vmatpush1.bf16.msra.mxu0 %v3339_v9  ;;  %v787_v20 = vld [vmem:[%s4686_s24 + $0x60] sm:$0xff]  ;;  %v789_v23 = vld [vmem:[%s4686_s24 + $0x70] sm:$0xff]  ;;  %v796_v25 = vld [vmem:[%s4686_s24 + $0xa8] sm:$0xff] }
 0x10f   : > { %3468 = vmatpush1.bf16.msra.mxu1 %v3467_v13  ;;  %v3343_v22 = vpack.c.bf16 %v787_v20, %v783_v19  ;;  %3342 = vmatprep.subr.bf16.mxu0 %v3341_v17  ;;  %v3471_v26 = vpack.c.bf16 %v789_v23, %v785_v21  ;;  %v3345_v27 = vpack.c.bf16 %v796_v25, %v792_v24  ;;  %v794_v28 = vld [vmem:[%s4686_s24 + $0x98] sm:$0xff]  ;;  %v791_v30 = vld [vmem:[%s4686_s24 + $0x80] sm:$0xff]  ;;  %v793_v33 = vld [vmem:[%s4686_s24 + $0x90] sm:$0xff]  ;;  %p3327_p10 = scmp.ne.s32.totalorder %s5564_s16, 1 }
 0x110   : > { %3470 = vmatprep.subr.bf16.mxu1 %v3469_v18  ;;  %v798_v29 = vld [vmem:[%s4686_s24 + $0xb8] sm:$0xff]  ;;  %v795_v32 = vld [vmem:[%s4686_s24 + $0xa0] sm:$0xff]  ;;  %v797_v34 = vld [vmem:[%s4686_s24 + $0xb0] sm:$0xff]  ;;  %s5565_s17 = sld [smem:[#allocation29_spill]] (!%p3327_p10)  ;;  %s5566_s19 = sld [smem:[#allocation30_spill]] (!%p3327_p10) }
 0x111   : > { %v3473_v31 = vpack.c.bf16 %v798_v29, %v794_v28  ;;  %v3347_v35 = vpack.c.bf16 %v795_v32, %v791_v30  ;;  %v800_v36 = vld [vmem:[%s4686_s24 + $0xc8] sm:$0xff]  ;;  %v802_v38 = vld [vmem:[%s4686_s24 + $0xd8] sm:$0xff]  ;;  %v3475_v39 = vpack.c.bf16 %v797_v34, %v793_v33  ;;  %v799_v42 = vld [vmem:[%s4686_s24 + $0xc0] sm:$0xff]  ;;  %s3137_s12 = sld [smem:[#allocation3]] (!%p3327_p10) }
 0x112   : > { %3344 = vmatpush1.bf16.msra.mxu0 %v3343_v22  ;;  %v804_v37 = vld [vmem:[%s4686_s24 + $0xe8] sm:$0xff]  ;;  %v806_v41 = vld [vmem:[%s4686_s24 + $0xf8] sm:$0xff]  ;;  %v803_v43 = vld [vmem:[%s4686_s24 + $0xe0] sm:$0xff] }
 0x113   : > { %3472 = vmatpush1.bf16.msra.mxu1 %v3471_v26  ;;  %3346 = vmatprep.subr.bf16.mxu0 %v3345_v27  ;;  %v3349_v40 = vpack.c.bf16 %v804_v37, %v800_v36  ;;  %v3477_v44 = vpack.c.bf16 %v806_v41, %v802_v38  ;;  %v801_v45 = vld [vmem:[%s4686_s24 + $0xd0] sm:$0xff]  ;;  %v808_v47 = vld [vmem:[%s4686_s24 + $0x108] sm:$0xff]  ;;  %v810_v49 = vld [vmem:[%s4686_s24 + $0x118] sm:$0xff]  ;;  %v3351_v51 = vpack.c.bf16 %v803_v43, %v799_v42 }
 0x114   : > { %3474 = vmatprep.subr.bf16.mxu1 %v3473_v31  ;;  %v805_v46 = vld [vmem:[%s4686_s24 + $0xf0] sm:$0xff]  ;;  %v812_v48 = vld [vmem:[%s4686_s24 + $0x128] sm:$0xff]  ;;  %v814_v50 = vld [vmem:[%s4686_s24 + $0x138] sm:$0xff] }
 0x115   : > { %v3479_v52 = vpack.c.bf16 %v805_v46, %v801_v45  ;;  %v3353_v53 = vpack.c.bf16 %v812_v48, %v808_v47  ;;  %v807_v54 = vld [vmem:[%s4686_s24 + $0x100] sm:$0xff]  ;;  %v809_v56 = vld [vmem:[%s4686_s24 + $0x110] sm:$0xff]  ;;  %v3481_v57 = vpack.c.bf16 %v814_v50, %v810_v49  ;;  %v816_v59 = vld [vmem:[%s4686_s24 + $0x148] sm:$0xff] }
 0x116   : > { %3348 = vmatpush1.bf16.msra.mxu0 %v3347_v35  ;;  %v811_v55 = vld [vmem:[%s4686_s24 + $0x120] sm:$0xff]  ;;  %v813_v58 = vld [vmem:[%s4686_s24 + $0x130] sm:$0xff]  ;;  %v820_v60 = vld [vmem:[%s4686_s24 + $0x168] sm:$0xff] }
 0x117   : > { %3476 = vmatpush1.bf16.msra.mxu1 %v3475_v39  ;;  %3350 = vmatprep.subr.bf16.mxu0 %v3349_v40  ;;  %v818_v61 = vld [vmem:[%s4686_s24 + $0x158] sm:$0xff]  ;;  %v3355_v63 = vpack.c.bf16 %v811_v55, %v807_v54  ;;  %v3483_v0 = vpack.c.bf16 %v813_v58, %v809_v56  ;;  %v3357_v1 = vpack.c.bf16 %v820_v60, %v816_v59  ;;  %v815_v2 = vld [vmem:[%s4686_s24 + $0x140] sm:$0xff]  ;;  %v817_v4 = vld [vmem:[%s4686_s24 + $0x150] sm:$0xff] }
 0x118   : > { %3478 = vmatprep.subr.bf16.mxu1 %v3477_v44  ;;  %v822_v62 = vld [vmem:[%s4686_s24 + $0x178] sm:$0xff]  ;;  %v819_v3 = vld [vmem:[%s4686_s24 + $0x160] sm:$0xff]  ;;  %v821_v6 = vld [vmem:[%s4686_s24 + $0x170] sm:$0xff] }
 0x119   : > { %v3485_v5 = vpack.c.bf16 %v822_v62, %v818_v61  ;;  %v824_v7 = vld [vmem:[%s4686_s24 + $0x188] sm:$0xff]  ;;  %v826_v9 = vld [vmem:[%s4686_s24 + $0x198] sm:$0xff]  ;;  %v3359_v11 = vpack.c.bf16 %v819_v3, %v815_v2  ;;  %v3487_v12 = vpack.c.bf16 %v821_v6, %v817_v4  ;;  %v823_v14 = vld [vmem:[%s4686_s24 + $0x180] sm:$0xff] }
 0x11a   : > { %3352 = vmatpush1.bf16.msra.mxu0 %v3351_v51  ;;  %v828_v8 = vld [vmem:[%s4686_s24 + $0x1a8] sm:$0xff]  ;;  %v830_v10 = vld [vmem:[%s4686_s24 + $0x1b8] sm:$0xff]  ;;  %v827_v15 = vld [vmem:[%s4686_s24 + $0x1a0] sm:$0xff] }
 0x11b   : > { %3480 = vmatpush1.bf16.msra.mxu1 %v3479_v52  ;;  %3354 = vmatprep.subr.bf16.mxu0 %v3353_v53  ;;  %v3361_v13 = vpack.c.bf16 %v828_v8, %v824_v7  ;;  %v825_v16 = vld [vmem:[%s4686_s24 + $0x190] sm:$0xff]  ;;  %v3489_v17 = vpack.c.bf16 %v830_v10, %v826_v9  ;;  %v832_v19 = vld [vmem:[%s4686_s24 + $0x1c8] sm:$0xff]  ;;  %v834_v21 = vld [vmem:[%s4686_s24 + $0x1d8] sm:$0xff]  ;;  %v3363_v23 = vpack.c.bf16 %v827_v15, %v823_v14 }
 0x11c   : > { %3482 = vmatprep.subr.bf16.mxu1 %v3481_v57  ;;  %v829_v18 = vld [vmem:[%s4686_s24 + $0x1b0] sm:$0xff]  ;;  %v836_v20 = vld [vmem:[%s4686_s24 + $0x1e8] sm:$0xff]  ;;  %v838_v22 = vld [vmem:[%s4686_s24 + $0x1f8] sm:$0xff] }
 0x11d   : > { %v3491_v24 = vpack.c.bf16 %v829_v18, %v825_v16  ;;  %v3365_v25 = vpack.c.bf16 %v836_v20, %v832_v19  ;;  %v831_v26 = vld [vmem:[%s4686_s24 + $0x1c0] sm:$0xff]  ;;  %v833_v28 = vld [vmem:[%s4686_s24 + $0x1d0] sm:$0xff]  ;;  %v3493_v29 = vpack.c.bf16 %v838_v22, %v834_v21  ;;  %v840_v31 = vld [vmem:[%s4686_s24 + $0x208] sm:$0xff] }
 0x11e   : > { %3356 = vmatpush1.bf16.msra.mxu0 %v3355_v63  ;;  %v835_v27 = vld [vmem:[%s4686_s24 + $0x1e0] sm:$0xff]  ;;  %v837_v30 = vld [vmem:[%s4686_s24 + $0x1f0] sm:$0xff]  ;;  %v844_v32 = vld [vmem:[%s4686_s24 + $0x228] sm:$0xff] }
 0x11f   : > { %3484 = vmatpush1.bf16.msra.mxu1 %v3483_v0  ;;  %3358 = vmatprep.subr.bf16.mxu0 %v3357_v1  ;;  %v842_v33 = vld [vmem:[%s4686_s24 + $0x218] sm:$0xff]  ;;  %v3367_v35 = vpack.c.bf16 %v835_v27, %v831_v26  ;;  %v3495_v36 = vpack.c.bf16 %v837_v30, %v833_v28  ;;  %v3369_v37 = vpack.c.bf16 %v844_v32, %v840_v31  ;;  %v839_v38 = vld [vmem:[%s4686_s24 + $0x200] sm:$0xff]  ;;  %v841_v40 = vld [vmem:[%s4686_s24 + $0x210] sm:$0xff] }
 0x120   : > { %3486 = vmatprep.subr.bf16.mxu1 %v3485_v5  ;;  %v846_v34 = vld [vmem:[%s4686_s24 + $0x238] sm:$0xff]  ;;  %v843_v39 = vld [vmem:[%s4686_s24 + $0x220] sm:$0xff]  ;;  %v845_v42 = vld [vmem:[%s4686_s24 + $0x230] sm:$0xff] }
 0x121   : > { %v3497_v41 = vpack.c.bf16 %v846_v34, %v842_v33  ;;  %v848_v43 = vld [vmem:[%s4686_s24 + $0x248] sm:$0xff]  ;;  %v850_v45 = vld [vmem:[%s4686_s24 + $0x258] sm:$0xff]  ;;  %v3371_v47 = vpack.c.bf16 %v843_v39, %v839_v38  ;;  %v3499_v48 = vpack.c.bf16 %v845_v42, %v841_v40  ;;  %v847_v50 = vld [vmem:[%s4686_s24 + $0x240] sm:$0xff] }
 0x122   : > { %3360 = vmatpush1.bf16.msra.mxu0 %v3359_v11  ;;  %v852_v44 = vld [vmem:[%s4686_s24 + $0x268] sm:$0xff]  ;;  %v854_v46 = vld [vmem:[%s4686_s24 + $0x278] sm:$0xff]  ;;  %v851_v51 = vld [vmem:[%s4686_s24 + $0x260] sm:$0xff] }
 0x123   : > { %3488 = vmatpush1.bf16.msra.mxu1 %v3487_v12  ;;  %3362 = vmatprep.subr.bf16.mxu0 %v3361_v13  ;;  %v3373_v49 = vpack.c.bf16 %v852_v44, %v848_v43  ;;  %v849_v52 = vld [vmem:[%s4686_s24 + $0x250] sm:$0xff]  ;;  %v3501_v53 = vpack.c.bf16 %v854_v46, %v850_v45  ;;  %v856_v55 = vld [vmem:[%s4686_s24 + $0x288] sm:$0xff]  ;;  %v858_v57 = vld [vmem:[%s4686_s24 + $0x298] sm:$0xff]  ;;  %v3375_v59 = vpack.c.bf16 %v851_v51, %v847_v50 }
 0x124   : > { %3490 = vmatprep.subr.bf16.mxu1 %v3489_v17  ;;  %v853_v54 = vld [vmem:[%s4686_s24 + $0x270] sm:$0xff]  ;;  %v860_v56 = vld [vmem:[%s4686_s24 + $0x2a8] sm:$0xff]  ;;  %v862_v58 = vld [vmem:[%s4686_s24 + $0x2b8] sm:$0xff] }
 0x125   : > { %v3503_v60 = vpack.c.bf16 %v853_v54, %v849_v52  ;;  %v3377_v61 = vpack.c.bf16 %v860_v56, %v856_v55  ;;  %v855_v62 = vld [vmem:[%s4686_s24 + $0x280] sm:$0xff]  ;;  %v857_v0 = vld [vmem:[%s4686_s24 + $0x290] sm:$0xff]  ;;  %v3505_v1 = vpack.c.bf16 %v862_v58, %v858_v57  ;;  %v864_v3 = vld [vmem:[%s4686_s24 + $0x2c8] sm:$0xff] }
 0x126   : > { %3364 = vmatpush1.bf16.msra.mxu0 %v3363_v23  ;;  %v859_v63 = vld [vmem:[%s4686_s24 + $0x2a0] sm:$0xff]  ;;  %v861_v2 = vld [vmem:[%s4686_s24 + $0x2b0] sm:$0xff]  ;;  %v868_v4 = vld [vmem:[%s4686_s24 + $0x2e8] sm:$0xff] }
 0x127   : > { %3492 = vmatpush1.bf16.msra.mxu1 %v3491_v24  ;;  %3366 = vmatprep.subr.bf16.mxu0 %v3365_v25  ;;  %v866_v5 = vld [vmem:[%s4686_s24 + $0x2d8] sm:$0xff]  ;;  %v3379_v7 = vpack.c.bf16 %v859_v63, %v855_v62  ;;  %v863_v8 = vld [vmem:[%s4686_s24 + $0x2c0] sm:$0xff]  ;;  %v3507_v9 = vpack.c.bf16 %v861_v2, %v857_v0  ;;  %v3381_v10 = vpack.c.bf16 %v868_v4, %v864_v3  ;;  %v865_v12 = vld [vmem:[%s4686_s24 + $0x2d0] sm:$0xff] }
 0x128   : > { %3494 = vmatprep.subr.bf16.mxu1 %v3493_v29  ;;  %v870_v6 = vld [vmem:[%s4686_s24 + $0x2f8] sm:$0xff]  ;;  %v867_v11 = vld [vmem:[%s4686_s24 + $0x2e0] sm:$0xff]  ;;  %v869_v13 = vld [vmem:[%s4686_s24 + $0x2f0] sm:$0xff] }
 0x129   : > { %v3509_v14 = vpack.c.bf16 %v870_v6, %v866_v5  ;;  %v872_v15 = vld [vmem:[%s4686_s24 + $0x308] sm:$0xff]  ;;  %v874_v18 = vld [vmem:[%s4686_s24 + $0x318] sm:$0xff]  ;;  %v3383_v20 = vpack.c.bf16 %v867_v11, %v863_v8  ;;  %v3511_v21 = vpack.c.bf16 %v869_v13, %v865_v12  ;;  %v871_v23 = vld [vmem:[%s4686_s24 + $0x300] sm:$0xff] }
 0x12a   : > { %3368 = vmatpush1.bf16.msra.mxu0 %v3367_v35  ;;  %v876_v16 = vld [vmem:[%s4686_s24 + $0x328] sm:$0xff]  ;;  %v878_v19 = vld [vmem:[%s4686_s24 + $0x338] sm:$0xff]  ;;  %v875_v24 = vld [vmem:[%s4686_s24 + $0x320] sm:$0xff] }
 0x12b   : > { %3496 = vmatpush1.bf16.msra.mxu1 %v3495_v36  ;;  %3370 = vmatprep.subr.bf16.mxu0 %v3369_v37  ;;  %v648_v17 = vld [vmem:[%s4678_s25 + $0x8] sm:$0xff]  ;;  %v3385_v22 = vpack.c.bf16 %v876_v16, %v872_v15  ;;  %v873_v25 = vld [vmem:[%s4686_s24 + $0x310] sm:$0xff]  ;;  %v3513_v26 = vpack.c.bf16 %v878_v19, %v874_v18  ;;  %v882_v30 = vld [vmem:[%s4686_s24 + $0x358] sm:$0xff]  ;;  %v3387_v32 = vpack.c.bf16 %v875_v24, %v871_v23 }
 0x12c   : > { %3498 = vmatprep.subr.bf16.mxu1 %v3497_v41  ;;  %1095 = vmatprep.mubr.f32.mxu0 %v648_v17  ;;  %v877_v27 = vld [vmem:[%s4686_s24 + $0x330] sm:$0xff]  ;;  %v880_v28 = vld [vmem:[%s4686_s24 + $0x348] sm:$0xff]  ;;  %v886_v31 = vld [vmem:[%s4686_s24 + $0x378] sm:$0xff] }
 0x12d   : > { %1609 = vmatprep.mubr.f32.mxu1 %v648_v17  ;;  %v884_v29 = vld [vmem:[%s4686_s24 + $0x368] sm:$0xff]  ;;  %v3515_v33 = vpack.c.bf16 %v877_v27, %v873_v25  ;;  %v879_v35 = vld [vmem:[%s4686_s24 + $0x340] sm:$0xff]  ;;  %v881_v37 = vld [vmem:[%s4686_s24 + $0x350] sm:$0xff]  ;;  %v3517_v38 = vpack.c.bf16 %v886_v31, %v882_v30 }
 0x12e   : > { %3372 = vmatpush1.bf16.msra.mxu0 %v3371_v47  ;;  %v3389_v34 = vpack.c.bf16 %v884_v29, %v880_v28  ;;  %v883_v36 = vld [vmem:[%s4686_s24 + $0x360] sm:$0xff]  ;;  %v885_v39 = vld [vmem:[%s4686_s24 + $0x370] sm:$0xff]  ;;  %v888_v40 = vld [vmem:[%s4686_s24 + $0x388] sm:$0xff] }
 0x12f   : > { %3500 = vmatpush1.bf16.msra.mxu1 %v3499_v48  ;;  %3374 = vmatprep.subr.bf16.mxu0 %v3373_v49  ;;  %v892_v41 = vld [vmem:[%s4686_s24 + $0x3a8] sm:$0xff]  ;;  %v890_v42 = vld [vmem:[%s4686_s24 + $0x398] sm:$0xff]  ;;  %v3391_v44 = vpack.c.bf16 %v883_v36, %v879_v35  ;;  %v3519_v45 = vpack.c.bf16 %v885_v39, %v881_v37  ;;  %v887_v47 = vld [vmem:[%s4686_s24 + $0x380] sm:$0xff] }
 0x130   : > { %3502 = vmatprep.subr.bf16.mxu1 %v3501_v53  ;;  %v894_v43 = vld [vmem:[%s4686_s24 + $0x3b8] sm:$0xff]  ;;  %v3393_v46 = vpack.c.bf16 %v892_v41, %v888_v40  ;;  %v891_v48 = vld [vmem:[%s4686_s24 + $0x3a0] sm:$0xff]  ;;  %v889_v49 = vld [vmem:[%s4686_s24 + $0x390] sm:$0xff] }
 0x131   : > { %v3521_v50 = vpack.c.bf16 %v894_v43, %v890_v42  ;;  %v893_v51 = vld [vmem:[%s4686_s24 + $0x3b0] sm:$0xff]  ;;  %v896_v52 = vld [vmem:[%s4686_s24 + $0x3c8] sm:$0xff]  ;;  %v898_v54 = vld [vmem:[%s4686_s24 + $0x3d8] sm:$0xff]  ;;  %v3395_v56 = vpack.c.bf16 %v891_v48, %v887_v47 }
 0x132   : > { %3376 = vmatpush1.bf16.msra.mxu0 %v3375_v59  ;;  %v900_v53 = vld [vmem:[%s4686_s24 + $0x3e8] sm:$0xff]  ;;  %v902_v55 = vld [vmem:[%s4686_s24 + $0x3f8] sm:$0xff]  ;;  %v3523_v57 = vpack.c.bf16 %v893_v51, %v889_v49  ;;  %v895_v59 = vld [vmem:[%s4686_s24 + $0x3c0] sm:$0xff] }
 0x133   : > { %3504 = vmatpush1.bf16.msra.mxu1 %v3503_v60  ;;  %3378 = vmatprep.subr.bf16.mxu0 %v3377_v61  ;;  %v3397_v58 = vpack.c.bf16 %v900_v53, %v896_v52  ;;  %v899_v60 = vld [vmem:[%s4686_s24 + $0x3e0] sm:$0xff]  ;;  %v897_v61 = vld [vmem:[%s4686_s24 + $0x3d0] sm:$0xff]  ;;  %v3525_v62 = vpack.c.bf16 %v902_v55, %v898_v54  ;;  %v904_v0 = vld [vmem:[%s4686_s24 + $0x408] sm:$0xff] }
 0x134   : > { %3506 = vmatprep.subr.bf16.mxu1 %v3505_v1  ;;  %v901_v63 = vld [vmem:[%s4686_s24 + $0x3f0] sm:$0xff]  ;;  %v908_v1 = vld [vmem:[%s4686_s24 + $0x428] sm:$0xff]  ;;  %v906_v2 = vld [vmem:[%s4686_s24 + $0x418] sm:$0xff]  ;;  %v3399_v4 = vpack.c.bf16 %v899_v60, %v895_v59 }
 0x135   : > { %v910_v3 = vld [vmem:[%s4686_s24 + $0x438] sm:$0xff]  ;;  %v3527_v5 = vpack.c.bf16 %v901_v63, %v897_v61  ;;  %v3401_v6 = vpack.c.bf16 %v908_v1, %v904_v0  ;;  %v907_v8 = vld [vmem:[%s4686_s24 + $0x420] sm:$0xff]  ;;  %v909_v11 = vld [vmem:[%s4686_s24 + $0x430] sm:$0xff] }
 0x136   : > { %3380 = vmatpush1.bf16.msra.mxu0 %v3379_v7  ;;  %v903_v7 = vld [vmem:[%s4686_s24 + $0x400] sm:$0xff]  ;;  %v912_v12 = vld [vmem:[%s4686_s24 + $0x448] sm:$0xff]  ;;  %v914_v16 = vld [vmem:[%s4686_s24 + $0x458] sm:$0xff] }
 0x137   : > { %3508 = vmatpush1.bf16.msra.mxu1 %v3507_v9  ;;  %3382 = vmatprep.subr.bf16.mxu0 %v3381_v10  ;;  %v3529_v9 = vpack.c.bf16 %v910_v3, %v906_v2  ;;  %v905_v10 = vld [vmem:[%s4686_s24 + $0x410] sm:$0xff]  ;;  %v916_v13 = vld [vmem:[%s4686_s24 + $0x468] sm:$0xff]  ;;  %v3403_v15 = vpack.c.bf16 %v907_v8, %v903_v7  ;;  %v918_v17 = vld [vmem:[%s4686_s24 + $0x478] sm:$0xff] }
 0x138   : > { %3510 = vmatprep.subr.bf16.mxu1 %v3509_v14  ;;  %v647_v14 = vld [vmem:[%s4678_s25] sm:$0xff]  ;;  %v3531_v18 = vpack.c.bf16 %v909_v11, %v905_v10  ;;  %v652_v19 = vld [vmem:[%s4678_s25 + $0x28] sm:$0xff]  ;;  %v913_v23 = vld [vmem:[%s4686_s24 + $0x450] sm:$0xff]  ;;  %v3533_v24 = vpack.c.bf16 %v918_v17, %v914_v16 }
 0x139   : > { %v917_v25 = vld [vmem:[%s4686_s24 + $0x470] sm:$0xff]  ;;  %v924_v27 = vld [vmem:[%s4686_s24 + $0x4a8] sm:$0xff]  ;;  %v651_v28 = vld [vmem:[%s4678_s25 + $0x20] sm:$0xff] }
 0x13a   : > { %3384 = vmatpush1.bf16.msra.mxu0 %v3383_v20  ;;  %v3405_v20 = vpack.c.bf16 %v916_v13, %v912_v12  ;;  %v922_v29 = vld [vmem:[%s4686_s24 + $0x498] sm:$0xff]  ;;  %v656_v31 = vld [vmem:[%s4678_s25 + $0x48] sm:$0xff]  ;;  %v919_v35 = vld [vmem:[%s4686_s24 + $0x480] sm:$0xff] }
 0x13b   : > { %3512 = vmatpush1.bf16.msra.mxu1 %v3511_v21  ;;  %3386 = vmatprep.subr.bf16.mxu0 %v3385_v22  ;;  %v911_v21 = vld [vmem:[%s4686_s24 + $0x440] sm:$0xff]  ;;  %v926_v30 = vld [vmem:[%s4686_s24 + $0x4b8] sm:$0xff]  ;;  %v921_v37 = vld [vmem:[%s4686_s24 + $0x490] sm:$0xff] }
 0x13c   : > { %3514 = vmatprep.subr.bf16.mxu1 %v3513_v26  ;;  %v915_v22 = vld [vmem:[%s4686_s24 + $0x460] sm:$0xff]  ;;  %v920_v26 = vld [vmem:[%s4686_s24 + $0x488] sm:$0xff]  ;;  %v925_v39 = vld [vmem:[%s4686_s24 + $0x4b0] sm:$0xff] }
 0x13d   : > { %v923_v36 = vld [vmem:[%s4686_s24 + $0x4a0] sm:$0xff]  ;;  %v928_v40 = vld [vmem:[%s4686_s24 + $0x4c8] sm:$0xff]  ;;  %v930_v43 = vld [vmem:[%s4686_s24 + $0x4d8] sm:$0xff]  ;;  %v3539_v47 = vpack.c.bf16 %v925_v39, %v921_v37 }
 0x13e   : > { %3388 = vmatpush1.bf16.msra.mxu0 %v3387_v32  ;;  %v3407_v32 = vpack.c.bf16 %v915_v22, %v911_v21  ;;  %v932_v41 = vld [vmem:[%s4686_s24 + $0x4e8] sm:$0xff]  ;;  %v655_v42 = vld [vmem:[%s4678_s25 + $0x40] sm:$0xff]  ;;  %v929_v51 = vld [vmem:[%s4686_s24 + $0x4d0] sm:$0xff] }
 0x13f   : > { %3516 = vmatpush1.bf16.msra.mxu1 %v3515_v33  ;;  %3390 = vmatprep.subr.bf16.mxu0 %v3389_v34  ;;  %v3535_v33 = vpack.c.bf16 %v917_v25, %v913_v23  ;;  %v3409_v34 = vpack.c.bf16 %v924_v27, %v920_v26  ;;  %v3413_v48 = vpack.c.bf16 %v932_v41, %v928_v40  ;;  %v927_v49 = vld [vmem:[%s4686_s24 + $0x4c0] sm:$0xff]  ;;  %v933_v53 = vld [vmem:[%s4686_s24 + $0x4f0] sm:$0xff]  ;;  %v936_v54 = vld [vmem:[%s4686_s24 + $0x508] sm:$0xff] }
 0x140   : > { %3518 = vmatprep.subr.bf16.mxu1 %v3517_v38  ;;  %v3537_v38 = vpack.c.bf16 %v926_v30, %v922_v29  ;;  %v940_v55 = vld [vmem:[%s4686_s24 + $0x528] sm:$0xff]  ;;  %v3543_v61 = vpack.c.bf16 %v933_v53, %v929_v51  ;;  %v935_v63 = vld [vmem:[%s4686_s24 + $0x500] sm:$0xff]  ;;  %v937_v1 = vld [vmem:[%s4686_s24 + $0x510] sm:$0xff] }
 0x141   : > { %v664_v59 = vld [vmem:[%s4678_s25 + $0x88] sm:$0xff]  ;;  %v939_v0 = vld [vmem:[%s4686_s24 + $0x520] sm:$0xff]  ;;  %v941_v3 = vld [vmem:[%s4686_s24 + $0x530] sm:$0xff] }
 0x142   : > { %3392 = vmatpush1.bf16.msra.mxu0 %v3391_v44  ;;  %v934_v44 = vld [vmem:[%s4686_s24 + $0x4f8] sm:$0xff]  ;;  %v3419_v10 = vpack.c.bf16 %v939_v0, %v935_v63  ;;  %v3547_v11 = vpack.c.bf16 %v941_v3, %v937_v1  ;;  %v943_v13 = vld [vmem:[%s4686_s24 + $0x540] sm:$0xff]  ;;  %v949_v17 = vld [vmem:[%s4686_s24 + $0x570] sm:$0xff] }
 0x143   : > { %3520 = vmatpush1.bf16.msra.mxu1 %v3519_v45  ;;  %3394 = vmatprep.subr.bf16.mxu0 %v3393_v46  ;;  %v660_v45 = vld [vmem:[%s4678_s25 + $0x68] sm:$0xff]  ;;  %v3411_v46 = vpack.c.bf16 %v923_v36, %v919_v35  ;;  %v3541_v52 = vpack.c.bf16 %v934_v44, %v930_v43  ;;  %v946_v7 = vld [vmem:[%s4686_s24 + $0x558] sm:$0xff]  ;;  %v951_v27 = vld [vmem:[%s4686_s24 + $0x580] sm:$0xff] }
 0x144   : > { %3522 = vmatprep.subr.bf16.mxu1 %v3521_v50  ;;  %v931_v50 = vld [vmem:[%s4686_s24 + $0x4e0] sm:$0xff]  ;;  %v950_v8 = vld [vmem:[%s4686_s24 + $0x578] sm:$0xff]  ;;  %v672_v23 = vld [vmem:[%s4678_s25 + $0xc8] sm:$0xff] }
 0x145   : > { %v3415_v60 = vpack.c.bf16 %v931_v50, %v927_v49  ;;  %v3549_v16 = vpack.c.bf16 %v950_v8, %v946_v7  ;;  %v954_v21 = vld [vmem:[%s4686_s24 + $0x598] sm:$0xff]  ;;  %v953_v29 = vld [vmem:[%s4686_s24 + $0x590] sm:$0xff]  ;;  %v676_v37 = vld [vmem:[%s4678_s25 + $0xe8] sm:$0xff] }
 0x146   : > { %3396 = vmatpush1.bf16.msra.mxu0 %v3395_v56  ;;  %v659_v56 = vld [vmem:[%s4678_s25 + $0x60] sm:$0xff]  ;;  %v958_v22 = vld [vmem:[%s4686_s24 + $0x5b8] sm:$0xff]  ;;  %v961_v43 = vld [vmem:[%s4686_s24 + $0x5d0] sm:$0xff] }
 0x147   : > { %3524 = vmatpush1.bf16.msra.mxu1 %v3523_v57  ;;  %3398 = vmatprep.subr.bf16.mxu0 %v3397_v58  ;;  %v938_v57 = vld [vmem:[%s4686_s24 + $0x518] sm:$0xff]  ;;  %v3553_v30 = vpack.c.bf16 %v958_v22, %v954_v21  ;;  %v959_v41 = vld [vmem:[%s4686_s24 + $0x5c0] sm:$0xff]  ;;  %v680_v51 = vld [vmem:[%s4678_s25 + $0x108] sm:$0xff] }
 0x148   : > { %3526 = vmatprep.subr.bf16.mxu1 %v3525_v62  ;;  %v942_v58 = vld [vmem:[%s4686_s24 + $0x538] sm:$0xff]  ;;  %v3417_v62 = vpack.c.bf16 %v940_v55, %v936_v54  ;;  %v967_v55 = vld [vmem:[%s4686_s24 + $0x600] sm:$0xff]  ;;  %v684_v1 = vld [vmem:[%s4678_s25 + $0x128] sm:$0xff] }
 0x149   : > { %v3545_v2 = vpack.c.bf16 %v942_v58, %v938_v57  ;;  %v962_v35 = vld [vmem:[%s4686_s24 + $0x5d8] sm:$0xff]  ;;  %v969_v57 = vld [vmem:[%s4686_s24 + $0x610] sm:$0xff] }
 0x14a   : > { %3400 = vmatpush1.bf16.msra.mxu0 %v3399_v4  ;;  %v944_v4 = vld [vmem:[%s4686_s24 + $0x548] sm:$0xff]  ;;  %v966_v36 = vld [vmem:[%s4686_s24 + $0x5f8] sm:$0xff]  ;;  %v977_v7 = vld [vmem:[%s4686_s24 + $0x650] sm:$0xff] }
 0x14b   : > { %3528 = vmatpush1.bf16.msra.mxu1 %v3527_v5  ;;  %3402 = vmatprep.subr.bf16.mxu0 %v3401_v6  ;;  %v948_v5 = vld [vmem:[%s4686_s24 + $0x568] sm:$0xff]  ;;  %v663_v6 = vld [vmem:[%s4678_s25 + $0x80] sm:$0xff]  ;;  %v3557_v44 = vpack.c.bf16 %v966_v36, %v962_v35  ;;  %v970_v49 = vld [vmem:[%s4686_s24 + $0x618] sm:$0xff] }
 0x14c   : > { %3530 = vmatprep.subr.bf16.mxu1 %v3529_v9  ;;  %v668_v9 = vld [vmem:[%s4678_s25 + $0xa8] sm:$0xff]  ;;  %v3421_v12 = vpack.c.bf16 %v948_v5, %v944_v4  ;;  %v974_v50 = vld [vmem:[%s4686_s24 + $0x638] sm:$0xff]  ;;  %v975_v5 = vld [vmem:[%s4686_s24 + $0x640] sm:$0xff] }
 0x14d   : > { %1096 = vmatmul.mubr.f32.vlgmr.msra.gmra.mrb[0].mxu0 %v647_v14  ;;  %v3561_v58 = vpack.c.bf16 %v974_v50, %v970_v49  ;;  %v978_v63 = vld [vmem:[%s4686_s24 + $0x658] sm:$0xff]  ;;  %v985_v21 = vld [vmem:[%s4686_s24 + $0x690] sm:$0xff] }
 0x14e   : > { %1610 = vmatmul.mubr.f32.vlgmr.msra.gmra.mrb[0].mxu1 %v647_v14  ;;  %3404 = vmatpush1.bf16.msra.mxu0 %v3403_v15  ;;  %v947_v14 = vld [vmem:[%s4686_s24 + $0x560] sm:$0xff]  ;;  %v945_v15 = vld [vmem:[%s4686_s24 + $0x550] sm:$0xff]  ;;  %v982_v0 = vld [vmem:[%s4686_s24 + $0x678] sm:$0xff] }
 0x14f   : > { %3532 = vmatpush1.bf16.msra.mxu1 %v3531_v18  ;;  %1101 = vmatprep.mubr.f32.mxu0 %v652_v19  ;;  %v952_v18 = vld [vmem:[%s4686_s24 + $0x588] sm:$0xff]  ;;  %v3551_v25 = vpack.c.bf16 %v949_v17, %v945_v15  ;;  %v3565_v8 = vpack.c.bf16 %v982_v0, %v978_v63  ;;  %v993_v35 = vld [vmem:[%s4686_s24 + $0x6d0] sm:$0xff] }
 0x150   : > { %1615 = vmatprep.mubr.f32.mxu1 %v652_v19  ;;  %3406 = vmatprep.subr.bf16.mxu0 %v3405_v20  ;;  %v956_v19 = vld [vmem:[%s4686_s24 + $0x5a8] sm:$0xff]  ;;  %v667_v20 = vld [vmem:[%s4678_s25 + $0xa0] sm:$0xff]  ;;  %v1001_v49 = vld [vmem:[%s4686_s24 + $0x710] sm:$0xff] }
 0x151   : > { %1102 = vmatmul.mubr.f32.gmra.mrb[2].mxu0 %v651_v28  ;;  %3534 = vmatprep.subr.bf16.mxu1 %v3533_v24  ;;  %v3423_v24 = vpack.c.bf16 %v947_v14, %v943_v13  ;;  %v3425_v26 = vpack.c.bf16 %v956_v19, %v952_v18  ;;  %v986_v13 = vld [vmem:[%s4686_s24 + $0x698] sm:$0xff]  ;;  %v688_v15 = vld [vmem:[%s4678_s25 + $0x148] sm:$0xff]  ;;  %v983_v19 = vld [vmem:[%s4686_s24 + $0x680] sm:$0xff] }
 0x152   : > { %1616 = vmatmul.mubr.f32.gmra.mrb[2].mxu1 %v651_v28  ;;  %1107 = vmatprep.mubr.f32.mxu0 %v656_v31  ;;  %v955_v28 = vld [vmem:[%s4686_s24 + $0x5a0] sm:$0xff]  ;;  %v990_v14 = vld [vmem:[%s4686_s24 + $0x6b8] sm:$0xff]  ;;  %v1009_v63 = vld [vmem:[%s4686_s24 + $0x750] sm:$0xff] }
 0x153   : > { %1621 = vmatprep.mubr.f32.mxu1 %v656_v31  ;;  %3408 = vmatpush1.bf16.msra.mxu0 %v3407_v32  ;;  %v957_v31 = vld [vmem:[%s4686_s24 + $0x5b0] sm:$0xff]  ;;  %v960_v32 = vld [vmem:[%s4686_s24 + $0x5c8] sm:$0xff]  ;;  %v3569_v22 = vpack.c.bf16 %v990_v14, %v986_v13 }
 0x154   : > { %3536 = vmatpush1.bf16.msra.mxu1 %v3535_v33  ;;  %3410 = vmatprep.subr.bf16.mxu0 %v3409_v34  ;;  %v964_v33 = vld [vmem:[%s4686_s24 + $0x5e8] sm:$0xff]  ;;  %v671_v34 = vld [vmem:[%s4678_s25 + $0xc0] sm:$0xff]  ;;  %v3555_v39 = vpack.c.bf16 %v957_v31, %v953_v29  ;;  %v1017_v13 = vld [vmem:[%s4686_s24 + $0x790] sm:$0xff] }
 0x155   : > { %1108 = vmatmul.mubr.f32.gmra.mrb[4].mxu0 %v655_v42  ;;  %3538 = vmatprep.subr.bf16.mxu1 %v3537_v38  ;;  %v3427_v38 = vpack.c.bf16 %v955_v28, %v951_v27  ;;  %v3429_v40 = vpack.c.bf16 %v964_v33, %v960_v32  ;;  %v994_v27 = vld [vmem:[%s4686_s24 + $0x6d8] sm:$0xff]  ;;  %v692_v29 = vld [vmem:[%s4678_s25 + $0x168] sm:$0xff]  ;;  %v991_v33 = vld [vmem:[%s4686_s24 + $0x6c0] sm:$0xff] }
 0x156   : > { %1622 = vmatmul.mubr.f32.gmra.mrb[4].mxu1 %v655_v42  ;;  %1113 = vmatprep.mubr.f32.mxu0 %v660_v45  ;;  %v963_v42 = vld [vmem:[%s4686_s24 + $0x5e0] sm:$0xff]  ;;  %v998_v28 = vld [vmem:[%s4686_s24 + $0x6f8] sm:$0xff] }
 0x157   : > { %1627 = vmatprep.mubr.f32.mxu1 %v660_v45  ;;  %3412 = vmatpush1.bf16.msra.mxu0 %v3411_v46  ;;  %v965_v45 = vld [vmem:[%s4686_s24 + $0x5f0] sm:$0xff]  ;;  %v968_v46 = vld [vmem:[%s4686_s24 + $0x608] sm:$0xff]  ;;  %v3573_v36 = vpack.c.bf16 %v998_v28, %v994_v27 }
 0x158   : > { %3540 = vmatpush1.bf16.msra.mxu1 %v3539_v47  ;;  %3414 = vmatprep.subr.bf16.mxu0 %v3413_v48  ;;  %v972_v47 = vld [vmem:[%s4686_s24 + $0x628] sm:$0xff]  ;;  %v675_v48 = vld [vmem:[%s4678_s25 + $0xe0] sm:$0xff]  ;;  %v3559_v53 = vpack.c.bf16 %v965_v45, %v961_v43  ;;  %v1025_v28 = vld [vmem:[%s4686_s24 + $0x7d0] sm:$0xff] }
 0x159   : > { %1114 = vmatmul.mubr.f32.gmra.mrb[6].mxu0 %v659_v56  ;;  %3542 = vmatprep.subr.bf16.mxu1 %v3541_v52  ;;  %v3431_v52 = vpack.c.bf16 %v963_v42, %v959_v41  ;;  %v3433_v54 = vpack.c.bf16 %v972_v47, %v968_v46  ;;  %v1002_v41 = vld [vmem:[%s4686_s24 + $0x718] sm:$0xff]  ;;  %v696_v43 = vld [vmem:[%s4678_s25 + $0x188] sm:$0xff]  ;;  %v999_v47 = vld [vmem:[%s4686_s24 + $0x700] sm:$0xff] }
 0x15a   : > { %1628 = vmatmul.mubr.f32.gmra.mrb[6].mxu1 %v659_v56  ;;  %1119 = vmatprep.mubr.f32.mxu0 %v664_v59  ;;  %v971_v56 = vld [vmem:[%s4686_s24 + $0x620] sm:$0xff]  ;;  %v1006_v42 = vld [vmem:[%s4686_s24 + $0x738] sm:$0xff] }
 0x15b   : > { %1633 = vmatprep.mubr.f32.mxu1 %v664_v59  ;;  %3416 = vmatpush1.bf16.msra.mxu0 %v3415_v60  ;;  %v973_v59 = vld [vmem:[%s4686_s24 + $0x630] sm:$0xff]  ;;  %v976_v60 = vld [vmem:[%s4686_s24 + $0x648] sm:$0xff]  ;;  %v3577_v50 = vpack.c.bf16 %v1006_v42, %v1002_v41  ;;  %v727_v42 = vld [vmem:[%s4678_s25 + $0x280] sm:$0xff] }
 0x15c   : > { %3544 = vmatpush1.bf16.msra.mxu1 %v3543_v61  ;;  %3418 = vmatprep.subr.bf16.mxu0 %v3417_v62  ;;  %v980_v61 = vld [vmem:[%s4686_s24 + $0x668] sm:$0xff]  ;;  %v679_v62 = vld [vmem:[%s4678_s25 + $0x100] sm:$0xff]  ;;  %v3563_v3 = vpack.c.bf16 %v973_v59, %v969_v57 }
 0x15d   : > { %1120 = vmatmul.mubr.f32.gmra.mrb[8].mxu0 %v663_v6  ;;  %3546 = vmatprep.subr.bf16.mxu1 %v3545_v2  ;;  %v3435_v2 = vpack.c.bf16 %v971_v56, %v967_v55  ;;  %v3437_v4 = vpack.c.bf16 %v980_v61, %v976_v60  ;;  %v1010_v55 = vld [vmem:[%s4686_s24 + $0x758] sm:$0xff]  ;;  %v700_v57 = vld [vmem:[%s4678_s25 + $0x1a8] sm:$0xff]  ;;  %v1007_v61 = vld [vmem:[%s4686_s24 + $0x740] sm:$0xff] }
 0x15e   : > { %1634 = vmatmul.mubr.f32.gmra.mrb[8].mxu1 %v663_v6  ;;  %1125 = vmatprep.mubr.f32.mxu0 %v668_v9  ;;  %v979_v6 = vld [vmem:[%s4686_s24 + $0x660] sm:$0xff]  ;;  %v1014_v56 = vld [vmem:[%s4686_s24 + $0x778] sm:$0xff]  ;;  %v728_v41 = vld [vmem:[%s4678_s25 + $0x288] sm:$0xff] }
 0x15f   : > { %1639 = vmatprep.mubr.f32.mxu1 %v668_v9  ;;  %3420 = vmatpush1.bf16.msra.mxu0 %v3419_v10  ;;  %v981_v9 = vld [vmem:[%s4686_s24 + $0x670] sm:$0xff]  ;;  %v984_v10 = vld [vmem:[%s4686_s24 + $0x688] sm:$0xff]  ;;  %v3581_v0 = vpack.c.bf16 %v1014_v56, %v1010_v55  ;;  %v755_v56 = vld [vmem:[%s4678_s25 + $0x360] sm:$0xff] }
 0x160   : > { %3548 = vmatpush1.bf16.msra.mxu1 %v3547_v11  ;;  %3422 = vmatprep.subr.bf16.mxu0 %v3421_v12  ;;  %v988_v11 = vld [vmem:[%s4686_s24 + $0x6a8] sm:$0xff]  ;;  %v683_v12 = vld [vmem:[%s4678_s25 + $0x120] sm:$0xff]  ;;  %v3567_v17 = vpack.c.bf16 %v981_v9, %v977_v7 }
 0x161   : > { %1126 = vmatmul.mubr.f32.gmra.mrb[10].mxu0 %v667_v20  ;;  %3550 = vmatprep.subr.bf16.mxu1 %v3549_v16  ;;  %v3439_v16 = vpack.c.bf16 %v979_v6, %v975_v5  ;;  %v3441_v18 = vpack.c.bf16 %v988_v11, %v984_v10  ;;  %v1018_v5 = vld [vmem:[%s4686_s24 + $0x798] sm:$0xff]  ;;  %v704_v7 = vld [vmem:[%s4678_s25 + $0x1c8] sm:$0xff]  ;;  %v1015_v11 = vld [vmem:[%s4686_s24 + $0x780] sm:$0xff] }
 0x162   : > { %1640 = vmatmul.mubr.f32.gmra.mrb[10].mxu1 %v667_v20  ;;  %1131 = vmatprep.mubr.f32.mxu0 %v672_v23  ;;  %v987_v20 = vld [vmem:[%s4686_s24 + $0x6a0] sm:$0xff]  ;;  %v1022_v6 = vld [vmem:[%s4686_s24 + $0x7b8] sm:$0xff]  ;;  %v756_v55 = vld [vmem:[%s4678_s25 + $0x368] sm:$0xff] }
 0x163   : > { %1645 = vmatprep.mubr.f32.mxu1 %v672_v23  ;;  %3424 = vmatpush1.bf16.msra.mxu0 %v3423_v24  ;;  %v989_v23 = vld [vmem:[%s4686_s24 + $0x6b0] sm:$0xff]  ;;  %v992_v24 = vld [vmem:[%s4686_s24 + $0x6c8] sm:$0xff]  ;;  %v3585_v14 = vpack.c.bf16 %v1022_v6, %v1018_v5  ;;  %v658_v5 = vld [vmem:[%s4678_s25 + $0x58] sm:$0xff] }
 0x164   : > { %3552 = vmatpush1.bf16.msra.mxu1 %v3551_v25  ;;  %3426 = vmatprep.subr.bf16.mxu0 %v3425_v26  ;;  %v996_v25 = vld [vmem:[%s4686_s24 + $0x6e8] sm:$0xff]  ;;  %v687_v26 = vld [vmem:[%s4678_s25 + $0x140] sm:$0xff]  ;;  %v3571_v31 = vpack.c.bf16 %v989_v23, %v985_v21  ;;  %v657_v6 = vld [vmem:[%s4678_s25 + $0x50] sm:$0xff] }
 0x165   : > { %1132 = vmatmul.mubr.f32.gmra.mrb[12].mxu0 %v671_v34  ;;  %3554 = vmatprep.subr.bf16.mxu1 %v3553_v30  ;;  %v3443_v30 = vpack.c.bf16 %v987_v20, %v983_v19  ;;  %v3445_v32 = vpack.c.bf16 %v996_v25, %v992_v24  ;;  %v1026_v19 = vld [vmem:[%s4686_s24 + $0x7d8] sm:$0xff]  ;;  %v708_v21 = vld [vmem:[%s4678_s25 + $0x1e8] sm:$0xff]  ;;  %v1023_v25 = vld [vmem:[%s4686_s24 + $0x7c0] sm:$0xff] }
 0x166   : > { %1646 = vmatmul.mubr.f32.gmra.mrb[12].mxu1 %v671_v34  ;;  %1137 = vmatprep.mubr.f32.mxu0 %v676_v37  ;;  %v995_v34 = vld [vmem:[%s4686_s24 + $0x6e0] sm:$0xff]  ;;  %v1030_v20 = vld [vmem:[%s4686_s24 + $0x7f8] sm:$0xff] }
 0x167   : > { %1651 = vmatprep.mubr.f32.mxu1 %v676_v37  ;;  %3428 = vmatpush1.bf16.msra.mxu0 %v3427_v38  ;;  %v997_v37 = vld [vmem:[%s4686_s24 + $0x6f0] sm:$0xff]  ;;  %v1000_v38 = vld [vmem:[%s4686_s24 + $0x708] sm:$0xff]  ;;  %v3589_v27 = vpack.c.bf16 %v1030_v20, %v1026_v19  ;;  %v686_v19 = vld [vmem:[%s4678_s25 + $0x138] sm:$0xff] }
 0x168   : > { %3556 = vmatpush1.bf16.msra.mxu1 %v3555_v39  ;;  %3430 = vmatprep.subr.bf16.mxu0 %v3429_v40  ;;  %v1004_v39 = vld [vmem:[%s4686_s24 + $0x728] sm:$0xff]  ;;  %v691_v40 = vld [vmem:[%s4678_s25 + $0x160] sm:$0xff]  ;;  %v3575_v45 = vpack.c.bf16 %v997_v37, %v993_v35  ;;  %v685_v20 = vld [vmem:[%s4678_s25 + $0x130] sm:$0xff] }
 0x169   : > { %1138 = vmatmul.mubr.f32.gmra.mrb[14].mxu0 %v675_v48  ;;  %3558 = vmatprep.subr.bf16.mxu1 %v3557_v44  ;;  %v3447_v44 = vpack.c.bf16 %v995_v34, %v991_v33  ;;  %v3449_v46 = vpack.c.bf16 %v1004_v39, %v1000_v38  ;;  %v711_v34 = vld [vmem:[%s4678_s25 + $0x200] sm:$0xff]  ;;  %v716_v35 = vld [vmem:[%s4678_s25 + $0x228] sm:$0xff] }
 0x16a   : > { %1652 = vmatmul.mubr.f32.gmra.mrb[14].mxu1 %v675_v48  ;;  %1143 = vmatprep.mubr.f32.mxu0 %v680_v51  ;;  %v1003_v48 = vld [vmem:[%s4686_s24 + $0x720] sm:$0xff]  ;;  %v720_v37 = vld [vmem:[%s4678_s25 + $0x248] sm:$0xff] }
 0x16b   : > { %1657 = vmatprep.mubr.f32.mxu1 %v680_v51  ;;  %3432 = vmatpush1.bf16.msra.mxu0 %v3431_v52  ;;  %v1005_v51 = vld [vmem:[%s4686_s24 + $0x730] sm:$0xff]  ;;  %v1008_v52 = vld [vmem:[%s4686_s24 + $0x748] sm:$0xff]  ;;  %v719_v38 = vld [vmem:[%s4678_s25 + $0x240] sm:$0xff] }
 0x16c   : > { %3560 = vmatpush1.bf16.msra.mxu1 %v3559_v53  ;;  %3434 = vmatprep.subr.bf16.mxu0 %v3433_v54  ;;  %v1012_v53 = vld [vmem:[%s4686_s24 + $0x768] sm:$0xff]  ;;  %v695_v54 = vld [vmem:[%s4678_s25 + $0x180] sm:$0xff]  ;;  %v3579_v59 = vpack.c.bf16 %v1005_v51, %v1001_v49 }
 0x16d   : > { %1144 = vmatmul.mubr.f32.gmra.mrb[16].mxu0 %v679_v62  ;;  %3562 = vmatprep.subr.bf16.mxu1 %v3561_v58  ;;  %v3451_v58 = vpack.c.bf16 %v1003_v48, %v999_v47  ;;  %v3453_v60 = vpack.c.bf16 %v1012_v53, %v1008_v52  ;;  %v724_v39 = vld [vmem:[%s4678_s25 + $0x268] sm:$0xff]  ;;  %v739_v48 = vld [vmem:[%s4678_s25 + $0x2e0] sm:$0xff] }
 0x16e   : > { %1658 = vmatmul.mubr.f32.gmra.mrb[16].mxu1 %v679_v62  ;;  %1149 = vmatprep.mubr.f32.mxu0 %v684_v1  ;;  %v1011_v62 = vld [vmem:[%s4686_s24 + $0x760] sm:$0xff]  ;;  %v740_v47 = vld [vmem:[%s4678_s25 + $0x2e8] sm:$0xff] }
 0x16f   : > { %1663 = vmatprep.mubr.f32.mxu1 %v684_v1  ;;  %3436 = vmatpush1.bf16.msra.mxu0 %v3435_v2  ;;  %v1013_v1 = vld [vmem:[%s4686_s24 + $0x770] sm:$0xff]  ;;  %v1016_v2 = vld [vmem:[%s4686_s24 + $0x788] sm:$0xff]  ;;  %v747_v52 = vld [vmem:[%s4678_s25 + $0x320] sm:$0xff] }
 0x170   : > { %3564 = vmatpush1.bf16.msra.mxu1 %v3563_v3  ;;  %3438 = vmatprep.subr.bf16.mxu0 %v3437_v4  ;;  %v1020_v3 = vld [vmem:[%s4686_s24 + $0x7a8] sm:$0xff]  ;;  %v699_v4 = vld [vmem:[%s4678_s25 + $0x1a0] sm:$0xff]  ;;  %v3583_v9 = vpack.c.bf16 %v1013_v1, %v1009_v63  ;;  %v650_v1 = vld [vmem:[%s4678_s25 + $0x18] sm:$0xff] }
 0x171   : > { %1150 = vmatmul.mubr.f32.gmra.mrb[18].mxu0 %v683_v12  ;;  %3566 = vmatprep.subr.bf16.mxu1 %v3565_v8  ;;  %v3455_v8 = vpack.c.bf16 %v1011_v62, %v1007_v61  ;;  %v3457_v10 = vpack.c.bf16 %v1020_v3, %v1016_v2  ;;  %v744_v49 = vld [vmem:[%s4678_s25 + $0x308] sm:$0xff]  ;;  %v767_v62 = vld [vmem:[%s4678_s25 + $0x3c0] sm:$0xff]  ;;  %v649_v2 = vld [vmem:[%s4678_s25 + $0x10] sm:$0xff] }
 0x172   : > { %1664 = vmatmul.mubr.f32.gmra.mrb[18].mxu1 %v683_v12  ;;  %1155 = vmatprep.mubr.f32.mxu0 %v688_v15  ;;  %v1019_v12 = vld [vmem:[%s4686_s24 + $0x7a0] sm:$0xff]  ;;  %v748_v51 = vld [vmem:[%s4678_s25 + $0x328] sm:$0xff]  ;;  %v654_v3 = vld [vmem:[%s4678_s25 + $0x38] sm:$0xff] }
 0x173   : > { %1669 = vmatprep.mubr.f32.mxu1 %v688_v15  ;;  %3440 = vmatpush1.bf16.msra.mxu0 %v3439_v16  ;;  %v1021_v15 = vld [vmem:[%s4686_s24 + $0x7b0] sm:$0xff]  ;;  %v1024_v16 = vld [vmem:[%s4686_s24 + $0x7c8] sm:$0xff] }
 0x174   : > { %3568 = vmatpush1.bf16.msra.mxu1 %v3567_v17  ;;  %3442 = vmatprep.subr.bf16.mxu0 %v3441_v18  ;;  %v1028_v17 = vld [vmem:[%s4686_s24 + $0x7e8] sm:$0xff]  ;;  %v703_v18 = vld [vmem:[%s4678_s25 + $0x1c0] sm:$0xff]  ;;  %v3587_v23 = vpack.c.bf16 %v1021_v15, %v1017_v13  ;;  %v674_v13 = vld [vmem:[%s4678_s25 + $0xd8] sm:$0xff] }
 0x175   : > { %1156 = vmatmul.mubr.f32.gmra.mrb[20].mxu0 %v687_v26  ;;  %3570 = vmatprep.subr.bf16.mxu1 %v3569_v22  ;;  %v3459_v22 = vpack.c.bf16 %v1019_v12, %v1015_v11  ;;  %v3461_v24 = vpack.c.bf16 %v1028_v17, %v1024_v16  ;;  %v752_v53 = vld [vmem:[%s4678_s25 + $0x348] sm:$0xff]  ;;  %v670_v11 = vld [vmem:[%s4678_s25 + $0xb8] sm:$0xff]  ;;  %v669_v12 = vld [vmem:[%s4678_s25 + $0xb0] sm:$0xff] }
 0x176   : > { %1670 = vmatmul.mubr.f32.gmra.mrb[20].mxu1 %v687_v26  ;;  %1161 = vmatprep.mubr.f32.mxu0 %v692_v29  ;;  %v1027_v26 = vld [vmem:[%s4686_s24 + $0x7e0] sm:$0xff]  ;;  %v768_v61 = vld [vmem:[%s4678_s25 + $0x3c8] sm:$0xff]  ;;  %v678_v15 = vld [vmem:[%s4678_s25 + $0xf8] sm:$0xff] }
 0x177   : > { %1675 = vmatprep.mubr.f32.mxu1 %v692_v29  ;;  %3444 = vmatpush1.bf16.msra.mxu0 %v3443_v30  ;;  %v1029_v29 = vld [vmem:[%s4686_s24 + $0x7f0] sm:$0xff]  ;;  %v707_v30 = vld [vmem:[%s4678_s25 + $0x1e0] sm:$0xff]  ;;  %v772_v63 = vld [vmem:[%s4678_s25 + $0x3e8] sm:$0xff] }
 0x178   : > { %3572 = vmatpush1.bf16.msra.mxu1 %v3571_v31  ;;  %3446 = vmatprep.subr.bf16.mxu0 %v3445_v32  ;;  %v712_v31 = vld [vmem:[%s4678_s25 + $0x208] sm:$0xff]  ;;  %v3463_v32 = vpack.c.bf16 %v1027_v26, %v1023_v25  ;;  %v3591_v33 = vpack.c.bf16 %v1029_v29, %v1025_v28  ;;  %v677_v16 = vld [vmem:[%s4678_s25 + $0xf0] sm:$0xff]  ;;  %v682_v17 = vld [vmem:[%s4678_s25 + $0x118] sm:$0xff] }
 0x179   : > { %1162 = vmatmul.mubr.f32.gmra.mrb[22].mxu0 %v691_v40  ;;  %3574 = vmatprep.subr.bf16.mxu1 %v3573_v36  ;;  %v715_v36 = vld [vmem:[%s4678_s25 + $0x220] sm:$0xff]  ;;  %v698_v25 = vld [vmem:[%s4678_s25 + $0x198] sm:$0xff]  ;;  %v697_v26 = vld [vmem:[%s4678_s25 + $0x190] sm:$0xff] }
 0x17a   : > { %1676 = vmatmul.mubr.f32.gmra.mrb[22].mxu1 %v691_v40  ;;  %1167 = vmatprep.mubr.f32.mxu0 %v696_v43  ;;  %v723_v40 = vld [vmem:[%s4678_s25 + $0x260] sm:$0xff]  ;;  %v701_v28 = vld [vmem:[%s4678_s25 + $0x1b0] sm:$0xff]  ;;  %v706_v29 = vld [vmem:[%s4678_s25 + $0x1d8] sm:$0xff] }
 0x17b   : > { %1681 = vmatprep.mubr.f32.mxu1 %v696_v43  ;;  %3448 = vmatpush1.bf16.msra.mxu0 %v3447_v44  ;;  %v732_v43 = vld [vmem:[%s4678_s25 + $0x2a8] sm:$0xff]  ;;  %v731_v44 = vld [vmem:[%s4678_s25 + $0x2a0] sm:$0xff] }
 0x17c   : > { %3576 = vmatpush1.bf16.msra.mxu1 %v3575_v45  ;;  %3450 = vmatprep.subr.bf16.mxu0 %v3449_v46  ;;  %v736_v45 = vld [vmem:[%s4678_s25 + $0x2c8] sm:$0xff]  ;;  %v735_v46 = vld [vmem:[%s4678_s25 + $0x2c0] sm:$0xff] }
 0x17d   : > { %1168 = vmatmul.mubr.f32.gmra.mrb[24].mxu0 %v695_v54  ;;  %3578 = vmatprep.subr.bf16.mxu1 %v3577_v50  ;;  %v743_v50 = vld [vmem:[%s4678_s25 + $0x300] sm:$0xff] }
 0x17e   : > { %1682 = vmatmul.mubr.f32.gmra.mrb[24].mxu1 %v695_v54  ;;  %1173 = vmatprep.mubr.f32.mxu0 %v700_v57  ;;  %v751_v54 = vld [vmem:[%s4678_s25 + $0x340] sm:$0xff] }
 0x17f   : > { %1687 = vmatprep.mubr.f32.mxu1 %v700_v57  ;;  %3452 = vmatpush1.bf16.msra.mxu0 %v3451_v58  ;;  %v760_v57 = vld [vmem:[%s4678_s25 + $0x388] sm:$0xff]  ;;  %v759_v58 = vld [vmem:[%s4678_s25 + $0x380] sm:$0xff] }
 0x180   : > { %3580 = vmatpush1.bf16.msra.mxu1 %v3579_v59  ;;  %3454 = vmatprep.subr.bf16.mxu0 %v3453_v60  ;;  %v764_v59 = vld [vmem:[%s4678_s25 + $0x3a8] sm:$0xff]  ;;  %v763_v60 = vld [vmem:[%s4678_s25 + $0x3a0] sm:$0xff] }
 0x181   : > { %1174 = vmatmul.mubr.f32.gmra.mrb[26].mxu0 %v699_v4  ;;  %3582 = vmatprep.subr.bf16.mxu1 %v3581_v0  ;;  %v771_v0 = vld [vmem:[%s4678_s25 + $0x3e0] sm:$0xff] }
 0x182   : > { %1688 = vmatmul.mubr.f32.gmra.mrb[26].mxu1 %v699_v4  ;;  %1179 = vmatprep.mubr.f32.mxu0 %v704_v7  ;;  %v653_v4 = vld [vmem:[%s4678_s25 + $0x30] sm:$0xff] }
 0x183   : > { %1693 = vmatprep.mubr.f32.mxu1 %v704_v7  ;;  %3456 = vmatpush1.bf16.msra.mxu0 %v3455_v8  ;;  %v662_v7 = vld [vmem:[%s4678_s25 + $0x78] sm:$0xff]  ;;  %v661_v8 = vld [vmem:[%s4678_s25 + $0x70] sm:$0xff] }
 0x184   : > { %3584 = vmatpush1.bf16.msra.mxu1 %v3583_v9  ;;  %3458 = vmatprep.subr.bf16.mxu0 %v3457_v10  ;;  %v666_v9 = vld [vmem:[%s4678_s25 + $0x98] sm:$0xff]  ;;  %v665_v10 = vld [vmem:[%s4678_s25 + $0x90] sm:$0xff] }
 0x185   : > { %1180 = vmatmul.mubr.f32.gmra.mrb[28].mxu0 %v703_v18  ;;  %3586 = vmatprep.subr.bf16.mxu1 %v3585_v14  ;;  %v673_v14 = vld [vmem:[%s4678_s25 + $0xd0] sm:$0xff] }
 0x186   : > { %1694 = vmatmul.mubr.f32.gmra.mrb[28].mxu1 %v703_v18  ;;  %1185 = vmatprep.mubr.f32.mxu0 %v708_v21  ;;  %v681_v18 = vld [vmem:[%s4678_s25 + $0x110] sm:$0xff] }
 0x187   : > { %1699 = vmatprep.mubr.f32.mxu1 %v708_v21  ;;  %3460 = vmatpush1.bf16.msra.mxu0 %v3459_v22  ;;  %v690_v21 = vld [vmem:[%s4678_s25 + $0x158] sm:$0xff]  ;;  %v689_v22 = vld [vmem:[%s4678_s25 + $0x150] sm:$0xff] }
 0x188   : > { %3588 = vmatpush1.bf16.msra.mxu1 %v3587_v23  ;;  %3462 = vmatprep.subr.bf16.mxu0 %v3461_v24  ;;  %v694_v23 = vld [vmem:[%s4678_s25 + $0x178] sm:$0xff]  ;;  %v693_v24 = vld [vmem:[%s4678_s25 + $0x170] sm:$0xff] }
 0x189   : > { %1186 = vmatmul.mubr.f32.gmra.mrb[30].mxu0 %v707_v30  ;;  %3590 = vmatprep.subr.bf16.mxu1 %v3589_v27  ;;  %v702_v27 = vld [vmem:[%s4678_s25 + $0x1b8] sm:$0xff] }
 0x18a   : > { %1700 = vmatmul.mubr.f32.gmra.mrb[30].mxu1 %v707_v30  ;;  %1191 = vmatprep.mubr.f32.mxu0 %v712_v31  ;;  %v705_v30 = vld [vmem:[%s4678_s25 + $0x1d0] sm:$0xff] }
 0x18b   : > { %1705 = vmatprep.mubr.f32.mxu1 %v712_v31  ;;  %3464 = vmatpush1.bf16.msra.mxu0 %v3463_v32  ;;  %v710_v31 = vld [vmem:[%s4678_s25 + $0x1f8] sm:$0xff]  ;;  %v709_v32 = vld [vmem:[%s4678_s25 + $0x1f0] sm:$0xff] }
 0x18c   : > { %3592 = vmatpush1.bf16.msra.mxu1 %v3591_v33  ;;  %v714_v33 = vld [vmem:[%s4678_s25 + $0x218] sm:$0xff] }
 0x18d   : > { %1192 = vmatmul.mubr.f32.gmra.mrb[32].mxu0 %v711_v34 }
 0x18e   : > { %1706 = vmatmul.mubr.f32.gmra.mrb[32].mxu1 %v711_v34  ;;  %1197 = vmatprep.mubr.f32.mxu0 %v716_v35  ;;  %v713_v34 = vld [vmem:[%s4678_s25 + $0x210] sm:$0xff] }
 0x18f   : > { %1711 = vmatprep.mubr.f32.mxu1 %v716_v35  ;;  %v718_v35 = vld [vmem:[%s4678_s25 + $0x238] sm:$0xff] }
 0x191   : > { %1198 = vmatmul.mubr.f32.gmra.mrb[34].mxu0 %v715_v36 }
 0x192   : > { %1712 = vmatmul.mubr.f32.gmra.mrb[34].mxu1 %v715_v36  ;;  %1203 = vmatprep.mubr.f32.mxu0 %v720_v37  ;;  %v717_v36 = vld [vmem:[%s4678_s25 + $0x230] sm:$0xff] }
 0x193   : > { %1717 = vmatprep.mubr.f32.mxu1 %v720_v37  ;;  %v722_v37 = vld [vmem:[%s4678_s25 + $0x258] sm:$0xff] }
 0x195   : > { %1204 = vmatmul.mubr.f32.gmra.mrb[36].mxu0 %v719_v38 }
 0x196   : > { %1718 = vmatmul.mubr.f32.gmra.mrb[36].mxu1 %v719_v38  ;;  %1209 = vmatprep.mubr.f32.mxu0 %v724_v39  ;;  %v721_v38 = vld [vmem:[%s4678_s25 + $0x250] sm:$0xff] }
 0x197   : > { %1723 = vmatprep.mubr.f32.mxu1 %v724_v39  ;;  %v726_v39 = vld [vmem:[%s4678_s25 + $0x278] sm:$0xff] }
 0x199   : > { %1210 = vmatmul.mubr.f32.gmra.mrb[38].mxu0 %v723_v40 }
 0x19a   : > { %1724 = vmatmul.mubr.f32.gmra.mrb[38].mxu1 %v723_v40  ;;  %1215 = vmatprep.mubr.f32.mxu0 %v728_v41  ;;  %v725_v40 = vld [vmem:[%s4678_s25 + $0x270] sm:$0xff] }
 0x19b   : > { %1729 = vmatprep.mubr.f32.mxu1 %v728_v41  ;;  %v730_v41 = vld [vmem:[%s4678_s25 + $0x298] sm:$0xff] }
 0x19d   : > { %1216 = vmatmul.mubr.f32.gmra.mrb[40].mxu0 %v727_v42 }
 0x19e   : > { %1730 = vmatmul.mubr.f32.gmra.mrb[40].mxu1 %v727_v42  ;;  %1221 = vmatprep.mubr.f32.mxu0 %v732_v43  ;;  %v729_v42 = vld [vmem:[%s4678_s25 + $0x290] sm:$0xff] }
 0x19f   : > { %1735 = vmatprep.mubr.f32.mxu1 %v732_v43  ;;  %v734_v43 = vld [vmem:[%s4678_s25 + $0x2b8] sm:$0xff] }
 0x1a1   : > { %1222 = vmatmul.mubr.f32.gmra.mrb[42].mxu0 %v731_v44 }
 0x1a2   : > { %1736 = vmatmul.mubr.f32.gmra.mrb[42].mxu1 %v731_v44  ;;  %1227 = vmatprep.mubr.f32.mxu0 %v736_v45  ;;  %v733_v44 = vld [vmem:[%s4678_s25 + $0x2b0] sm:$0xff] }
 0x1a3   : > { %1741 = vmatprep.mubr.f32.mxu1 %v736_v45  ;;  %v738_v45 = vld [vmem:[%s4678_s25 + $0x2d8] sm:$0xff] }
 0x1a5   : > { %1228 = vmatmul.mubr.f32.gmra.mrb[44].mxu0 %v735_v46 }
 0x1a6   : > { %1742 = vmatmul.mubr.f32.gmra.mrb[44].mxu1 %v735_v46  ;;  %1233 = vmatprep.mubr.f32.mxu0 %v740_v47  ;;  %v737_v46 = vld [vmem:[%s4678_s25 + $0x2d0] sm:$0xff] }
 0x1a7   : > { %1747 = vmatprep.mubr.f32.mxu1 %v740_v47  ;;  %v742_v47 = vld [vmem:[%s4678_s25 + $0x2f8] sm:$0xff] }
 0x1a9   : > { %1234 = vmatmul.mubr.f32.gmra.mrb[46].mxu0 %v739_v48 }
 0x1aa   : > { %1748 = vmatmul.mubr.f32.gmra.mrb[46].mxu1 %v739_v48  ;;  %1239 = vmatprep.mubr.f32.mxu0 %v744_v49  ;;  %v741_v48 = vld [vmem:[%s4678_s25 + $0x2f0] sm:$0xff] }
 0x1ab   : > { %1753 = vmatprep.mubr.f32.mxu1 %v744_v49  ;;  %v746_v49 = vld [vmem:[%s4678_s25 + $0x318] sm:$0xff] }
 0x1ad   : > { %1240 = vmatmul.mubr.f32.gmra.mrb[48].mxu0 %v743_v50 }
 0x1ae   : > { %1754 = vmatmul.mubr.f32.gmra.mrb[48].mxu1 %v743_v50  ;;  %1245 = vmatprep.mubr.f32.mxu0 %v748_v51  ;;  %v745_v50 = vld [vmem:[%s4678_s25 + $0x310] sm:$0xff] }
 0x1af   : > { %1759 = vmatprep.mubr.f32.mxu1 %v748_v51  ;;  %v750_v51 = vld [vmem:[%s4678_s25 + $0x338] sm:$0xff] }
 0x1b1   : > { %1246 = vmatmul.mubr.f32.gmra.mrb[50].mxu0 %v747_v52 }
 0x1b2   : > { %1760 = vmatmul.mubr.f32.gmra.mrb[50].mxu1 %v747_v52  ;;  %1251 = vmatprep.mubr.f32.mxu0 %v752_v53  ;;  %v749_v52 = vld [vmem:[%s4678_s25 + $0x330] sm:$0xff] }
 0x1b3   : > { %1765 = vmatprep.mubr.f32.mxu1 %v752_v53  ;;  %v754_v53 = vld [vmem:[%s4678_s25 + $0x358] sm:$0xff] }
 0x1b5   : > { %1252 = vmatmul.mubr.f32.gmra.mrb[52].mxu0 %v751_v54 }
 0x1b6   : > { %1766 = vmatmul.mubr.f32.gmra.mrb[52].mxu1 %v751_v54  ;;  %1257 = vmatprep.mubr.f32.mxu0 %v756_v55  ;;  %v753_v54 = vld [vmem:[%s4678_s25 + $0x350] sm:$0xff] }
 0x1b7   : > { %1771 = vmatprep.mubr.f32.mxu1 %v756_v55  ;;  %v758_v55 = vld [vmem:[%s4678_s25 + $0x378] sm:$0xff] }
 0x1b9   : > { %1258 = vmatmul.mubr.f32.gmra.mrb[54].mxu0 %v755_v56 }
 0x1ba   : > { %1772 = vmatmul.mubr.f32.gmra.mrb[54].mxu1 %v755_v56  ;;  %1263 = vmatprep.mubr.f32.mxu0 %v760_v57  ;;  %v757_v56 = vld [vmem:[%s4678_s25 + $0x370] sm:$0xff] }
 0x1bb   : > { %1777 = vmatprep.mubr.f32.mxu1 %v760_v57  ;;  %v762_v57 = vld [vmem:[%s4678_s25 + $0x398] sm:$0xff] }
 0x1bd   : > { %1264 = vmatmul.mubr.f32.gmra.mrb[56].mxu0 %v759_v58 }
 0x1be   : > { %1778 = vmatmul.mubr.f32.gmra.mrb[56].mxu1 %v759_v58  ;;  %1269 = vmatprep.mubr.f32.mxu0 %v764_v59  ;;  %v761_v58 = vld [vmem:[%s4678_s25 + $0x390] sm:$0xff] }
 0x1bf   : > { %1783 = vmatprep.mubr.f32.mxu1 %v764_v59  ;;  %v766_v59 = vld [vmem:[%s4678_s25 + $0x3b8] sm:$0xff] }
 0x1c1   : > { %1270 = vmatmul.mubr.f32.gmra.mrb[58].mxu0 %v763_v60 }
 0x1c2   : > { %1784 = vmatmul.mubr.f32.gmra.mrb[58].mxu1 %v763_v60  ;;  %1275 = vmatprep.mubr.f32.mxu0 %v768_v61  ;;  %v765_v60 = vld [vmem:[%s4678_s25 + $0x3b0] sm:$0xff] }
 0x1c3   : > { %1789 = vmatprep.mubr.f32.mxu1 %v768_v61  ;;  %v770_v61 = vld [vmem:[%s4678_s25 + $0x3d8] sm:$0xff] }
 0x1c5   : > { %1276 = vmatmul.mubr.f32.gmra.mrb[60].mxu0 %v767_v62 }
 0x1c6   : > { %1790 = vmatmul.mubr.f32.gmra.mrb[60].mxu1 %v767_v62  ;;  %1281 = vmatprep.mubr.f32.mxu0 %v772_v63  ;;  %v769_v62 = vld [vmem:[%s4678_s25 + $0x3d0] sm:$0xff] }
 0x1c7   : > { %1795 = vmatprep.mubr.f32.mxu1 %v772_v63  ;;  %v774_v63 = vld [vmem:[%s4678_s25 + $0x3f8] sm:$0xff] }
 0x1c9   : > { %1282 = vmatmul.mubr.f32.gmra.mrb[62].mxu0 %v771_v0 }
 0x1ca   : > { %1796 = vmatmul.mubr.f32.gmra.mrb[62].mxu1 %v771_v0  ;;  %1352 = vmatprep.mubr.f32.mxu0 %v650_v1  ;;  %v773_v0 = vld [vmem:[%s4678_s25 + $0x3f0] sm:$0xff] }
 0x1cb   : > { %1866 = vmatprep.mubr.f32.mxu1 %v650_v1  ;;  %v519_v1 = vld [vmem:[#allocation2] sm:$0xff] }
 0x1cd   : > { %1353 = vmatmul.mubr.f32.vlgmr.msra.gmra.mrb[0].mxu0 %v649_v2 }
 0x1ce   : > { %1867 = vmatmul.mubr.f32.vlgmr.msra.gmra.mrb[0].mxu1 %v649_v2  ;;  %1358 = vmatprep.mubr.f32.mxu0 %v654_v3  ;;  %v521_v2 = vld [vmem:[#allocation2 + $0x10] sm:$0xff] }
 0x1cf   : > { %1872 = vmatprep.mubr.f32.mxu1 %v654_v3  ;;  %v520_v3 = vld [vmem:[#allocation2 + $0x8] sm:$0xff] }
 0x1d1   : > { %1359 = vmatmul.mubr.f32.gmra.mrb[2].mxu0 %v653_v4 }
 0x1d2   : > { %1873 = vmatmul.mubr.f32.gmra.mrb[2].mxu1 %v653_v4  ;;  %1364 = vmatprep.mubr.f32.mxu0 %v658_v5 }
 0x1d3   : > { %1878 = vmatprep.mubr.f32.mxu1 %v658_v5  ;;  %v522_v5 = vld [vmem:[#allocation2 + $0x18] sm:$0xff] }
 0x1d5   : > { %1365 = vmatmul.mubr.f32.gmra.mrb[4].mxu0 %v657_v6 }
 0x1d6   : > { %1879 = vmatmul.mubr.f32.gmra.mrb[4].mxu1 %v657_v6  ;;  %1370 = vmatprep.mubr.f32.mxu0 %v662_v7 }
 0x1d7   : > { %1884 = vmatprep.mubr.f32.mxu1 %v662_v7 }
 0x1d9   : > { %1371 = vmatmul.mubr.f32.gmra.mrb[6].mxu0 %v661_v8 }
 0x1da   : > { %1885 = vmatmul.mubr.f32.gmra.mrb[6].mxu1 %v661_v8  ;;  %1376 = vmatprep.mubr.f32.mxu0 %v666_v9 }
 0x1db   : > { %1890 = vmatprep.mubr.f32.mxu1 %v666_v9 }
 0x1dd   : > { %1377 = vmatmul.mubr.f32.gmra.mrb[8].mxu0 %v665_v10 }
 0x1de   : > { %1891 = vmatmul.mubr.f32.gmra.mrb[8].mxu1 %v665_v10  ;;  %1382 = vmatprep.mubr.f32.mxu0 %v670_v11 }
 0x1df   : > { %1896 = vmatprep.mubr.f32.mxu1 %v670_v11 }
 0x1e1   : > { %1383 = vmatmul.mubr.f32.gmra.mrb[10].mxu0 %v669_v12 }
 0x1e2   : > { %1897 = vmatmul.mubr.f32.gmra.mrb[10].mxu1 %v669_v12  ;;  %1388 = vmatprep.mubr.f32.mxu0 %v674_v13  ;;  %v523_v12 = vld [vmem:[#allocation2 + $0x20] sm:$0xff] }
 0x1e3   : > { %1902 = vmatprep.mubr.f32.mxu1 %v674_v13 }
 0x1e5   : > { %1389 = vmatmul.mubr.f32.gmra.mrb[12].mxu0 %v673_v14 }
 0x1e6   : > { %1903 = vmatmul.mubr.f32.gmra.mrb[12].mxu1 %v673_v14  ;;  %1394 = vmatprep.mubr.f32.mxu0 %v678_v15  ;;  %v525_v14 = vld [vmem:[#allocation2 + $0x30] sm:$0xff] }
 0x1e7   : > { %1908 = vmatprep.mubr.f32.mxu1 %v678_v15  ;;  %v524_v15 = vld [vmem:[#allocation2 + $0x28] sm:$0xff] }
 0x1e9   : > { %1395 = vmatmul.mubr.f32.gmra.mrb[14].mxu0 %v677_v16 }
 0x1ea   : > { %1909 = vmatmul.mubr.f32.gmra.mrb[14].mxu1 %v677_v16  ;;  %1400 = vmatprep.mubr.f32.mxu0 %v682_v17 }
 0x1eb   : > { %1914 = vmatprep.mubr.f32.mxu1 %v682_v17  ;;  %v526_v17 = vld [vmem:[#allocation2 + $0x38] sm:$0xff] }
 0x1ed   : > { %1401 = vmatmul.mubr.f32.gmra.mrb[16].mxu0 %v681_v18 }
 0x1ee   : > { %1915 = vmatmul.mubr.f32.gmra.mrb[16].mxu1 %v681_v18  ;;  %1406 = vmatprep.mubr.f32.mxu0 %v686_v19 }
 0x1ef   : > { %1920 = vmatprep.mubr.f32.mxu1 %v686_v19 }
 0x1f1   : > { %1407 = vmatmul.mubr.f32.gmra.mrb[18].mxu0 %v685_v20 }
 0x1f2   : > { %1921 = vmatmul.mubr.f32.gmra.mrb[18].mxu1 %v685_v20  ;;  %1412 = vmatprep.mubr.f32.mxu0 %v690_v21 }
 0x1f3   : > { %1926 = vmatprep.mubr.f32.mxu1 %v690_v21 }
 0x1f5   : > { %1413 = vmatmul.mubr.f32.gmra.mrb[20].mxu0 %v689_v22 }
 0x1f6   : > { %1927 = vmatmul.mubr.f32.gmra.mrb[20].mxu1 %v689_v22  ;;  %1418 = vmatprep.mubr.f32.mxu0 %v694_v23 }
 0x1f7   : > { %1932 = vmatprep.mubr.f32.mxu1 %v694_v23 }
 0x1f9   : > { %1419 = vmatmul.mubr.f32.gmra.mrb[22].mxu0 %v693_v24 }
 0x1fa   : > { %1933 = vmatmul.mubr.f32.gmra.mrb[22].mxu1 %v693_v24  ;;  %1424 = vmatprep.mubr.f32.mxu0 %v698_v25  ;;  %v527_v24 = vld [vmem:[#allocation2 + $0x40] sm:$0xff] }
 0x1fb   : > { %1938 = vmatprep.mubr.f32.mxu1 %v698_v25 }
 0x1fd   : > { %1425 = vmatmul.mubr.f32.gmra.mrb[24].mxu0 %v697_v26 }
 0x1fe   : > { %1939 = vmatmul.mubr.f32.gmra.mrb[24].mxu1 %v697_v26  ;;  %1430 = vmatprep.mubr.f32.mxu0 %v702_v27  ;;  %v529_v26 = vld [vmem:[#allocation2 + $0x50] sm:$0xff] }
 0x1ff   : > { %1944 = vmatprep.mubr.f32.mxu1 %v702_v27  ;;  %v528_v27 = vld [vmem:[#allocation2 + $0x48] sm:$0xff] }
 0x201   : > { %1431 = vmatmul.mubr.f32.gmra.mrb[26].mxu0 %v701_v28 }
 0x202   : > { %1945 = vmatmul.mubr.f32.gmra.mrb[26].mxu1 %v701_v28  ;;  %1436 = vmatprep.mubr.f32.mxu0 %v706_v29 }
 0x203   : > { %1950 = vmatprep.mubr.f32.mxu1 %v706_v29  ;;  %v530_v29 = vld [vmem:[#allocation2 + $0x58] sm:$0xff] }
 0x205   : > { %1437 = vmatmul.mubr.f32.gmra.mrb[28].mxu0 %v705_v30 }
 0x206   : > { %1951 = vmatmul.mubr.f32.gmra.mrb[28].mxu1 %v705_v30  ;;  %1442 = vmatprep.mubr.f32.mxu0 %v710_v31 }
 0x207   : > { %1956 = vmatprep.mubr.f32.mxu1 %v710_v31 }
 0x209   : > { %1443 = vmatmul.mubr.f32.gmra.mrb[30].mxu0 %v709_v32 }
 0x20a   : > { %1957 = vmatmul.mubr.f32.gmra.mrb[30].mxu1 %v709_v32  ;;  %1448 = vmatprep.mubr.f32.mxu0 %v714_v33 }
 0x20b   : > { %1962 = vmatprep.mubr.f32.mxu1 %v714_v33 }
 0x20d   : > { %1449 = vmatmul.mubr.f32.gmra.mrb[32].mxu0 %v713_v34 }
 0x20e   : > { %1963 = vmatmul.mubr.f32.gmra.mrb[32].mxu1 %v713_v34  ;;  %1454 = vmatprep.mubr.f32.mxu0 %v718_v35 }
 0x20f   : > { %1968 = vmatprep.mubr.f32.mxu1 %v718_v35 }
 0x211   : > { %1455 = vmatmul.mubr.f32.gmra.mrb[34].mxu0 %v717_v36 }
 0x212   : > { %1969 = vmatmul.mubr.f32.gmra.mrb[34].mxu1 %v717_v36  ;;  %1460 = vmatprep.mubr.f32.mxu0 %v722_v37  ;;  %v531_v36 = vld [vmem:[#allocation2 + $0x60] sm:$0xff] }
 0x213   : > { %1974 = vmatprep.mubr.f32.mxu1 %v722_v37 }
 0x215   : > { %1461 = vmatmul.mubr.f32.gmra.mrb[36].mxu0 %v721_v38 }
 0x216   : > { %1975 = vmatmul.mubr.f32.gmra.mrb[36].mxu1 %v721_v38  ;;  %1466 = vmatprep.mubr.f32.mxu0 %v726_v39  ;;  %v533_v38 = vld [vmem:[#allocation2 + $0x70] sm:$0xff] }
 0x217   : > { %1980 = vmatprep.mubr.f32.mxu1 %v726_v39  ;;  %v532_v39 = vld [vmem:[#allocation2 + $0x68] sm:$0xff] }
 0x219   : > { %1467 = vmatmul.mubr.f32.gmra.mrb[38].mxu0 %v725_v40 }
 0x21a   : > { %1981 = vmatmul.mubr.f32.gmra.mrb[38].mxu1 %v725_v40  ;;  %1472 = vmatprep.mubr.f32.mxu0 %v730_v41 }
 0x21b   : > { %1986 = vmatprep.mubr.f32.mxu1 %v730_v41  ;;  %v534_v41 = vld [vmem:[#allocation2 + $0x78] sm:$0xff] }
 0x21d   : > { %1473 = vmatmul.mubr.f32.gmra.mrb[40].mxu0 %v729_v42 }
 0x21e   : > { %1987 = vmatmul.mubr.f32.gmra.mrb[40].mxu1 %v729_v42  ;;  %1478 = vmatprep.mubr.f32.mxu0 %v734_v43 }
 0x21f   : > { %1992 = vmatprep.mubr.f32.mxu1 %v734_v43 }
 0x221   : > { %1479 = vmatmul.mubr.f32.gmra.mrb[42].mxu0 %v733_v44 }
 0x222   : > { %1993 = vmatmul.mubr.f32.gmra.mrb[42].mxu1 %v733_v44  ;;  %1484 = vmatprep.mubr.f32.mxu0 %v738_v45 }
 0x223   : > { %1998 = vmatprep.mubr.f32.mxu1 %v738_v45 }
 0x225   : > { %1485 = vmatmul.mubr.f32.gmra.mrb[44].mxu0 %v737_v46 }
 0x226   : > { %1999 = vmatmul.mubr.f32.gmra.mrb[44].mxu1 %v737_v46  ;;  %1490 = vmatprep.mubr.f32.mxu0 %v742_v47 }
 0x227   : > { %2004 = vmatprep.mubr.f32.mxu1 %v742_v47 }
 0x229   : > { %1491 = vmatmul.mubr.f32.gmra.mrb[46].mxu0 %v741_v48 }
 0x22a   : > { %2005 = vmatmul.mubr.f32.gmra.mrb[46].mxu1 %v741_v48  ;;  %1496 = vmatprep.mubr.f32.mxu0 %v746_v49  ;;  %v535_v48 = vld [vmem:[#allocation2 + $0x80] sm:$0xff] }
 0x22b   : > { %2010 = vmatprep.mubr.f32.mxu1 %v746_v49 }
 0x22d   : > { %1497 = vmatmul.mubr.f32.gmra.mrb[48].mxu0 %v745_v50 }
 0x22e   : > { %2011 = vmatmul.mubr.f32.gmra.mrb[48].mxu1 %v745_v50  ;;  %1502 = vmatprep.mubr.f32.mxu0 %v750_v51  ;;  %v537_v50 = vld [vmem:[#allocation2 + $0x90] sm:$0xff] }
 0x22f   : > { %2016 = vmatprep.mubr.f32.mxu1 %v750_v51  ;;  %v536_v51 = vld [vmem:[#allocation2 + $0x88] sm:$0xff] }
 0x231   : > { %1503 = vmatmul.mubr.f32.gmra.mrb[50].mxu0 %v749_v52 }
 0x232   : > { %2017 = vmatmul.mubr.f32.gmra.mrb[50].mxu1 %v749_v52  ;;  %1508 = vmatprep.mubr.f32.mxu0 %v754_v53 }
 0x233   : > { %2022 = vmatprep.mubr.f32.mxu1 %v754_v53  ;;  %v538_v53 = vld [vmem:[#allocation2 + $0x98] sm:$0xff] }
 0x235   : > { %1509 = vmatmul.mubr.f32.gmra.mrb[52].mxu0 %v753_v54 }
 0x236   : > { %2023 = vmatmul.mubr.f32.gmra.mrb[52].mxu1 %v753_v54  ;;  %1514 = vmatprep.mubr.f32.mxu0 %v758_v55 }
 0x237   : > { %2028 = vmatprep.mubr.f32.mxu1 %v758_v55 }
 0x239   : > { %1515 = vmatmul.mubr.f32.gmra.mrb[54].mxu0 %v757_v56 }
 0x23a   : > { %2029 = vmatmul.mubr.f32.gmra.mrb[54].mxu1 %v757_v56  ;;  %1520 = vmatprep.mubr.f32.mxu0 %v762_v57 }
 0x23b   : > { %2034 = vmatprep.mubr.f32.mxu1 %v762_v57 }
 0x23d   : > { %1521 = vmatmul.mubr.f32.gmra.mrb[56].mxu0 %v761_v58 }
 0x23e   : > { %2035 = vmatmul.mubr.f32.gmra.mrb[56].mxu1 %v761_v58  ;;  %1526 = vmatprep.mubr.f32.mxu0 %v766_v59 }
 0x23f   : > { %2040 = vmatprep.mubr.f32.mxu1 %v766_v59 }
 0x241   : > { %1527 = vmatmul.mubr.f32.gmra.mrb[58].mxu0 %v765_v60 }
 0x242   : > { %2041 = vmatmul.mubr.f32.gmra.mrb[58].mxu1 %v765_v60  ;;  %1532 = vmatprep.mubr.f32.mxu0 %v770_v61  ;;  %v539_v60 = vld [vmem:[#allocation2 + $0xa0] sm:$0xff] }
 0x243   : > { %2046 = vmatprep.mubr.f32.mxu1 %v770_v61 }
 0x245   : > { %1533 = vmatmul.mubr.f32.gmra.mrb[60].mxu0 %v769_v62 }
 0x246   : > { %2047 = vmatmul.mubr.f32.gmra.mrb[60].mxu1 %v769_v62  ;;  %1538 = vmatprep.mubr.f32.mxu0 %v774_v63  ;;  %v541_v62 = vld [vmem:[#allocation2 + $0xb0] sm:$0xff] }
 0x247   : > { %2052 = vmatprep.mubr.f32.mxu1 %v774_v63  ;;  %v540_v63 = vld [vmem:[#allocation2 + $0xa8] sm:$0xff] }
 0x249   : > { %1539 = vmatmul.mubr.f32.gmra.mrb[62].mxu0 %v773_v0 }
 0x24a   : > { %2053 = vmatmul.mubr.f32.gmra.mrb[62].mxu1 %v773_v0 }
 0x2a0   : > { %v1354_v4 = vpop.f32.mrb[0].mxu0 }
 0x2a1   : > { %v2059_v6 = vadd.f32 %v1354_v4, %v519_v1  ;;  %v1868_v7 = vpop.f32.mrb[0].mxu1  ;;  %v1356_v8 = vpop.f32.mrb[1].mxu0  ;;  %v542_v1 = vld [vmem:[#allocation2 + $0xb8] sm:$0xff] }
 0x2a2   : > { %v2061_v9 = vadd.f32 %v1868_v7, %v521_v2  ;;  %v2060_v10 = vadd.f32 %v1356_v8, %v520_v3  ;;  %v1870_v11 = vpop.f32.mrb[1].mxu1  ;;  %v543_v8 = vld [vmem:[#allocation2 + $0xc0] sm:$0xff] }
 0x2a3   : > { %2187 = vst [vmem:[#allocation2] sm:$0xff] %v2059_v6  ;;  %v2062_v13 = vadd.f32 %v1870_v11, %v522_v5  ;;  %v544_v11 = vld [vmem:[#allocation2 + $0xc8] sm:$0xff] }
 0x2a4   : > { %2189 = vst [vmem:[#allocation2 + $0x10] sm:$0xff] %v2061_v9  ;;  %2188 = vst [vmem:[#allocation2 + $0x8] sm:$0xff] %v2060_v10  ;;  %v1360_v16 = vpop.f32.mrb[2].mxu0  ;;  %v545_v10 = vld [vmem:[#allocation2 + $0xd0] sm:$0xff] }
 0x2a5   : > { %2190 = vst [vmem:[#allocation2 + $0x18] sm:$0xff] %v2062_v13  ;;  %v2063_v18 = vadd.f32 %v1360_v16, %v523_v12  ;;  %v1874_v19 = vpop.f32.mrb[2].mxu1  ;;  %v1362_v20 = vpop.f32.mrb[3].mxu0  ;;  %v546_v13 = vld [vmem:[#allocation2 + $0xd8] sm:$0xff] }
 0x2a6   : > { %v2065_v21 = vadd.f32 %v1874_v19, %v525_v14  ;;  %v2064_v22 = vadd.f32 %v1362_v20, %v524_v15  ;;  %v1876_v23 = vpop.f32.mrb[3].mxu1  ;;  %v547_v20 = vld [vmem:[#allocation2 + $0xe0] sm:$0xff] }
 0x2a7   : > { %2191 = vst [vmem:[#allocation2 + $0x20] sm:$0xff] %v2063_v18  ;;  %v2066_v25 = vadd.f32 %v1876_v23, %v526_v17  ;;  %v548_v23 = vld [vmem:[#allocation2 + $0xe8] sm:$0xff] }
 0x2a8   : > { %2193 = vst [vmem:[#allocation2 + $0x30] sm:$0xff] %v2065_v21  ;;  %2192 = vst [vmem:[#allocation2 + $0x28] sm:$0xff] %v2064_v22  ;;  %v1366_v28 = vpop.f32.mrb[4].mxu0  ;;  %v549_v22 = vld [vmem:[#allocation2 + $0xf0] sm:$0xff] }
 0x2a9   : > { %2194 = vst [vmem:[#allocation2 + $0x38] sm:$0xff] %v2066_v25  ;;  %v2067_v30 = vadd.f32 %v1366_v28, %v527_v24  ;;  %v1880_v31 = vpop.f32.mrb[4].mxu1  ;;  %v1368_v32 = vpop.f32.mrb[5].mxu0  ;;  %v550_v25 = vld [vmem:[#allocation2 + $0xf8] sm:$0xff] }
 0x2aa   : > { %v2069_v33 = vadd.f32 %v1880_v31, %v529_v26  ;;  %v2068_v34 = vadd.f32 %v1368_v32, %v528_v27  ;;  %v1882_v35 = vpop.f32.mrb[5].mxu1  ;;  %v551_v32 = vld [vmem:[#allocation2 + $0x100] sm:$0xff] }
 0x2ab   : > { %2195 = vst [vmem:[#allocation2 + $0x40] sm:$0xff] %v2067_v30  ;;  %v2070_v37 = vadd.f32 %v1882_v35, %v530_v29  ;;  %v552_v35 = vld [vmem:[#allocation2 + $0x108] sm:$0xff] }
 0x2ac   : > { %2197 = vst [vmem:[#allocation2 + $0x50] sm:$0xff] %v2069_v33  ;;  %2196 = vst [vmem:[#allocation2 + $0x48] sm:$0xff] %v2068_v34  ;;  %v1372_v40 = vpop.f32.mrb[6].mxu0  ;;  %v553_v34 = vld [vmem:[#allocation2 + $0x110] sm:$0xff] }
 0x2ad   : > { %2198 = vst [vmem:[#allocation2 + $0x58] sm:$0xff] %v2070_v37  ;;  %v2071_v42 = vadd.f32 %v1372_v40, %v531_v36  ;;  %v1886_v43 = vpop.f32.mrb[6].mxu1  ;;  %v1374_v44 = vpop.f32.mrb[7].mxu0  ;;  %v554_v37 = vld [vmem:[#allocation2 + $0x118] sm:$0xff] }
 0x2ae   : > { %v2073_v45 = vadd.f32 %v1886_v43, %v533_v38  ;;  %v2072_v46 = vadd.f32 %v1374_v44, %v532_v39  ;;  %v1888_v47 = vpop.f32.mrb[7].mxu1  ;;  %v555_v44 = vld [vmem:[#allocation2 + $0x120] sm:$0xff] }
 0x2af   : > { %2199 = vst [vmem:[#allocation2 + $0x60] sm:$0xff] %v2071_v42  ;;  %v2074_v49 = vadd.f32 %v1888_v47, %v534_v41  ;;  %v556_v47 = vld [vmem:[#allocation2 + $0x128] sm:$0xff] }
 0x2b0   : > { %2201 = vst [vmem:[#allocation2 + $0x70] sm:$0xff] %v2073_v45  ;;  %2200 = vst [vmem:[#allocation2 + $0x68] sm:$0xff] %v2072_v46  ;;  %v1378_v52 = vpop.f32.mrb[8].mxu0  ;;  %v557_v46 = vld [vmem:[#allocation2 + $0x130] sm:$0xff] }
 0x2b1   : > { %2202 = vst [vmem:[#allocation2 + $0x78] sm:$0xff] %v2074_v49  ;;  %v2075_v54 = vadd.f32 %v1378_v52, %v535_v48  ;;  %v1892_v55 = vpop.f32.mrb[8].mxu1  ;;  %v1380_v56 = vpop.f32.mrb[9].mxu0  ;;  %v558_v49 = vld [vmem:[#allocation2 + $0x138] sm:$0xff] }
 0x2b2   : > { %v2077_v57 = vadd.f32 %v1892_v55, %v537_v50  ;;  %v2076_v58 = vadd.f32 %v1380_v56, %v536_v51  ;;  %v1894_v59 = vpop.f32.mrb[9].mxu1  ;;  %v559_v56 = vld [vmem:[#allocation2 + $0x140] sm:$0xff] }
 0x2b3   : > { %2203 = vst [vmem:[#allocation2 + $0x80] sm:$0xff] %v2075_v54  ;;  %v2078_v61 = vadd.f32 %v1894_v59, %v538_v53  ;;  %v560_v59 = vld [vmem:[#allocation2 + $0x148] sm:$0xff] }
 0x2b4   : > { %2205 = vst [vmem:[#allocation2 + $0x90] sm:$0xff] %v2077_v57  ;;  %2204 = vst [vmem:[#allocation2 + $0x88] sm:$0xff] %v2076_v58  ;;  %v1384_v0 = vpop.f32.mrb[10].mxu0  ;;  %v561_v58 = vld [vmem:[#allocation2 + $0x150] sm:$0xff] }
 0x2b5   : > { %2206 = vst [vmem:[#allocation2 + $0x98] sm:$0xff] %v2078_v61  ;;  %v2079_v2 = vadd.f32 %v1384_v0, %v539_v60  ;;  %v1898_v3 = vpop.f32.mrb[10].mxu1  ;;  %v1386_v4 = vpop.f32.mrb[11].mxu0  ;;  %v562_v61 = vld [vmem:[#allocation2 + $0x158] sm:$0xff] }
 0x2b6   : > { %v2081_v5 = vadd.f32 %v1898_v3, %v541_v62  ;;  %v2080_v6 = vadd.f32 %v1386_v4, %v540_v63  ;;  %v1900_v7 = vpop.f32.mrb[11].mxu1  ;;  %v563_v4 = vld [vmem:[#allocation2 + $0x160] sm:$0xff] }
 0x2b7   : > { %2207 = vst [vmem:[#allocation2 + $0xa0] sm:$0xff] %v2079_v2  ;;  %v2082_v9 = vadd.f32 %v1900_v7, %v542_v1  ;;  %v564_v7 = vld [vmem:[#allocation2 + $0x168] sm:$0xff] }
 0x2b8   : > { %2209 = vst [vmem:[#allocation2 + $0xb0] sm:$0xff] %v2081_v5  ;;  %2208 = vst [vmem:[#allocation2 + $0xa8] sm:$0xff] %v2080_v6  ;;  %v1390_v12 = vpop.f32.mrb[12].mxu0  ;;  %v565_v6 = vld [vmem:[#allocation2 + $0x170] sm:$0xff] }
 0x2b9   : > { %2210 = vst [vmem:[#allocation2 + $0xb8] sm:$0xff] %v2082_v9  ;;  %v2083_v14 = vadd.f32 %v1390_v12, %v543_v8  ;;  %v1904_v15 = vpop.f32.mrb[12].mxu1  ;;  %v1392_v16 = vpop.f32.mrb[13].mxu0  ;;  %v566_v9 = vld [vmem:[#allocation2 + $0x178] sm:$0xff] }
 0x2ba   : > { %v2085_v17 = vadd.f32 %v1904_v15, %v545_v10  ;;  %v2084_v18 = vadd.f32 %v1392_v16, %v544_v11  ;;  %v1906_v19 = vpop.f32.mrb[13].mxu1  ;;  %v567_v16 = vld [vmem:[#allocation2 + $0x180] sm:$0xff] }
 0x2bb   : > { %2211 = vst [vmem:[#allocation2 + $0xc0] sm:$0xff] %v2083_v14  ;;  %v2086_v21 = vadd.f32 %v1906_v19, %v546_v13  ;;  %v568_v19 = vld [vmem:[#allocation2 + $0x188] sm:$0xff] }
 0x2bc   : > { %2213 = vst [vmem:[#allocation2 + $0xd0] sm:$0xff] %v2085_v17  ;;  %2212 = vst [vmem:[#allocation2 + $0xc8] sm:$0xff] %v2084_v18  ;;  %v1396_v24 = vpop.f32.mrb[14].mxu0  ;;  %v569_v18 = vld [vmem:[#allocation2 + $0x190] sm:$0xff] }
 0x2bd   : > { %2214 = vst [vmem:[#allocation2 + $0xd8] sm:$0xff] %v2086_v21  ;;  %v2087_v26 = vadd.f32 %v1396_v24, %v547_v20  ;;  %v1910_v27 = vpop.f32.mrb[14].mxu1  ;;  %v1398_v28 = vpop.f32.mrb[15].mxu0  ;;  %v570_v21 = vld [vmem:[#allocation2 + $0x198] sm:$0xff] }
 0x2be   : > { %v2089_v29 = vadd.f32 %v1910_v27, %v549_v22  ;;  %v2088_v30 = vadd.f32 %v1398_v28, %v548_v23  ;;  %v1912_v31 = vpop.f32.mrb[15].mxu1  ;;  %v571_v28 = vld [vmem:[#allocation2 + $0x1a0] sm:$0xff] }
 0x2bf   : > { %2215 = vst [vmem:[#allocation2 + $0xe0] sm:$0xff] %v2087_v26  ;;  %v2090_v33 = vadd.f32 %v1912_v31, %v550_v25  ;;  %v572_v31 = vld [vmem:[#allocation2 + $0x1a8] sm:$0xff] }
 0x2c0   : > { %2217 = vst [vmem:[#allocation2 + $0xf0] sm:$0xff] %v2089_v29  ;;  %2216 = vst [vmem:[#allocation2 + $0xe8] sm:$0xff] %v2088_v30  ;;  %v1402_v36 = vpop.f32.mrb[16].mxu0  ;;  %v573_v30 = vld [vmem:[#allocation2 + $0x1b0] sm:$0xff] }
 0x2c1   : > { %2218 = vst [vmem:[#allocation2 + $0xf8] sm:$0xff] %v2090_v33  ;;  %v2091_v38 = vadd.f32 %v1402_v36, %v551_v32  ;;  %v1916_v39 = vpop.f32.mrb[16].mxu1  ;;  %v1404_v40 = vpop.f32.mrb[17].mxu0  ;;  %v574_v33 = vld [vmem:[#allocation2 + $0x1b8] sm:$0xff] }
 0x2c2   : > { %v2093_v41 = vadd.f32 %v1916_v39, %v553_v34  ;;  %v2092_v42 = vadd.f32 %v1404_v40, %v552_v35  ;;  %v1918_v43 = vpop.f32.mrb[17].mxu1  ;;  %v575_v40 = vld [vmem:[#allocation2 + $0x1c0] sm:$0xff] }
 0x2c3   : > { %2219 = vst [vmem:[#allocation2 + $0x100] sm:$0xff] %v2091_v38  ;;  %v2094_v45 = vadd.f32 %v1918_v43, %v554_v37  ;;  %v576_v43 = vld [vmem:[#allocation2 + $0x1c8] sm:$0xff] }
 0x2c4   : > { %2221 = vst [vmem:[#allocation2 + $0x110] sm:$0xff] %v2093_v41  ;;  %2220 = vst [vmem:[#allocation2 + $0x108] sm:$0xff] %v2092_v42  ;;  %v1408_v48 = vpop.f32.mrb[18].mxu0  ;;  %v577_v42 = vld [vmem:[#allocation2 + $0x1d0] sm:$0xff] }
 0x2c5   : > { %2222 = vst [vmem:[#allocation2 + $0x118] sm:$0xff] %v2094_v45  ;;  %v2095_v50 = vadd.f32 %v1408_v48, %v555_v44  ;;  %v1922_v51 = vpop.f32.mrb[18].mxu1  ;;  %v1410_v52 = vpop.f32.mrb[19].mxu0  ;;  %v578_v45 = vld [vmem:[#allocation2 + $0x1d8] sm:$0xff] }
 0x2c6   : > { %v2097_v53 = vadd.f32 %v1922_v51, %v557_v46  ;;  %v2096_v54 = vadd.f32 %v1410_v52, %v556_v47  ;;  %v1924_v55 = vpop.f32.mrb[19].mxu1  ;;  %v579_v52 = vld [vmem:[#allocation2 + $0x1e0] sm:$0xff] }
 0x2c7   : > { %2223 = vst [vmem:[#allocation2 + $0x120] sm:$0xff] %v2095_v50  ;;  %v2098_v57 = vadd.f32 %v1924_v55, %v558_v49  ;;  %v580_v55 = vld [vmem:[#allocation2 + $0x1e8] sm:$0xff] }
 0x2c8   : > { %2225 = vst [vmem:[#allocation2 + $0x130] sm:$0xff] %v2097_v53  ;;  %2224 = vst [vmem:[#allocation2 + $0x128] sm:$0xff] %v2096_v54  ;;  %v1414_v60 = vpop.f32.mrb[20].mxu0  ;;  %v581_v54 = vld [vmem:[#allocation2 + $0x1f0] sm:$0xff] }
 0x2c9   : > { %2226 = vst [vmem:[#allocation2 + $0x138] sm:$0xff] %v2098_v57  ;;  %v2099_v62 = vadd.f32 %v1414_v60, %v559_v56  ;;  %v1928_v63 = vpop.f32.mrb[20].mxu1  ;;  %v1416_v0 = vpop.f32.mrb[21].mxu0  ;;  %v582_v57 = vld [vmem:[#allocation2 + $0x1f8] sm:$0xff] }
 0x2ca   : > { %v2101_v1 = vadd.f32 %v1928_v63, %v561_v58  ;;  %v2100_v2 = vadd.f32 %v1416_v0, %v560_v59  ;;  %v1930_v3 = vpop.f32.mrb[21].mxu1  ;;  %v583_v0 = vld [vmem:[#allocation2 + $0x200] sm:$0xff] }
 0x2cb   : > { %2227 = vst [vmem:[#allocation2 + $0x140] sm:$0xff] %v2099_v62  ;;  %v2102_v5 = vadd.f32 %v1930_v3, %v562_v61  ;;  %v584_v3 = vld [vmem:[#allocation2 + $0x208] sm:$0xff] }
 0x2cc   : > { %2229 = vst [vmem:[#allocation2 + $0x150] sm:$0xff] %v2101_v1  ;;  %2228 = vst [vmem:[#allocation2 + $0x148] sm:$0xff] %v2100_v2  ;;  %v1420_v8 = vpop.f32.mrb[22].mxu0  ;;  %v585_v2 = vld [vmem:[#allocation2 + $0x210] sm:$0xff] }
 0x2cd   : > { %2230 = vst [vmem:[#allocation2 + $0x158] sm:$0xff] %v2102_v5  ;;  %v2103_v10 = vadd.f32 %v1420_v8, %v563_v4  ;;  %v1934_v11 = vpop.f32.mrb[22].mxu1  ;;  %v1422_v12 = vpop.f32.mrb[23].mxu0  ;;  %v586_v5 = vld [vmem:[#allocation2 + $0x218] sm:$0xff] }
 0x2ce   : > { %v2105_v13 = vadd.f32 %v1934_v11, %v565_v6  ;;  %v2104_v14 = vadd.f32 %v1422_v12, %v564_v7  ;;  %v1936_v15 = vpop.f32.mrb[23].mxu1  ;;  %v587_v12 = vld [vmem:[#allocation2 + $0x220] sm:$0xff] }
 0x2cf   : > { %2231 = vst [vmem:[#allocation2 + $0x160] sm:$0xff] %v2103_v10  ;;  %v2106_v17 = vadd.f32 %v1936_v15, %v566_v9  ;;  %v588_v15 = vld [vmem:[#allocation2 + $0x228] sm:$0xff] }
 0x2d0   : > { %2233 = vst [vmem:[#allocation2 + $0x170] sm:$0xff] %v2105_v13  ;;  %2232 = vst [vmem:[#allocation2 + $0x168] sm:$0xff] %v2104_v14  ;;  %v1426_v20 = vpop.f32.mrb[24].mxu0  ;;  %v589_v14 = vld [vmem:[#allocation2 + $0x230] sm:$0xff] }
 0x2d1   : > { %2234 = vst [vmem:[#allocation2 + $0x178] sm:$0xff] %v2106_v17  ;;  %v2107_v22 = vadd.f32 %v1426_v20, %v567_v16  ;;  %v1940_v23 = vpop.f32.mrb[24].mxu1  ;;  %v1428_v24 = vpop.f32.mrb[25].mxu0  ;;  %v590_v17 = vld [vmem:[#allocation2 + $0x238] sm:$0xff] }
 0x2d2   : > { %v2109_v25 = vadd.f32 %v1940_v23, %v569_v18  ;;  %v2108_v26 = vadd.f32 %v1428_v24, %v568_v19  ;;  %v1942_v27 = vpop.f32.mrb[25].mxu1  ;;  %v591_v24 = vld [vmem:[#allocation2 + $0x240] sm:$0xff] }
 0x2d3   : > { %2235 = vst [vmem:[#allocation2 + $0x180] sm:$0xff] %v2107_v22  ;;  %v2110_v29 = vadd.f32 %v1942_v27, %v570_v21  ;;  %v592_v27 = vld [vmem:[#allocation2 + $0x248] sm:$0xff] }
 0x2d4   : > { %2237 = vst [vmem:[#allocation2 + $0x190] sm:$0xff] %v2109_v25  ;;  %2236 = vst [vmem:[#allocation2 + $0x188] sm:$0xff] %v2108_v26  ;;  %v1432_v32 = vpop.f32.mrb[26].mxu0  ;;  %v593_v26 = vld [vmem:[#allocation2 + $0x250] sm:$0xff] }
 0x2d5   : > { %2238 = vst [vmem:[#allocation2 + $0x198] sm:$0xff] %v2110_v29  ;;  %v2111_v34 = vadd.f32 %v1432_v32, %v571_v28  ;;  %v1946_v35 = vpop.f32.mrb[26].mxu1  ;;  %v1434_v36 = vpop.f32.mrb[27].mxu0  ;;  %v594_v29 = vld [vmem:[#allocation2 + $0x258] sm:$0xff] }
 0x2d6   : > { %v2113_v37 = vadd.f32 %v1946_v35, %v573_v30  ;;  %v2112_v38 = vadd.f32 %v1434_v36, %v572_v31  ;;  %v1948_v39 = vpop.f32.mrb[27].mxu1  ;;  %v595_v36 = vld [vmem:[#allocation2 + $0x260] sm:$0xff] }
 0x2d7   : > { %2239 = vst [vmem:[#allocation2 + $0x1a0] sm:$0xff] %v2111_v34  ;;  %v2114_v41 = vadd.f32 %v1948_v39, %v574_v33  ;;  %v596_v39 = vld [vmem:[#allocation2 + $0x268] sm:$0xff] }
 0x2d8   : > { %2241 = vst [vmem:[#allocation2 + $0x1b0] sm:$0xff] %v2113_v37  ;;  %2240 = vst [vmem:[#allocation2 + $0x1a8] sm:$0xff] %v2112_v38  ;;  %v1438_v44 = vpop.f32.mrb[28].mxu0  ;;  %v597_v38 = vld [vmem:[#allocation2 + $0x270] sm:$0xff] }
 0x2d9   : > { %2242 = vst [vmem:[#allocation2 + $0x1b8] sm:$0xff] %v2114_v41  ;;  %v2115_v46 = vadd.f32 %v1438_v44, %v575_v40  ;;  %v1952_v47 = vpop.f32.mrb[28].mxu1  ;;  %v1440_v48 = vpop.f32.mrb[29].mxu0  ;;  %v598_v41 = vld [vmem:[#allocation2 + $0x278] sm:$0xff] }
 0x2da   : > { %v2117_v49 = vadd.f32 %v1952_v47, %v577_v42  ;;  %v2116_v50 = vadd.f32 %v1440_v48, %v576_v43  ;;  %v1954_v51 = vpop.f32.mrb[29].mxu1  ;;  %v599_v48 = vld [vmem:[#allocation2 + $0x280] sm:$0xff] }
 0x2db   : > { %2243 = vst [vmem:[#allocation2 + $0x1c0] sm:$0xff] %v2115_v46  ;;  %v2118_v53 = vadd.f32 %v1954_v51, %v578_v45  ;;  %v600_v51 = vld [vmem:[#allocation2 + $0x288] sm:$0xff] }
 0x2dc   : > { %2245 = vst [vmem:[#allocation2 + $0x1d0] sm:$0xff] %v2117_v49  ;;  %2244 = vst [vmem:[#allocation2 + $0x1c8] sm:$0xff] %v2116_v50  ;;  %v1444_v56 = vpop.f32.mrb[30].mxu0  ;;  %v601_v50 = vld [vmem:[#allocation2 + $0x290] sm:$0xff] }
 0x2dd   : > { %2246 = vst [vmem:[#allocation2 + $0x1d8] sm:$0xff] %v2118_v53  ;;  %v2119_v58 = vadd.f32 %v1444_v56, %v579_v52  ;;  %v1958_v59 = vpop.f32.mrb[30].mxu1  ;;  %v1446_v60 = vpop.f32.mrb[31].mxu0  ;;  %v602_v53 = vld [vmem:[#allocation2 + $0x298] sm:$0xff] }
 0x2de   : > { %v2121_v61 = vadd.f32 %v1958_v59, %v581_v54  ;;  %v2120_v62 = vadd.f32 %v1446_v60, %v580_v55  ;;  %v1960_v63 = vpop.f32.mrb[31].mxu1  ;;  %v603_v60 = vld [vmem:[#allocation2 + $0x2a0] sm:$0xff] }
 0x2df   : > { %2247 = vst [vmem:[#allocation2 + $0x1e0] sm:$0xff] %v2119_v58  ;;  %v2122_v1 = vadd.f32 %v1960_v63, %v582_v57  ;;  %v604_v63 = vld [vmem:[#allocation2 + $0x2a8] sm:$0xff] }
 0x2e0   : > { %2249 = vst [vmem:[#allocation2 + $0x1f0] sm:$0xff] %v2121_v61  ;;  %2248 = vst [vmem:[#allocation2 + $0x1e8] sm:$0xff] %v2120_v62  ;;  %v1450_v4 = vpop.f32.mrb[32].mxu0  ;;  %v605_v62 = vld [vmem:[#allocation2 + $0x2b0] sm:$0xff] }
 0x2e1   : > { %2250 = vst [vmem:[#allocation2 + $0x1f8] sm:$0xff] %v2122_v1  ;;  %v2123_v6 = vadd.f32 %v1450_v4, %v583_v0  ;;  %v1964_v7 = vpop.f32.mrb[32].mxu1  ;;  %v1452_v8 = vpop.f32.mrb[33].mxu0  ;;  %v606_v1 = vld [vmem:[#allocation2 + $0x2b8] sm:$0xff] }
 0x2e2   : > { %v2125_v9 = vadd.f32 %v1964_v7, %v585_v2  ;;  %v2124_v10 = vadd.f32 %v1452_v8, %v584_v3  ;;  %v1966_v11 = vpop.f32.mrb[33].mxu1  ;;  %v607_v8 = vld [vmem:[#allocation2 + $0x2c0] sm:$0xff] }
 0x2e3   : > { %2251 = vst [vmem:[#allocation2 + $0x200] sm:$0xff] %v2123_v6  ;;  %v2126_v13 = vadd.f32 %v1966_v11, %v586_v5  ;;  %v608_v11 = vld [vmem:[#allocation2 + $0x2c8] sm:$0xff] }
 0x2e4   : > { %2253 = vst [vmem:[#allocation2 + $0x210] sm:$0xff] %v2125_v9  ;;  %2252 = vst [vmem:[#allocation2 + $0x208] sm:$0xff] %v2124_v10  ;;  %v1456_v16 = vpop.f32.mrb[34].mxu0  ;;  %v609_v10 = vld [vmem:[#allocation2 + $0x2d0] sm:$0xff] }
 0x2e5   : > { %2254 = vst [vmem:[#allocation2 + $0x218] sm:$0xff] %v2126_v13  ;;  %v2127_v18 = vadd.f32 %v1456_v16, %v587_v12  ;;  %v1970_v19 = vpop.f32.mrb[34].mxu1  ;;  %v1458_v20 = vpop.f32.mrb[35].mxu0  ;;  %v610_v13 = vld [vmem:[#allocation2 + $0x2d8] sm:$0xff] }
 0x2e6   : > { %v2129_v21 = vadd.f32 %v1970_v19, %v589_v14  ;;  %v2128_v22 = vadd.f32 %v1458_v20, %v588_v15  ;;  %v1972_v23 = vpop.f32.mrb[35].mxu1  ;;  %v611_v20 = vld [vmem:[#allocation2 + $0x2e0] sm:$0xff] }
 0x2e7   : > { %2255 = vst [vmem:[#allocation2 + $0x220] sm:$0xff] %v2127_v18  ;;  %v2130_v25 = vadd.f32 %v1972_v23, %v590_v17  ;;  %v612_v23 = vld [vmem:[#allocation2 + $0x2e8] sm:$0xff] }
 0x2e8   : > { %2257 = vst [vmem:[#allocation2 + $0x230] sm:$0xff] %v2129_v21  ;;  %2256 = vst [vmem:[#allocation2 + $0x228] sm:$0xff] %v2128_v22  ;;  %v1462_v28 = vpop.f32.mrb[36].mxu0  ;;  %v613_v22 = vld [vmem:[#allocation2 + $0x2f0] sm:$0xff] }
 0x2e9   : > { %2258 = vst [vmem:[#allocation2 + $0x238] sm:$0xff] %v2130_v25  ;;  %v2131_v30 = vadd.f32 %v1462_v28, %v591_v24  ;;  %v1976_v31 = vpop.f32.mrb[36].mxu1  ;;  %v1464_v32 = vpop.f32.mrb[37].mxu0  ;;  %v614_v25 = vld [vmem:[#allocation2 + $0x2f8] sm:$0xff] }
 0x2ea   : > { %v2133_v33 = vadd.f32 %v1976_v31, %v593_v26  ;;  %v2132_v34 = vadd.f32 %v1464_v32, %v592_v27  ;;  %v1978_v35 = vpop.f32.mrb[37].mxu1  ;;  %v615_v32 = vld [vmem:[#allocation2 + $0x300] sm:$0xff] }
 0x2eb   : > { %2259 = vst [vmem:[#allocation2 + $0x240] sm:$0xff] %v2131_v30  ;;  %v2134_v37 = vadd.f32 %v1978_v35, %v594_v29  ;;  %v616_v35 = vld [vmem:[#allocation2 + $0x308] sm:$0xff] }
 0x2ec   : > { %2261 = vst [vmem:[#allocation2 + $0x250] sm:$0xff] %v2133_v33  ;;  %2260 = vst [vmem:[#allocation2 + $0x248] sm:$0xff] %v2132_v34  ;;  %v1468_v40 = vpop.f32.mrb[38].mxu0  ;;  %v617_v34 = vld [vmem:[#allocation2 + $0x310] sm:$0xff] }
 0x2ed   : > { %2262 = vst [vmem:[#allocation2 + $0x258] sm:$0xff] %v2134_v37  ;;  %v2135_v42 = vadd.f32 %v1468_v40, %v595_v36  ;;  %v1982_v43 = vpop.f32.mrb[38].mxu1  ;;  %v1470_v44 = vpop.f32.mrb[39].mxu0  ;;  %v618_v37 = vld [vmem:[#allocation2 + $0x318] sm:$0xff] }
 0x2ee   : > { %v2137_v45 = vadd.f32 %v1982_v43, %v597_v38  ;;  %v2136_v46 = vadd.f32 %v1470_v44, %v596_v39  ;;  %v1984_v47 = vpop.f32.mrb[39].mxu1  ;;  %v619_v44 = vld [vmem:[#allocation2 + $0x320] sm:$0xff] }
 0x2ef   : > { %2263 = vst [vmem:[#allocation2 + $0x260] sm:$0xff] %v2135_v42  ;;  %v2138_v49 = vadd.f32 %v1984_v47, %v598_v41  ;;  %v620_v47 = vld [vmem:[#allocation2 + $0x328] sm:$0xff] }
 0x2f0   : > { %2265 = vst [vmem:[#allocation2 + $0x270] sm:$0xff] %v2137_v45  ;;  %2264 = vst [vmem:[#allocation2 + $0x268] sm:$0xff] %v2136_v46  ;;  %v1474_v52 = vpop.f32.mrb[40].mxu0  ;;  %v621_v46 = vld [vmem:[#allocation2 + $0x330] sm:$0xff] }
 0x2f1   : > { %2266 = vst [vmem:[#allocation2 + $0x278] sm:$0xff] %v2138_v49  ;;  %v2139_v54 = vadd.f32 %v1474_v52, %v599_v48  ;;  %v1988_v55 = vpop.f32.mrb[40].mxu1  ;;  %v1476_v56 = vpop.f32.mrb[41].mxu0  ;;  %v622_v49 = vld [vmem:[#allocation2 + $0x338] sm:$0xff] }
 0x2f2   : > { %v2141_v57 = vadd.f32 %v1988_v55, %v601_v50  ;;  %v2140_v58 = vadd.f32 %v1476_v56, %v600_v51  ;;  %v1990_v59 = vpop.f32.mrb[41].mxu1  ;;  %v623_v56 = vld [vmem:[#allocation2 + $0x340] sm:$0xff] }
 0x2f3   : > { %2267 = vst [vmem:[#allocation2 + $0x280] sm:$0xff] %v2139_v54  ;;  %v2142_v61 = vadd.f32 %v1990_v59, %v602_v53  ;;  %v624_v59 = vld [vmem:[#allocation2 + $0x348] sm:$0xff] }
 0x2f4   : > { %2269 = vst [vmem:[#allocation2 + $0x290] sm:$0xff] %v2141_v57  ;;  %2268 = vst [vmem:[#allocation2 + $0x288] sm:$0xff] %v2140_v58  ;;  %v1480_v0 = vpop.f32.mrb[42].mxu0  ;;  %v625_v58 = vld [vmem:[#allocation2 + $0x350] sm:$0xff] }
 0x2f5   : > { %2270 = vst [vmem:[#allocation2 + $0x298] sm:$0xff] %v2142_v61  ;;  %v2143_v2 = vadd.f32 %v1480_v0, %v603_v60  ;;  %v1994_v3 = vpop.f32.mrb[42].mxu1  ;;  %v1482_v4 = vpop.f32.mrb[43].mxu0  ;;  %v626_v61 = vld [vmem:[#allocation2 + $0x358] sm:$0xff] }
 0x2f6   : > { %v2145_v5 = vadd.f32 %v1994_v3, %v605_v62  ;;  %v2144_v6 = vadd.f32 %v1482_v4, %v604_v63  ;;  %v1996_v7 = vpop.f32.mrb[43].mxu1  ;;  %v627_v4 = vld [vmem:[#allocation2 + $0x360] sm:$0xff] }
 0x2f7   : > { %2271 = vst [vmem:[#allocation2 + $0x2a0] sm:$0xff] %v2143_v2  ;;  %v2146_v9 = vadd.f32 %v1996_v7, %v606_v1  ;;  %v628_v7 = vld [vmem:[#allocation2 + $0x368] sm:$0xff] }
 0x2f8   : > { %2273 = vst [vmem:[#allocation2 + $0x2b0] sm:$0xff] %v2145_v5  ;;  %2272 = vst [vmem:[#allocation2 + $0x2a8] sm:$0xff] %v2144_v6  ;;  %v1486_v12 = vpop.f32.mrb[44].mxu0  ;;  %v629_v6 = vld [vmem:[#allocation2 + $0x370] sm:$0xff] }
 0x2f9   : > { %2274 = vst [vmem:[#allocation2 + $0x2b8] sm:$0xff] %v2146_v9  ;;  %v2147_v14 = vadd.f32 %v1486_v12, %v607_v8  ;;  %v2000_v15 = vpop.f32.mrb[44].mxu1  ;;  %v1488_v16 = vpop.f32.mrb[45].mxu0  ;;  %v630_v9 = vld [vmem:[#allocation2 + $0x378] sm:$0xff] }
 0x2fa   : > { %v2149_v17 = vadd.f32 %v2000_v15, %v609_v10  ;;  %v2148_v18 = vadd.f32 %v1488_v16, %v608_v11  ;;  %v2002_v19 = vpop.f32.mrb[45].mxu1  ;;  %v631_v16 = vld [vmem:[#allocation2 + $0x380] sm:$0xff] }
 0x2fb   : > { %2275 = vst [vmem:[#allocation2 + $0x2c0] sm:$0xff] %v2147_v14  ;;  %v2150_v21 = vadd.f32 %v2002_v19, %v610_v13  ;;  %v632_v19 = vld [vmem:[#allocation2 + $0x388] sm:$0xff] }
 0x2fc   : > { %2277 = vst [vmem:[#allocation2 + $0x2d0] sm:$0xff] %v2149_v17  ;;  %2276 = vst [vmem:[#allocation2 + $0x2c8] sm:$0xff] %v2148_v18  ;;  %v1492_v24 = vpop.f32.mrb[46].mxu0  ;;  %v633_v18 = vld [vmem:[#allocation2 + $0x390] sm:$0xff] }
 0x2fd   : > { %2278 = vst [vmem:[#allocation2 + $0x2d8] sm:$0xff] %v2150_v21  ;;  %v2151_v26 = vadd.f32 %v1492_v24, %v611_v20  ;;  %v2006_v27 = vpop.f32.mrb[46].mxu1  ;;  %v1494_v28 = vpop.f32.mrb[47].mxu0  ;;  %v634_v21 = vld [vmem:[#allocation2 + $0x398] sm:$0xff] }
 0x2fe   : > { %v2153_v29 = vadd.f32 %v2006_v27, %v613_v22  ;;  %v2152_v30 = vadd.f32 %v1494_v28, %v612_v23  ;;  %v2008_v31 = vpop.f32.mrb[47].mxu1  ;;  %v635_v28 = vld [vmem:[#allocation2 + $0x3a0] sm:$0xff] }
 0x2ff   : > { %2279 = vst [vmem:[#allocation2 + $0x2e0] sm:$0xff] %v2151_v26  ;;  %v2154_v33 = vadd.f32 %v2008_v31, %v614_v25  ;;  %v636_v31 = vld [vmem:[#allocation2 + $0x3a8] sm:$0xff] }
 0x300   : > { %2281 = vst [vmem:[#allocation2 + $0x2f0] sm:$0xff] %v2153_v29  ;;  %2280 = vst [vmem:[#allocation2 + $0x2e8] sm:$0xff] %v2152_v30  ;;  %v1498_v36 = vpop.f32.mrb[48].mxu0  ;;  %v637_v30 = vld [vmem:[#allocation2 + $0x3b0] sm:$0xff] }
 0x301   : > { %2282 = vst [vmem:[#allocation2 + $0x2f8] sm:$0xff] %v2154_v33  ;;  %v2155_v38 = vadd.f32 %v1498_v36, %v615_v32  ;;  %v2012_v39 = vpop.f32.mrb[48].mxu1  ;;  %v1500_v40 = vpop.f32.mrb[49].mxu0  ;;  %v638_v33 = vld [vmem:[#allocation2 + $0x3b8] sm:$0xff] }
 0x302   : > { %v2157_v41 = vadd.f32 %v2012_v39, %v617_v34  ;;  %v2156_v42 = vadd.f32 %v1500_v40, %v616_v35  ;;  %v2014_v43 = vpop.f32.mrb[49].mxu1  ;;  %v639_v40 = vld [vmem:[#allocation2 + $0x3c0] sm:$0xff] }
 0x303   : > { %2283 = vst [vmem:[#allocation2 + $0x300] sm:$0xff] %v2155_v38  ;;  %v2158_v45 = vadd.f32 %v2014_v43, %v618_v37  ;;  %v640_v43 = vld [vmem:[#allocation2 + $0x3c8] sm:$0xff] }
 0x304   : > { %2285 = vst [vmem:[#allocation2 + $0x310] sm:$0xff] %v2157_v41  ;;  %2284 = vst [vmem:[#allocation2 + $0x308] sm:$0xff] %v2156_v42  ;;  %v1504_v48 = vpop.f32.mrb[50].mxu0  ;;  %v641_v42 = vld [vmem:[#allocation2 + $0x3d0] sm:$0xff] }
 0x305   : > { %2286 = vst [vmem:[#allocation2 + $0x318] sm:$0xff] %v2158_v45  ;;  %v2159_v50 = vadd.f32 %v1504_v48, %v619_v44  ;;  %v2018_v51 = vpop.f32.mrb[50].mxu1  ;;  %v1506_v52 = vpop.f32.mrb[51].mxu0  ;;  %v642_v45 = vld [vmem:[#allocation2 + $0x3d8] sm:$0xff] }
 0x306   : > { %v2161_v53 = vadd.f32 %v2018_v51, %v621_v46  ;;  %v2160_v54 = vadd.f32 %v1506_v52, %v620_v47  ;;  %v2020_v55 = vpop.f32.mrb[51].mxu1  ;;  %v643_v52 = vld [vmem:[#allocation2 + $0x3e0] sm:$0xff] }
 0x307   : > { %2287 = vst [vmem:[#allocation2 + $0x320] sm:$0xff] %v2159_v50  ;;  %v2162_v57 = vadd.f32 %v2020_v55, %v622_v49  ;;  %v644_v55 = vld [vmem:[#allocation2 + $0x3e8] sm:$0xff] }
 0x308   : > { %2289 = vst [vmem:[#allocation2 + $0x330] sm:$0xff] %v2161_v53  ;;  %2288 = vst [vmem:[#allocation2 + $0x328] sm:$0xff] %v2160_v54  ;;  %v1510_v60 = vpop.f32.mrb[52].mxu0  ;;  %v645_v54 = vld [vmem:[#allocation2 + $0x3f0] sm:$0xff] }
 0x309   : > { %2290 = vst [vmem:[#allocation2 + $0x338] sm:$0xff] %v2162_v57  ;;  %v2163_v62 = vadd.f32 %v1510_v60, %v623_v56  ;;  %v2024_v63 = vpop.f32.mrb[52].mxu1  ;;  %v1512_v0 = vpop.f32.mrb[53].mxu0  ;;  %v646_v57 = vld [vmem:[#allocation2 + $0x3f8] sm:$0xff] }
 0x30a   : > { %v2165_v1 = vadd.f32 %v2024_v63, %v625_v58  ;;  %v2164_v2 = vadd.f32 %v1512_v0, %v624_v59  ;;  %v2026_v3 = vpop.f32.mrb[53].mxu1 }
 0x30b   : > { %2291 = vst [vmem:[#allocation2 + $0x340] sm:$0xff] %v2163_v62  ;;  %v2166_v5 = vadd.f32 %v2026_v3, %v626_v61  ;;  %v2447_v3 = vld [vmem:[#allocation9] sm:$0xf] (!%p3327_p10) }
 0x30c   : > { %2293 = vst [vmem:[#allocation2 + $0x350] sm:$0xff] %v2165_v1  ;;  %2292 = vst [vmem:[#allocation2 + $0x348] sm:$0xff] %v2164_v2  ;;  %v1516_v8 = vpop.f32.mrb[54].mxu0  ;;  %v2449_v1 = vlaneseq (!%p3327_p10) }
 0x30d   : > { %2294 = vst [vmem:[#allocation2 + $0x358] sm:$0xff] %v2166_v5  ;;  %v2167_v10 = vadd.f32 %v1516_v8, %v627_v4  ;;  %v2030_v11 = vpop.f32.mrb[54].mxu1  ;;  %v1518_v12 = vpop.f32.mrb[55].mxu0  ;;  %v2320_v4 = vld [vmem:[#allocation2 + $0x8] sm:$0xff] (!%p3327_p10) }
 0x30e   : > { %v2169_v13 = vadd.f32 %v2030_v11, %v629_v6  ;;  %v2168_v14 = vadd.f32 %v1518_v12, %v628_v7  ;;  %v2032_v15 = vpop.f32.mrb[55].mxu1  ;;  %v5221_v2 = vshrl.u32 (!%p3327_p10), %v2449_v1, 7  ;;  %v2324_v5 = vld [vmem:[#allocation2 + $0x28] sm:$0xff] (!%p3327_p10)  ;;  %v2323_v11 = vld [vmem:[#allocation2 + $0x20] sm:$0xff] (!%p3327_p10)  ;;  %v2322_v12 = vld [vmem:[#allocation2 + $0x18] sm:$0xff] (!%p3327_p10)  ;;  %vm3161_vm0 = vcmp.lt.s32.totalorder (!%p3327_p10), %v2449_v1, 256 }
 0x30f   : > { %2295 = vst [vmem:[#allocation2 + $0x360] sm:$0xff] %v2167_v10  ;;  %v2170_v17 = vadd.f32 %v2032_v15, %v630_v9  ;;  %v2319_v10 = vld [vmem:[#allocation2] sm:$0xff] (!%p3327_p10)  ;;  %v2326_v15 = vld [vmem:[#allocation2 + $0x38] sm:$0xff] (!%p3327_p10) }
 0x310   : > { %2297 = vst [vmem:[#allocation2 + $0x370] sm:$0xff] %v2169_v13  ;;  %2296 = vst [vmem:[#allocation2 + $0x368] sm:$0xff] %v2168_v14  ;;  %v1522_v20 = vpop.f32.mrb[56].mxu0  ;;  %v2455_v6 = vsub.s32 (!%p3327_p10), 1, %v5221_v2  ;;  %v2451_v7 = vsub.s32 (!%p3327_p10), 0, %v5221_v2  ;;  %v2463_v8 = vsub.s32 (!%p3327_p10), 3, %v5221_v2 }
 0x311   : > { %2298 = vst [vmem:[#allocation2 + $0x378] sm:$0xff] %v2170_v17  ;;  %v2171_v22 = vadd.f32 %v1522_v20, %v631_v16  ;;  %v2036_v23 = vpop.f32.mrb[56].mxu1  ;;  %v1524_v24 = vpop.f32.mrb[57].mxu0  ;;  %v2459_v9 = vsub.s32 (!%p3327_p10), 2, %v5221_v2  ;;  %v2321_v17 = vld [vmem:[#allocation2 + $0x10] sm:$0xff] (!%p3327_p10) }
 0x312   : > { %v2173_v25 = vadd.f32 %v2036_v23, %v633_v18  ;;  %v2172_v26 = vadd.f32 %v1524_v24, %v632_v19  ;;  %v2038_v27 = vpop.f32.mrb[57].mxu1  ;;  %v5227_v13 = vrot.slane (!%p3327_p10), %v2447_v3, %v2455_v6  ;;  %v5229_v14 = vrot.slane (!%p3327_p10), %v2447_v3, %v2451_v7  ;;  %v2325_v18 = vld [vmem:[#allocation2 + $0x30] sm:$0xff] (!%p3327_p10)  ;;  %v2338_v6 = vld [vmem:[#allocation2 + $0x98] sm:$0xff] (!%p3327_p10) }
 0x313   : > { %2299 = vst [vmem:[#allocation2 + $0x380] sm:$0xff] %v2171_v22  ;;  %v2174_v29 = vadd.f32 %v2038_v27, %v634_v21  ;;  %v5231_v16 = vrot.slane (!%p3327_p10), %v2447_v3, %v2463_v8  ;;  %v5233_v19 = vrot.slane (!%p3327_p10), %v2447_v3, %v2459_v9  ;;  %v2342_v7 = vld [vmem:[#allocation2 + $0xb8] sm:$0xff] (!%p3327_p10) }
 0x314   : > { %2301 = vst [vmem:[#allocation2 + $0x390] sm:$0xff] %v2173_v25  ;;  %2300 = vst [vmem:[#allocation2 + $0x388] sm:$0xff] %v2172_v26  ;;  %v1528_v32 = vpop.f32.mrb[58].mxu0  ;;  %v2470_v20 = vadd.f32 (!%p3327_p10), %v5227_v13, %v2320_v4  ;;  %v2474_v21 = vadd.f32 (!%p3327_p10), %v5227_v13, %v2324_v5  ;;  %v2469_v22 = vadd.f32 (!%p3327_p10), %v5229_v14, %v2319_v10  ;;  %v2339_v5 = vld [vmem:[#allocation2 + $0xa0] sm:$0xff] (!%p3327_p10) }
 0x315   : > { %2302 = vst [vmem:[#allocation2 + $0x398] sm:$0xff] %v2174_v29  ;;  %v2175_v34 = vadd.f32 %v1528_v32, %v635_v28  ;;  %v2042_v35 = vpop.f32.mrb[58].mxu1  ;;  %v1530_v36 = vpop.f32.mrb[59].mxu0  ;;  %v2473_v23 = vadd.f32 (!%p3327_p10), %v5229_v14, %v2323_v11  ;;  %v2472_v24 = vadd.f32 (!%p3327_p10), %v5231_v16, %v2322_v12  ;;  %v2476_v25 = vadd.f32 (!%p3327_p10), %v5231_v16, %v2326_v15  ;;  %v2328_v28 = vld [vmem:[#allocation2 + $0x48] sm:$0xff] (!%p3327_p10)  ;;  %v2337_v11 = vld [vmem:[#allocation2 + $0x90] sm:$0xff] (!%p3327_p10) }
 0x316   : > { %v2177_v37 = vadd.f32 %v2042_v35, %v637_v30  ;;  %v2176_v38 = vadd.f32 %v1530_v36, %v636_v31  ;;  %v2044_v39 = vpop.f32.mrb[59].mxu1  ;;  %v2471_v26 = vadd.f32 (!%p3327_p10), %v5233_v19, %v2321_v17  ;;  %v2475_v27 = vadd.f32 (!%p3327_p10), %v5233_v19, %v2325_v18  ;;  %v2332_v29 = vld [vmem:[#allocation2 + $0x68] sm:$0xff] (!%p3327_p10)  ;;  %v2331_v35 = vld [vmem:[#allocation2 + $0x60] sm:$0xff] (!%p3327_p10)  ;;  %v2341_v12 = vld [vmem:[#allocation2 + $0xb0] sm:$0xff] (!%p3327_p10) }
 0x317   : > { %2303 = vst [vmem:[#allocation2 + $0x3a0] sm:$0xff] %v2175_v34  ;;  %v2178_v41 = vadd.f32 %v2044_v39, %v638_v33  ;;  %v2598_v30 = vmax.f32 (!%p3327_p10), %v2470_v20, 0.0  ;;  %v2602_v31 = vmax.f32 (!%p3327_p10), %v2474_v21, 0.0  ;;  %v2597_v32 = vmax.f32 (!%p3327_p10), %v2469_v22, 0.0  ;;  %v2327_v34 = vld [vmem:[#allocation2 + $0x40] sm:$0xff] (!%p3327_p10)  ;;  %v2344_v21 = vld [vmem:[#allocation2 + $0xc8] sm:$0xff] (!%p3327_p10) }
 0x318   : > { %2305 = vst [vmem:[#allocation2 + $0x3b0] sm:$0xff] %v2177_v37  ;;  %2304 = vst [vmem:[#allocation2 + $0x3a8] sm:$0xff] %v2176_v38  ;;  %v1534_v44 = vpop.f32.mrb[60].mxu0  ;;  %v2601_v33 = vmax.f32 (!%p3327_p10), %v2473_v23, 0.0  ;;  %v2600_v36 = vmax.f32 (!%p3327_p10), %v2472_v24, 0.0  ;;  %v2604_v37 = vmax.f32 (!%p3327_p10), %v2476_v25, 0.0  ;;  %v2489_v23 = vadd.f32 (!%p3327_p10), %v5229_v14, %v2339_v5 }
 0x319   : > { %2306 = vst [vmem:[#allocation2 + $0x3b8] sm:$0xff] %v2178_v41  ;;  %v2179_v46 = vadd.f32 %v1534_v44, %v639_v40  ;;  %v2048_v47 = vpop.f32.mrb[60].mxu1  ;;  %v1536_v48 = vpop.f32.mrb[61].mxu0  ;;  %v2599_v38 = vmax.f32 (!%p3327_p10), %v2471_v26, 0.0  ;;  %v2603_v39 = vmax.f32 (!%p3327_p10), %v2475_v27, 0.0  ;;  %v2330_v40 = vld [vmem:[#allocation2 + $0x58] sm:$0xff] (!%p3327_p10)  ;;  %v2478_v44 = vadd.f32 (!%p3327_p10), %v5227_v13, %v2328_v28 }
 0x31a   : > { %v2181_v49 = vadd.f32 %v2048_v47, %v641_v42  ;;  %v2180_v50 = vadd.f32 %v1536_v48, %v640_v43  ;;  %v2050_v51 = vpop.f32.mrb[61].mxu1  ;;  %v2334_v41 = vld [vmem:[#allocation2 + $0x78] sm:$0xff] (!%p3327_p10)  ;;  %v3593_v42 = vpack.c.bf16 (!%p3327_p10), %v2602_v31, %v2598_v30  ;;  %v3595_v43 = vpack.c.bf16 (!%p3327_p10), %v2601_v33, %v2597_v32  ;;  %v2333_v47 = vld [vmem:[#allocation2 + $0x70] sm:$0xff] (!%p3327_p10)  ;;  %v2348_v26 = vld [vmem:[#allocation2 + $0xe8] sm:$0xff] (!%p3327_p10) }
 0x31b   : > { %2307 = vst [vmem:[#allocation2 + $0x3c0] sm:$0xff] %v2179_v46  ;;  %v2182_v53 = vadd.f32 %v2050_v51, %v642_v45  ;;  %2318 = sbr.rel (%p3327_p10) target bundleno = 1196 (0x4ac), region = 72  ;;  %v2482_v45 = vadd.f32 (!%p3327_p10), %v5227_v13, %v2332_v29  ;;  %v2329_v46 = vld [vmem:[#allocation2 + $0x50] sm:$0xff] (!%p3327_p10)  ;;  %v3657_v48 = vpack.c.bf16 (!%p3327_p10), %v2604_v37, %v2600_v36  ;;  %v2481_v51 = vadd.f32 (!%p3327_p10), %v5229_v14, %v2331_v35  ;;  %v2350_v35 = vld [vmem:[#allocation2 + $0xf8] sm:$0xff] (!%p3327_p10) }
 0x31c   : > { %2309 = vst [vmem:[#allocation2 + $0x3d0] sm:$0xff] %v2181_v49  ;;  %2308 = vst [vmem:[#allocation2 + $0x3c8] sm:$0xff] %v2180_v50  ;;  %v1540_v56 = vpop.f32.mrb[62].mxu0  ;;  %v3659_v49 = vpack.c.bf16 (!%p3327_p10), %v2603_v39, %v2599_v38  ;;  %v2477_v50 = vadd.f32 (!%p3327_p10), %v5229_v14, %v2327_v34  ;;  %3594 = vmatprep.subr.bf16.mxu1 (!%p3327_p10), %v3593_v42  ;;  %v2488_v24 = vadd.f32 (!%p3327_p10), %v5231_v16, %v2338_v6  ;;  %v2346_v34 = vld [vmem:[#allocation2 + $0xd8] sm:$0xff] (!%p3327_p10)  ;;  %v2343_v42 = vld [vmem:[#allocation2 + $0xc0] sm:$0xff] (!%p3327_p10) }
 0x31d   : > { %2310 = vst [vmem:[#allocation2 + $0x3d8] sm:$0xff] %v2182_v53  ;;  %v2183_v58 = vadd.f32 %v1540_v56, %v643_v52  ;;  %v2054_v59 = vpop.f32.mrb[62].mxu1  ;;  %v1542_v60 = vpop.f32.mrb[63].mxu0  ;;  %v2336_v52 = vld [vmem:[#allocation2 + $0x88] sm:$0xff] (!%p3327_p10)  ;;  %v2606_v53 = vmax.f32 (!%p3327_p10), %v2478_v44, 0.0  ;;  %v2484_v56 = vadd.f32 (!%p3327_p10), %v5231_v16, %v2334_v41  ;;  %3596 = vmatpush1.bf16.xpose.msra.mxu1 (!%p3327_p10), %v3595_v43  ;;  %3658 = vmatprep.subr.bf16.mxu0 (!%p3327_p10), %v3657_v48  ;;  %v2617_v38 = vmax.f32 (!%p3327_p10), %v2489_v23, 0.0 }
 0x31e   : > { %v2185_v61 = vadd.f32 %v2054_v59, %v645_v54  ;;  %v2184_v62 = vadd.f32 %v1542_v60, %v644_v55  ;;  %v2056_v63 = vpop.f32.mrb[63].mxu1  ;;  %v2610_v54 = vmax.f32 (!%p3327_p10), %v2482_v45, 0.0  ;;  %v2480_v55 = vadd.f32 (!%p3327_p10), %v5231_v16, %v2330_v40  ;;  %3660 = vmatpush1.bf16.xpose.msra.mxu0 (!%p3327_p10), %v3659_v49  ;;  %v2347_v43 = vld [vmem:[#allocation2 + $0xe0] sm:$0xff] (!%p3327_p10)  ;;  %v2345_v48 = vld [vmem:[#allocation2 + $0xd0] sm:$0xff] (!%p3327_p10)  ;;  %v2364_v23 = vld [vmem:[#allocation2 + $0x168] sm:$0xff] (!%p3327_p10) }
 0x31f   : > { %2311 = vst [vmem:[#allocation2 + $0x3e0] sm:$0xff] %v2183_v58  ;;  %v2186_v0 = vadd.f32 %v2056_v63, %v646_v57  ;;  %v2340_v57 = vld [vmem:[#allocation2 + $0xa8] sm:$0xff] (!%p3327_p10)  ;;  %v2605_v58 = vmax.f32 (!%p3327_p10), %v2477_v50, 0.0  ;;  %v2609_v59 = vmax.f32 (!%p3327_p10), %v2481_v51, 0.0  ;;  %v2479_v60 = vadd.f32 (!%p3327_p10), %v5233_v19, %v2329_v46  ;;  %v2349_v49 = vld [vmem:[#allocation2 + $0xf0] sm:$0xff] (!%p3327_p10) }
 0x320   : > { %2313 = vst [vmem:[#allocation2 + $0x3f0] sm:$0xff] %v2185_v61  ;;  %2312 = vst [vmem:[#allocation2 + $0x3e8] sm:$0xff] %v2184_v62  ;;  %v2483_v61 = vadd.f32 (!%p3327_p10), %v5233_v19, %v2333_v47  ;;  %v2335_v62 = vld [vmem:[#allocation2 + $0x80] sm:$0xff] (!%p3327_p10)  ;;  %v3597_v63 = vpack.c.bf16 (!%p3327_p10), %v2610_v54, %v2606_v53  ;;  %v2612_v3 = vmax.f32 (!%p3327_p10), %v2484_v56, 0.0  ;;  %v2486_v4 = vadd.f32 (!%p3327_p10), %v5227_v13, %v2336_v52  ;;  %v2352_v50 = vld [vmem:[#allocation2 + $0x108] sm:$0xff] (!%p3327_p10) }
 0x321   : > { %2314 = vst [vmem:[#allocation2 + $0x3f8] sm:$0xff] %v2186_v0  ;;  %v2608_v0 = vmax.f32 (!%p3327_p10), %v2480_v55, 0.0  ;;  %v2607_v8 = vmax.f32 (!%p3327_p10), %v2479_v60, 0.0  ;;  %v2490_v10 = vadd.f32 (!%p3327_p10), %v5227_v13, %v2340_v57  ;;  %v3599_v15 = vpack.c.bf16 (!%p3327_p10), %v2609_v59, %v2605_v58  ;;  %v2356_v51 = vld [vmem:[#allocation2 + $0x128] sm:$0xff] (!%p3327_p10)  ;;  %v2354_v56 = vld [vmem:[#allocation2 + $0x118] sm:$0xff] (!%p3327_p10) }
 0x322   : > { %v2611_v9 = vmax.f32 %v2483_v61, 0.0  ;;  %3598 = vmatprep.subr.bf16.mxu1 %v3597_v63  ;;  %v2614_v18 = vmax.f32 %v2486_v4, 0.0  ;;  %v2485_v20 = vadd.f32 %v5229_v14, %v2335_v62  ;;  %v2492_v25 = vadd.f32 %v5231_v16, %v2342_v7  ;;  %v2358_v57 = vld [vmem:[#allocation2 + $0x138] sm:$0xff] }
 0x323   : > { %v3661_v17 = vpack.c.bf16 %v2612_v3, %v2608_v0  ;;  %v2618_v22 = vmax.f32 %v2490_v10, 0.0  ;;  %v2487_v28 = vadd.f32 %v5233_v19, %v2337_v11  ;;  %v2491_v29 = vadd.f32 %v5233_v19, %v2341_v12  ;;  %v2351_v12 = vld [vmem:[#allocation2 + $0x100] sm:$0xff] }
 0x324   : > { %v3663_v27 = vpack.c.bf16 %v2611_v9, %v2607_v8  ;;  %v2616_v31 = vmax.f32 %v2488_v24, 0.0  ;;  %v2620_v32 = vmax.f32 %v2492_v25, 0.0  ;;  %v2494_v33 = vadd.f32 %v5227_v13, %v2344_v21  ;;  %v2357_v21 = vld [vmem:[#allocation2 + $0x130] sm:$0xff]  ;;  %v2362_v25 = vld [vmem:[#allocation2 + $0x158] sm:$0xff] }
 0x325   : > { %3662 = vmatprep.subr.bf16.mxu0 %v3661_v17  ;;  %v3601_v30 = vpack.c.bf16 %v2618_v22, %v2614_v18  ;;  %v2613_v36 = vmax.f32 %v2485_v20, 0.0  ;;  %v2498_v37 = vadd.f32 %v5227_v13, %v2348_v26  ;;  %3600 = vmatpush1.bf16.xpose.msra.mxu1 %v3599_v15  ;;  %v2615_v40 = vmax.f32 %v2487_v28, 0.0  ;;  %v2355_v15 = vld [vmem:[#allocation2 + $0x120] sm:$0xff]  ;;  %v2353_v17 = vld [vmem:[#allocation2 + $0x110] sm:$0xff]  ;;  %v2360_v22 = vld [vmem:[#allocation2 + $0x148] sm:$0xff] }
 0x326   : > { %v3665_v39 = vpack.c.bf16 %v2620_v32, %v2616_v31  ;;  %v2619_v41 = vmax.f32 %v2491_v29, 0.0  ;;  %3664 = vmatpush1.bf16.xpose.msra.mxu0 %v3663_v27  ;;  %v2622_v44 = vmax.f32 %v2494_v33, 0.0  ;;  %v2496_v46 = vadd.f32 %v5231_v16, %v2346_v34  ;;  %v2366_v26 = vld [vmem:[#allocation2 + $0x178] sm:$0xff] }
 0x327   : > { %3602 = vmatprep.subr.bf16.mxu1 %v3601_v30  ;;  %v2626_v45 = vmax.f32 %v2498_v37, 0.0  ;;  %v2500_v47 = vadd.f32 %v5231_v16, %v2350_v35  ;;  %v2493_v52 = vadd.f32 %v5229_v14, %v2343_v42  ;;  %v2497_v53 = vadd.f32 %v5229_v14, %v2347_v43 }
 0x328   : > { %3666 = vmatprep.subr.bf16.mxu0 %v3665_v39  ;;  %v2624_v54 = vmax.f32 %v2496_v46, 0.0  ;;  %v3603_v58 = vpack.c.bf16 %v2617_v38, %v2613_v36  ;;  %v2495_v59 = vadd.f32 %v5233_v19, %v2345_v48  ;;  %v2499_v60 = vadd.f32 %v5233_v19, %v2349_v49  ;;  %v2361_v46 = vld [vmem:[#allocation2 + $0x150] sm:$0xff] }
 0x329   : > { %v2628_v55 = vmax.f32 %v2500_v47, 0.0  ;;  %v3667_v61 = vpack.c.bf16 %v2619_v41, %v2615_v40  ;;  %v3605_v62 = vpack.c.bf16 %v2626_v45, %v2622_v44  ;;  %v2502_v63 = vadd.f32 %v5227_v13, %v2352_v50  ;;  %v2359_v40 = vld [vmem:[#allocation2 + $0x140] sm:$0xff]  ;;  %v2365_v47 = vld [vmem:[#allocation2 + $0x170] sm:$0xff]  ;;  %v2368_v50 = vld [vmem:[#allocation2 + $0x188] sm:$0xff] }
 0x32a   : > { %v2506_v0 = vadd.f32 %v5227_v13, %v2356_v51  ;;  %v2504_v4 = vadd.f32 %v5231_v16, %v2354_v56  ;;  %v2508_v5 = vadd.f32 %v5231_v16, %v2358_v57  ;;  %v2621_v6 = vmax.f32 %v2493_v52, 0.0  ;;  %v2363_v41 = vld [vmem:[#allocation2 + $0x160] sm:$0xff]  ;;  %v2372_v51 = vld [vmem:[#allocation2 + $0x1a8] sm:$0xff] }
 0x32b   : > { %v3669_v3 = vpack.c.bf16 %v2628_v55, %v2624_v54  ;;  %v2625_v7 = vmax.f32 %v2497_v53, 0.0  ;;  %v2623_v8 = vmax.f32 %v2495_v59, 0.0  ;;  %v2627_v9 = vmax.f32 %v2499_v60, 0.0  ;;  %v2370_v54 = vld [vmem:[#allocation2 + $0x198] sm:$0xff] }
 0x32c   : > { %v2630_v10 = vmax.f32 %v2502_v63, 0.0  ;;  %v2634_v11 = vmax.f32 %v2506_v0, 0.0  ;;  %v2632_v18 = vmax.f32 %v2504_v4, 0.0  ;;  %v2636_v20 = vmax.f32 %v2508_v5, 0.0  ;;  %v2374_v55 = vld [vmem:[#allocation2 + $0x1b8] sm:$0xff]  ;;  %v2726_v63 = vld [vmem:[#allocation10 + $0x8] sm:$0xff] }
 0x32d   : > { %3604 = vmatpush1.bf16.xpose.msra.mxu1 %v3603_v58  ;;  %v3607_v24 = vpack.c.bf16 %v2625_v7, %v2621_v6  ;;  %v3671_v27 = vpack.c.bf16 %v2627_v9, %v2623_v8  ;;  %v2501_v28 = vadd.f32 %v5229_v14, %v2351_v12  ;;  %v2505_v29 = vadd.f32 %v5229_v14, %v2355_v15  ;;  %v2728_v0 = vld [vmem:[#allocation10 + $0x18] sm:$0xff] }
 0x32e   : > { %3668 = vmatpush1.bf16.xpose.msra.mxu0 %v3667_v61  ;;  %3606 = vmatprep.subr.bf16.mxu1 %v3605_v62  ;;  %v2503_v30 = vadd.f32 %v5233_v19, %v2353_v17  ;;  %v3609_v31 = vpack.c.bf16 %v2634_v11, %v2630_v10  ;;  %v2507_v32 = vadd.f32 %v5233_v19, %v2357_v21  ;;  %v2367_v12 = vld [vmem:[#allocation2 + $0x180] sm:$0xff]  ;;  %v2369_v17 = vld [vmem:[#allocation2 + $0x190] sm:$0xff] }
 0x32f   : > { %3670 = vmatprep.subr.bf16.mxu0 %v3669_v3  ;;  %v2510_v33 = vadd.f32 %v5227_v13, %v2360_v22  ;;  %v2514_v34 = vadd.f32 %v5227_v13, %v2364_v23  ;;  %v3673_v35 = vpack.c.bf16 %v2636_v20, %v2632_v18  ;;  %v2512_v36 = vadd.f32 %v5231_v16, %v2362_v25  ;;  %v2371_v15 = vld [vmem:[#allocation2 + $0x1a0] sm:$0xff]  ;;  %v2373_v21 = vld [vmem:[#allocation2 + $0x1b0] sm:$0xff]  ;;  %v2376_v22 = vld [vmem:[#allocation2 + $0x1c8] sm:$0xff] }
 0x330   : > { %v2516_v37 = vadd.f32 %v5231_v16, %v2366_v26  ;;  %v2629_v38 = vmax.f32 %v2501_v28, 0.0  ;;  %v2633_v39 = vmax.f32 %v2505_v29, 0.0  ;;  %v2631_v42 = vmax.f32 %v2503_v30, 0.0  ;;  %2869 = vmatprep.mubr.f32.mxu1 %v2726_v63  ;;  %2982 = vmatprep.mubr.f32.mxu0 %v2728_v0  ;;  %v2380_v23 = vld [vmem:[#allocation2 + $0x1e8] sm:$0xff]  ;;  %v2378_v25 = vld [vmem:[#allocation2 + $0x1d8] sm:$0xff] }
 0x331   : > { %v2635_v43 = vmax.f32 %v2507_v32, 0.0  ;;  %v2638_v44 = vmax.f32 %v2510_v33, 0.0  ;;  %v2642_v45 = vmax.f32 %v2514_v34, 0.0  ;;  %v2640_v48 = vmax.f32 %v2512_v36, 0.0  ;;  %v2382_v26 = vld [vmem:[#allocation2 + $0x1f8] sm:$0xff] }
 0x332   : > { %v2644_v49 = vmax.f32 %v2516_v37, 0.0  ;;  %v2509_v52 = vadd.f32 %v5229_v14, %v2359_v40  ;;  %v2513_v53 = vadd.f32 %v5229_v14, %v2363_v41  ;;  %v3611_v56 = vpack.c.bf16 %v2633_v39, %v2629_v38  ;;  %v2375_v40 = vld [vmem:[#allocation2 + $0x1c0] sm:$0xff] }
 0x333   : > { %v2511_v57 = vadd.f32 %v5233_v19, %v2361_v46  ;;  %v2515_v58 = vadd.f32 %v5233_v19, %v2365_v47  ;;  %v3675_v59 = vpack.c.bf16 %v2635_v43, %v2631_v42  ;;  %v3613_v60 = vpack.c.bf16 %v2642_v45, %v2638_v44  ;;  %v2379_v41 = vld [vmem:[#allocation2 + $0x1e0] sm:$0xff]  ;;  %v2377_v46 = vld [vmem:[#allocation2 + $0x1d0] sm:$0xff] }
 0x334   : > { %v2518_v61 = vadd.f32 %v5227_v13, %v2368_v50  ;;  %v2522_v62 = vadd.f32 %v5227_v13, %v2372_v51  ;;  %v3677_v3 = vpack.c.bf16 %v2644_v49, %v2640_v48  ;;  %v2520_v4 = vadd.f32 %v5231_v16, %v2370_v54  ;;  %v2381_v47 = vld [vmem:[#allocation2 + $0x1f0] sm:$0xff]  ;;  %v2384_v50 = vld [vmem:[#allocation2 + $0x208] sm:$0xff]  ;;  %v2386_v54 = vld [vmem:[#allocation2 + $0x218] sm:$0xff] }
 0x335   : > { %3608 = vmatpush1.bf16.xpose.msra.mxu1 %v3607_v24  ;;  %v2524_v5 = vadd.f32 %v5231_v16, %v2374_v55  ;;  %v2637_v6 = vmax.f32 %v2509_v52, 0.0  ;;  %v2641_v7 = vmax.f32 %v2513_v53, 0.0  ;;  %v2639_v8 = vmax.f32 %v2511_v57, 0.0  ;;  %v2388_v51 = vld [vmem:[#allocation2 + $0x228] sm:$0xff]  ;;  %v2390_v55 = vld [vmem:[#allocation2 + $0x238] sm:$0xff] }
 0x336   : > { %3672 = vmatpush1.bf16.xpose.msra.mxu0 %v3671_v27  ;;  %3610 = vmatprep.subr.bf16.mxu1 %v3609_v31  ;;  %v2643_v9 = vmax.f32 %v2515_v58, 0.0  ;;  %v2646_v10 = vmax.f32 %v2518_v61, 0.0  ;;  %v2650_v11 = vmax.f32 %v2522_v62, 0.0  ;;  %v2648_v18 = vmax.f32 %v2520_v4, 0.0 }
 0x337   : > { %3674 = vmatprep.subr.bf16.mxu0 %v3673_v35  ;;  %v2652_v20 = vmax.f32 %v2524_v5, 0.0  ;;  %v3615_v24 = vpack.c.bf16 %v2641_v7, %v2637_v6  ;;  %v2517_v28 = vadd.f32 %v5229_v14, %v2367_v12  ;;  %v2521_v29 = vadd.f32 %v5229_v14, %v2371_v15  ;;  %v2385_v12 = vld [vmem:[#allocation2 + $0x210] sm:$0xff] }
 0x338   : > { %v3679_v27 = vpack.c.bf16 %v2643_v9, %v2639_v8  ;;  %v2519_v30 = vadd.f32 %v5233_v19, %v2369_v17  ;;  %v3617_v31 = vpack.c.bf16 %v2650_v11, %v2646_v10  ;;  %v2523_v32 = vadd.f32 %v5233_v19, %v2373_v21  ;;  %v2383_v10 = vld [vmem:[#allocation2 + $0x200] sm:$0xff]  ;;  %v2396_v21 = vld [vmem:[#allocation2 + $0x268] sm:$0xff] }
 0x339   : > { %v2526_v33 = vadd.f32 %v5227_v13, %v2376_v22  ;;  %v2530_v34 = vadd.f32 %v5227_v13, %v2380_v23  ;;  %v3681_v35 = vpack.c.bf16 %v2652_v20, %v2648_v18  ;;  %v2528_v36 = vadd.f32 %v5231_v16, %v2378_v25  ;;  %v2387_v11 = vld [vmem:[#allocation2 + $0x220] sm:$0xff]  ;;  %v2389_v18 = vld [vmem:[#allocation2 + $0x230] sm:$0xff]  ;;  %v2392_v20 = vld [vmem:[#allocation2 + $0x248] sm:$0xff] }
 0x33a   : > { %v2532_v37 = vadd.f32 %v5231_v16, %v2382_v26  ;;  %v2645_v38 = vmax.f32 %v2517_v28, 0.0  ;;  %v2649_v39 = vmax.f32 %v2521_v29, 0.0  ;;  %v2647_v42 = vmax.f32 %v2519_v30, 0.0  ;;  %v2394_v23 = vld [vmem:[#allocation2 + $0x258] sm:$0xff] }
 0x33b   : > { %v2651_v43 = vmax.f32 %v2523_v32, 0.0  ;;  %v2654_v44 = vmax.f32 %v2526_v33, 0.0  ;;  %v2658_v45 = vmax.f32 %v2530_v34, 0.0  ;;  %v2656_v48 = vmax.f32 %v2528_v36, 0.0 }
 0x33c   : > { %v2660_v49 = vmax.f32 %v2532_v37, 0.0  ;;  %v2525_v52 = vadd.f32 %v5229_v14, %v2375_v40  ;;  %v2529_v53 = vadd.f32 %v5229_v14, %v2379_v41  ;;  %v2527_v57 = vadd.f32 %v5233_v19, %v2377_v46 }
 0x33d   : > { %3612 = vmatpush1.bf16.xpose.msra.mxu1 %v3611_v56  ;;  %v3619_v56 = vpack.c.bf16 %v2649_v39, %v2645_v38  ;;  %v2531_v58 = vadd.f32 %v5233_v19, %v2381_v47  ;;  %v2534_v61 = vadd.f32 %v5227_v13, %v2384_v50  ;;  %v2538_v62 = vadd.f32 %v5227_v13, %v2388_v51  ;;  %v2391_v38 = vld [vmem:[#allocation2 + $0x240] sm:$0xff] }
 0x33e   : > { %3676 = vmatpush1.bf16.xpose.msra.mxu0 %v3675_v59  ;;  %3614 = vmatprep.subr.bf16.mxu1 %v3613_v60  ;;  %v3683_v59 = vpack.c.bf16 %v2651_v43, %v2647_v42  ;;  %v3621_v60 = vpack.c.bf16 %v2658_v45, %v2654_v44  ;;  %v3685_v63 = vpack.c.bf16 %v2660_v49, %v2656_v48  ;;  %v2653_v4 = vmax.f32 %v2525_v52, 0.0  ;;  %v2395_v39 = vld [vmem:[#allocation2 + $0x260] sm:$0xff]  ;;  %v2393_v44 = vld [vmem:[#allocation2 + $0x250] sm:$0xff]  ;;  %v2400_v48 = vld [vmem:[#allocation2 + $0x288] sm:$0xff] }
 0x33f   : > { %3678 = vmatprep.subr.bf16.mxu0 %v3677_v3  ;;  %v2536_v0 = vadd.f32 %v5231_v16, %v2386_v54  ;;  %v2540_v3 = vadd.f32 %v5231_v16, %v2390_v55  ;;  %v2657_v5 = vmax.f32 %v2529_v53, 0.0  ;;  %v2655_v6 = vmax.f32 %v2527_v57, 0.0  ;;  %v2397_v45 = vld [vmem:[#allocation2 + $0x270] sm:$0xff]  ;;  %v2404_v49 = vld [vmem:[#allocation2 + $0x2a8] sm:$0xff]  ;;  %v2402_v52 = vld [vmem:[#allocation2 + $0x298] sm:$0xff] }
 0x340   : > { %v2659_v7 = vmax.f32 %v2531_v58, 0.0  ;;  %v2662_v8 = vmax.f32 %v2534_v61, 0.0  ;;  %v2666_v9 = vmax.f32 %v2538_v62, 0.0  ;;  %v2533_v26 = vadd.f32 %v5229_v14, %v2383_v10  ;;  %v2406_v53 = vld [vmem:[#allocation2 + $0x2b8] sm:$0xff]  ;;  %v2401_v10 = vld [vmem:[#allocation2 + $0x290] sm:$0xff] }
 0x341   : > { %v2664_v15 = vmax.f32 %v2536_v0, 0.0  ;;  %v2668_v17 = vmax.f32 %v2540_v3, 0.0  ;;  %v3623_v22 = vpack.c.bf16 %v2657_v5, %v2653_v4  ;;  %v2535_v28 = vadd.f32 %v5233_v19, %v2385_v12 }
 0x342   : > { %v3687_v25 = vpack.c.bf16 %v2659_v7, %v2655_v6  ;;  %v3625_v29 = vpack.c.bf16 %v2666_v9, %v2662_v8  ;;  %v2539_v30 = vadd.f32 %v5233_v19, %v2389_v18  ;;  %v2546_v32 = vadd.f32 %v5227_v13, %v2396_v21  ;;  %v2399_v8 = vld [vmem:[#allocation2 + $0x280] sm:$0xff]  ;;  %v2412_v18 = vld [vmem:[#allocation2 + $0x2e8] sm:$0xff]  ;;  %v2410_v21 = vld [vmem:[#allocation2 + $0x2d8] sm:$0xff] }
 0x343   : > { %v3689_v33 = vpack.c.bf16 %v2668_v17, %v2664_v15  ;;  %v2544_v34 = vadd.f32 %v5231_v16, %v2394_v23  ;;  %v2661_v36 = vmax.f32 %v2533_v26, 0.0  ;;  %v2663_v40 = vmax.f32 %v2535_v28, 0.0  ;;  %v2403_v9 = vld [vmem:[#allocation2 + $0x2a0] sm:$0xff]  ;;  %v2405_v15 = vld [vmem:[#allocation2 + $0x2b0] sm:$0xff]  ;;  %v2408_v17 = vld [vmem:[#allocation2 + $0x2c8] sm:$0xff] }
 0x344   : > { %v2667_v41 = vmax.f32 %v2539_v30, 0.0  ;;  %v2674_v43 = vmax.f32 %v2546_v32, 0.0  ;;  %v2541_v50 = vadd.f32 %v5229_v14, %v2391_v38  ;;  %v2545_v51 = vadd.f32 %v5229_v14, %v2395_v39  ;;  %v2411_v38 = vld [vmem:[#allocation2 + $0x2e0] sm:$0xff]  ;;  %v2409_v39 = vld [vmem:[#allocation2 + $0x2d0] sm:$0xff] }
 0x345   : > { %3616 = vmatpush1.bf16.xpose.msra.mxu1 %v3615_v24  ;;  %v2398_v24 = vld [vmem:[#allocation2 + $0x278] sm:$0xff]  ;;  %v2672_v46 = vmax.f32 %v2544_v34, 0.0  ;;  %v2543_v55 = vadd.f32 %v5233_v19, %v2393_v44  ;;  %v2552_v62 = vadd.f32 %v5231_v16, %v2402_v52  ;;  %v2551_v26 = vadd.f32 %v5233_v19, %v2401_v10  ;;  %v2757_v34 = vld [vmem:[%s5565_s17] sm:$0xff] }
 0x346   : > { %3680 = vmatpush1.bf16.xpose.msra.mxu0 %v3679_v27  ;;  %3618 = vmatprep.subr.bf16.mxu1 %v3617_v31  ;;  %v2537_v27 = vadd.f32 %v5229_v14, %v2387_v11  ;;  %v2542_v31 = vadd.f32 %v5227_v13, %v2392_v20  ;;  %v3691_v57 = vpack.c.bf16 %v2667_v41, %v2663_v40  ;;  %v2669_v0 = vmax.f32 %v2541_v50, 0.0  ;;  %v2420_v50 = vld [vmem:[#allocation2 + $0x328] sm:$0xff]  ;;  %v2415_v10 = vld [vmem:[#allocation2 + $0x300] sm:$0xff] }
 0x347   : > { %3682 = vmatprep.subr.bf16.mxu0 %v3681_v35  ;;  %v2548_v35 = vadd.f32 %v5231_v16, %v2398_v24  ;;  %v2673_v3 = vmax.f32 %v2545_v51, 0.0  ;;  %v2671_v4 = vmax.f32 %v2543_v55, 0.0  ;;  %v2680_v11 = vmax.f32 %v2552_v62, 0.0  ;;  %v2758_v55 = vld [vmem:[%s5565_s17 + $0x8] sm:$0xff] }
 0x348   : > { %v2665_v37 = vmax.f32 %v2537_v27, 0.0  ;;  %v2670_v42 = vmax.f32 %v2542_v31, 0.0  ;;  %v2549_v24 = vadd.f32 %v5229_v14, %v2399_v8  ;;  %v2555_v28 = vadd.f32 %v5233_v19, %v2405_v15  ;;  %v2419_v15 = vld [vmem:[#allocation2 + $0x320] sm:$0xff] }
 0x349   : > { %v2676_v47 = vmax.f32 %v2548_v35, 0.0  ;;  %v3631_v20 = vpack.c.bf16 %v2673_v3, %v2669_v0  ;;  %v2562_v30 = vadd.f32 %v5227_v13, %v2412_v18  ;;  %v2560_v32 = vadd.f32 %v5231_v16, %v2410_v21  ;;  %v3047_v18 = vld [vmem:[%s5566_s19] sm:$0xff] }
 0x34a   : > { %v3627_v54 = vpack.c.bf16 %v2665_v37, %v2661_v36  ;;  %v3629_v58 = vpack.c.bf16 %v2674_v43, %v2670_v42  ;;  %v2677_v35 = vmax.f32 %v2549_v24, 0.0  ;;  %v2407_v37 = vld [vmem:[#allocation2 + $0x2c0] sm:$0xff]  ;;  %v4325_v40 = vmov 0   ;;  %v2428_v24 = vld [vmem:[#allocation2 + $0x368] sm:$0xff] }
 0x34b   : > { %v3693_v61 = vpack.c.bf16 %v2676_v47, %v2672_v46  ;;  %4039 = vset.pattern.permute.xlu0 %v4325_v40  ;;  %v2679_v41 = vmax.f32 %v2551_v26, 0.0  ;;  %v2683_v42 = vmax.f32 %v2555_v28, 0.0  ;;  %v2690_v44 = vmax.f32 %v2562_v30, 0.0  ;;  %v2759_v46 = vld [vmem:[%s5565_s17 + $0x10] sm:$0xff]  ;;  %4040 = vset.pattern.permute.xlu1 %v4325_v40  ;;  %v2426_v26 = vld [vmem:[#allocation2 + $0x358] sm:$0xff]  ;;  %v3048_v28 = vld [vmem:[%s5566_s19 + $0x8] sm:$0xff] }
 0x34c   : > { %v2688_v47 = vmax.f32 %v2560_v32, 0.0  ;;  %2767 = vperm.xlu0 %4039, %v2757_v34   ;;  %v2557_v51 = vadd.f32 %v5229_v14, %v2407_v37  ;;  %v2561_v52 = vadd.f32 %v5229_v14, %v2411_v38  ;;  %2777 = vperm.xlu1 %4040, %v2759_v46   ;;  %v2570_v62 = vadd.f32 %v5227_v13, %v2420_v50  ;;  %v2762_v37 = vld [vmem:[%s5565_s17 + $0x28] sm:$0xff]  ;;  %v2425_v46 = vld [vmem:[#allocation2 + $0x350] sm:$0xff] }
 0x34d   : > { %3620 = vmatpush1.bf16.xpose.msra.mxu1 %v3619_v56  ;;  %v2547_v56 = vadd.f32 %v5233_v19, %v2397_v45  ;;  %v2413_v45 = vld [vmem:[#allocation2 + $0x2f0] sm:$0xff]  ;;  %v2565_v30 = vadd.f32 %v5229_v14, %v2415_v10 }
 0x34e   : > { %3684 = vmatpush1.bf16.xpose.msra.mxu0 %v3683_v59  ;;  %3622 = vmatprep.subr.bf16.mxu1 %v3621_v60  ;;  %v2550_v59 = vadd.f32 %v5227_v13, %v2400_v48  ;;  %v2554_v60 = vadd.f32 %v5227_v13, %v2404_v49  ;;  %v2416_v49 = vld [vmem:[#allocation2 + $0x308] sm:$0xff] }
 0x34f   : > { %3686 = vmatprep.subr.bf16.mxu0 %v3685_v63  ;;  %v2556_v63 = vadd.f32 %v5231_v16, %v2406_v53  ;;  %v2675_v5 = vmax.f32 %v2547_v56, 0.0  ;;  %v2418_v53 = vld [vmem:[#allocation2 + $0x318] sm:$0xff] }
 0x350   : > { %v2678_v6 = vmax.f32 %v2550_v59, 0.0  ;;  %v2682_v7 = vmax.f32 %v2554_v60, 0.0  ;;  %v3699_v59 = vpack.c.bf16 %v2683_v42, %v2679_v41  ;;  %v2568_v3 = vadd.f32 %v5231_v16, %v2418_v53  ;;  %2772 = vperm.xlu0 %4039, %v2758_v55   ;;  %v3049_v41 = vld [vmem:[%s5566_s19 + $0x10] sm:$0xff]  ;;  %v2432_v55 = vld [vmem:[#allocation2 + $0x388] sm:$0xff] }
 0x351   : > { %v2684_v12 = vmax.f32 %v2556_v63, 0.0  ;;  %v3695_v23 = vpack.c.bf16 %v2675_v5, %v2671_v4  ;;  %v2760_v63 = vld [vmem:[%s5565_s17 + $0x18] sm:$0xff]  ;;  %v2685_v5 = vmax.f32 %v2557_v51, 0.0  ;;  %v2693_v42 = vmax.f32 %v2565_v30, 0.0  ;;  %v2429_v51 = vld [vmem:[#allocation2 + $0x370] sm:$0xff]  ;;  %v2444_v30 = vld [vmem:[#allocation2 + $0x3e8] sm:$0xff] }
 0x352   : > { %v3633_v27 = vpack.c.bf16 %v2682_v7, %v2678_v6  ;;  %v2689_v6 = vmax.f32 %v2561_v52, 0.0  ;;  %v2761_v7 = vld [vmem:[%s5565_s17 + $0x20] sm:$0xff]  ;;  %2782 = vperm.xlu1 %4040, %v2760_v63   ;;  %v2763_v52 = vld [vmem:[%s5565_s17 + $0x30] sm:$0xff]  ;;  %v2575_v63 = vadd.f32 %v5233_v19, %v2425_v46 }
 0x353   : > { %v3697_v31 = vpack.c.bf16 %v2684_v12, %v2680_v11  ;;  %v2698_v12 = vmax.f32 %v2570_v62, 0.0 }
 0x354   : > { %2787 = vperm.xlu0 %4039, %v2761_v7   ;;  %v2764_v7 = vld [vmem:[%s5565_s17 + $0x38] sm:$0xff] }
 0x355   : > { %3624 = vmatpush1.bf16.xpose.msra.mxu1 %v3623_v22  ;;  %v2414_v22 = vld [vmem:[#allocation2 + $0x2f8] sm:$0xff] }
 0x356   : > { %3688 = vmatpush1.bf16.xpose.msra.mxu0 %v3687_v25  ;;  %3626 = vmatprep.subr.bf16.mxu1 %v3625_v29  ;;  %v2553_v25 = vadd.f32 %v5229_v14, %v2403_v9  ;;  %v2558_v29 = vadd.f32 %v5227_v13, %v2408_v17  ;;  %v2417_v17 = vld [vmem:[#allocation2 + $0x310] sm:$0xff] }
 0x357   : > { %3690 = vmatprep.subr.bf16.mxu0 %v3689_v33  ;;  %v2564_v33 = vadd.f32 %v5231_v16, %v2414_v22  ;;  %v2421_v22 = vld [vmem:[#allocation2 + $0x330] sm:$0xff]  ;;  %v2567_v32 = vadd.f32 %v5233_v19, %v2417_v17  ;;  %3057 = vperm.xlu1 %4040, %v3047_v18   ;;  %v2703_v17 = vmax.f32 %v2575_v63, 0.0 }
 0x358   : > { %v2681_v36 = vmax.f32 %v2553_v25, 0.0  ;;  %v2686_v43 = vmax.f32 %v2558_v29, 0.0  ;;  %v3639_v25 = vpack.c.bf16 %v2689_v6, %v2685_v5  ;;  %v2571_v34 = vadd.f32 %v5233_v19, %v2421_v22  ;;  %3062 = vperm.xlu0 %4039, %v3048_v28   ;;  %v2437_v28 = vld [vmem:[#allocation2 + $0x3b0] sm:$0xff] }
 0x359   : > { %v2692_v48 = vmax.f32 %v2564_v33, 0.0  ;;  %v2582_v5 = vadd.f32 %v5227_v13, %v2432_v55 }
 0x35a   : > { %v3635_v56 = vpack.c.bf16 %v2681_v36, %v2677_v35  ;;  %v3637_v60 = vpack.c.bf16 %v2690_v44, %v2686_v43  ;;  %v2578_v36 = vadd.f32 %v5227_v13, %v2428_v24  ;;  %v2423_v44 = vld [vmem:[#allocation2 + $0x340] sm:$0xff]  ;;  %v2433_v24 = vld [vmem:[#allocation2 + $0x390] sm:$0xff] }
 0x35b   : > { %v3701_v0 = vpack.c.bf16 %v2692_v48, %v2688_v47  ;;  %2792 = vperm.xlu1 %4040, %v2762_v37   ;;  %v2695_v47 = vmax.f32 %v2567_v32, 0.0  ;;  %v2699_v48 = vmax.f32 %v2571_v34, 0.0  ;;  %v2442_v32 = vld [vmem:[#allocation2 + $0x3d8] sm:$0xff]  ;;  %v3053_v34 = vld [vmem:[%s5566_s19 + $0x30] sm:$0xff] }
 0x35c   : > { %v2706_v50 = vmax.f32 %v2578_v36, 0.0  ;;  %3067 = vperm.xlu0 %4039, %v3049_v41  }
 0x35d   : > { %3628 = vmatpush1.bf16.xpose.msra.mxu1 %v3627_v54  ;;  %v2422_v54 = vld [vmem:[#allocation2 + $0x338] sm:$0xff] }
 0x35e   : > { %3692 = vmatpush1.bf16.xpose.msra.mxu0 %v3691_v57  ;;  %3630 = vmatprep.subr.bf16.mxu1 %v3629_v58  ;;  %v2559_v57 = vadd.f32 %v5233_v19, %v2409_v39  ;;  %v2563_v58 = vadd.f32 %v5233_v19, %v2413_v45  ;;  %v2572_v4 = vadd.f32 %v5231_v16, %v2422_v54  ;;  %v2427_v45 = vld [vmem:[#allocation2 + $0x360] sm:$0xff] }
 0x35f   : > { %3694 = vmatprep.subr.bf16.mxu0 %v3693_v61  ;;  %v2566_v61 = vadd.f32 %v5227_v13, %v2416_v49  ;;  %v2576_v39 = vadd.f32 %v5231_v16, %v2426_v26  ;;  %2797 = vperm.xlu1 %4040, %v2763_v52   ;;  %v2439_v52 = vld [vmem:[#allocation2 + $0x3c0] sm:$0xff] }
 0x360   : > { %v2687_v8 = vmax.f32 %v2559_v57, 0.0  ;;  %v2691_v9 = vmax.f32 %v2563_v58, 0.0  ;;  %v2700_v21 = vmax.f32 %v2572_v4, 0.0  ;;  %v2573_v57 = vadd.f32 %v5229_v14, %v2423_v44 }
 0x361   : > { %v2694_v11 = vmax.f32 %v2566_v61, 0.0  ;;  %v2704_v53 = vmax.f32 %v2576_v39, 0.0  ;;  %v2577_v58 = vadd.f32 %v5229_v14, %v2427_v45  ;;  %v3050_v61 = vld [vmem:[%s5566_s19 + $0x18] sm:$0xff]  ;;  %v2592_v45 = vadd.f32 %v5231_v16, %v2442_v32 }
 0x362   : > { %v3703_v29 = vpack.c.bf16 %v2691_v9, %v2687_v8  ;;  %3072 = vperm.xlu0 %4039, %v3050_v61   ;;  %v2747_v32 = vld [vmem:[#allocation10 + $0xb0] sm:$0xff] }
 0x363   : > { %v3641_v33 = vpack.c.bf16 %v2698_v12, %v2694_v11  ;;  %v2701_v11 = vmax.f32 %v2573_v57, 0.0  ;;  %v2705_v12 = vmax.f32 %v2577_v58, 0.0  ;;  %2802 = vperm.xlu1 %4040, %v2764_v7   ;;  %v2445_v57 = vld [vmem:[#allocation2 + $0x3f0] sm:$0xff] }
 0x364   : > { %v2595_v63 = vadd.f32 %v5233_v19, %v2445_v57 }
 0x365   : > { %3632 = vmatpush1.bf16.xpose.msra.mxu1 %v3631_v20  ;;  %v2696_v20 = vmax.f32 %v2568_v3, 0.0  ;;  %v3707_v3 = vpack.c.bf16 %v2699_v48, %v2695_v47 }
 0x366   : > { %3696 = vmatpush1.bf16.xpose.msra.mxu0 %v3695_v23  ;;  %3634 = vmatprep.subr.bf16.mxu1 %v3633_v27  ;;  %v2424_v23 = vld [vmem:[#allocation2 + $0x348] sm:$0xff]  ;;  %v2430_v27 = vld [vmem:[#allocation2 + $0x378] sm:$0xff] }
 0x367   : > { %3698 = vmatprep.subr.bf16.mxu0 %v3697_v31  ;;  %v2569_v31 = vadd.f32 %v5229_v14, %v2419_v15  ;;  %v2574_v35 = vadd.f32 %v5227_v13, %v2424_v23  ;;  %v3705_v38 = vpack.c.bf16 %v2700_v21, %v2696_v20  ;;  %v2580_v40 = vadd.f32 %v5231_v16, %v2430_v27  ;;  %v3051_v15 = vld [vmem:[%s5566_s19 + $0x20] sm:$0xff] }
 0x368   : > { %v2431_v20 = vld [vmem:[#allocation2 + $0x380] sm:$0xff]  ;;  %v2710_v21 = vmax.f32 %v2582_v5, 0.0  ;;  %3077 = vperm.xlu0 %4039, %v3051_v15   ;;  %v2734_v15 = vld [vmem:[#allocation10 + $0x48] sm:$0xff] }
 0x369   : > { %v2697_v43 = vmax.f32 %v2569_v31, 0.0  ;;  %v2702_v49 = vmax.f32 %v2574_v35, 0.0  ;;  %v2708_v54 = vmax.f32 %v2580_v40, 0.0  ;;  %v2435_v23 = vld [vmem:[#allocation2 + $0x3a0] sm:$0xff]  ;;  %v3647_v31 = vpack.c.bf16 %v2705_v12, %v2701_v11  ;;  %v2731_v12 = vld [vmem:[#allocation10 + $0x30] sm:$0xff] }
 0x36a   : > { %v2581_v36 = vadd.f32 %v5229_v14, %v2431_v20  ;;  %v2585_v37 = vadd.f32 %v5229_v14, %v2435_v23  ;;  %v2587_v40 = vadd.f32 %v5233_v19, %v2437_v28  ;;  %v2732_v11 = vld [vmem:[#allocation10 + $0x38] sm:$0xff]  ;;  %v2735_v20 = vld [vmem:[#allocation10 + $0x50] sm:$0xff]  ;;  %v2737_v23 = vld [vmem:[#allocation10 + $0x60] sm:$0xff] }
 0x36b   : > { %v3643_v62 = vpack.c.bf16 %v2697_v43, %v2693_v42  ;;  %v3645_v4 = vpack.c.bf16 %v2706_v50, %v2702_v49  ;;  %v3709_v8 = vpack.c.bf16 %v2708_v54, %v2704_v53  ;;  %v2594_v42 = vadd.f32 %v5227_v13, %v2444_v30  ;;  %v3054_v43 = vld [vmem:[%s5566_s19 + $0x38] sm:$0xff]  ;;  %v2443_v53 = vld [vmem:[#allocation2 + $0x3e0] sm:$0xff] }
 0x36c   : > { %3087 = vperm.xlu0 %4039, %v3053_v34   ;;  %v2709_v47 = vmax.f32 %v2581_v36, 0.0  ;;  %v2713_v48 = vmax.f32 %v2585_v37, 0.0  ;;  %v2715_v50 = vmax.f32 %v2587_v40, 0.0  ;;  %v2720_v54 = vmax.f32 %v2592_v45, 0.0  ;;  %v2743_v28 = vld [vmem:[#allocation10 + $0x90] sm:$0xff]  ;;  %v2748_v30 = vld [vmem:[#allocation10 + $0xb8] sm:$0xff] }
 0x36d   : > { %3636 = vmatpush1.bf16.xpose.msra.mxu1 %v3635_v56  ;;  %v2436_v56 = vld [vmem:[#allocation2 + $0x3a8] sm:$0xff]  ;;  %v2752_v34 = vld [vmem:[#allocation10 + $0xd8] sm:$0xff]  ;;  %v2751_v36 = vld [vmem:[#allocation10 + $0xd0] sm:$0xff] }
 0x36e   : > { %3700 = vmatpush1.bf16.xpose.msra.mxu0 %v3699_v59  ;;  %3638 = vmatprep.subr.bf16.mxu1 %v3637_v60  ;;  %v2434_v59 = vld [vmem:[#allocation2 + $0x398] sm:$0xff]  ;;  %v2586_v6 = vadd.f32 %v5227_v13, %v2436_v56  ;;  %v2441_v56 = vld [vmem:[#allocation2 + $0x3d0] sm:$0xff]  ;;  %v3651_v58 = vpack.c.bf16 %v2713_v48, %v2709_v47 }
 0x36f   : > { %3702 = vmatprep.subr.bf16.mxu0 %v3701_v0  ;;  %v2438_v60 = vld [vmem:[#allocation2 + $0x3b8] sm:$0xff]  ;;  %v2579_v0 = vadd.f32 %v5233_v19, %v2429_v51  ;;  %v2584_v9 = vadd.f32 %v5231_v16, %v2434_v59  ;;  %v2593_v59 = vadd.f32 %v5229_v14, %v2443_v53  ;;  %v2754_v37 = vld [vmem:[#allocation10 + $0xe8] sm:$0xff] }
 0x370   : > { %v2588_v10 = vadd.f32 %v5231_v16, %v2438_v60  ;;  %v2714_v22 = vmax.f32 %v2586_v6, 0.0  ;;  %v2723_v6 = vmax.f32 %v2595_v63, 0.0  ;;  %v2755_v40 = vld [vmem:[#allocation10 + $0xf0] sm:$0xff] }
 0x371   : > { %v2707_v18 = vmax.f32 %v2579_v0, 0.0  ;;  %v2712_v26 = vmax.f32 %v2584_v9, 0.0  ;;  %v2727_v9 = vld [vmem:[#allocation10 + $0x10] sm:$0xff] }
 0x372   : > { %v2716_v27 = vmax.f32 %v2588_v10, 0.0  ;;  %v3649_v39 = vpack.c.bf16 %v2714_v22, %v2710_v21  ;;  %v2730_v10 = vld [vmem:[#allocation10 + $0x28] sm:$0xff]  ;;  %v2740_v22 = vld [vmem:[#allocation10 + $0x78] sm:$0xff] }
 0x373   : > { %v3711_v35 = vpack.c.bf16 %v2707_v18, %v2703_v17  ;;  %v2736_v17 = vld [vmem:[#allocation10 + $0x58] sm:$0xff]  ;;  %v2733_v18 = vld [vmem:[#allocation10 + $0x40] sm:$0xff]  ;;  %v2738_v21 = vld [vmem:[#allocation10 + $0x68] sm:$0xff] }
 0x374   : > { %v3713_v44 = vpack.c.bf16 %v2716_v27, %v2712_v26  ;;  %v2744_v26 = vld [vmem:[#allocation10 + $0x98] sm:$0xff]  ;;  %v2741_v27 = vld [vmem:[#allocation10 + $0x80] sm:$0xff] }
 0x375   : > { %3640 = vmatpush1.bf16.xpose.msra.mxu1 %v3639_v25  ;;  %v3052_v25 = vld [vmem:[%s5566_s19 + $0x28] sm:$0xff] }
 0x376   : > { %3704 = vmatpush1.bf16.xpose.msra.mxu0 %v3703_v29  ;;  %3642 = vmatprep.subr.bf16.mxu1 %v3641_v33  ;;  %v2440_v29 = vld [vmem:[#allocation2 + $0x3c8] sm:$0xff]  ;;  %v2446_v33 = vld [vmem:[#allocation2 + $0x3f8] sm:$0xff] }
 0x377   : > { %3706 = vmatprep.subr.bf16.mxu0 %v3705_v38  ;;  %v2583_v38 = vadd.f32 %v5233_v19, %v2433_v24  ;;  %3082 = vperm.xlu1 %4040, %v3052_v25   ;;  %v2590_v41 = vadd.f32 %v5227_v13, %v2440_v29  ;;  %v2596_v46 = vadd.f32 %v5231_v16, %v2446_v33  ;;  %v2722_v13 = vmax.f32 %v2594_v42, 0.0  ;;  %v2739_v24 = vld [vmem:[#allocation10 + $0x70] sm:$0xff]  ;;  %v2742_v25 = vld [vmem:[#allocation10 + $0x88] sm:$0xff] }
 0x378   : > { %v2589_v16 = vadd.f32 %v5229_v14, %v2439_v52  ;;  %v2725_v14 = vld [vmem:[#allocation10] sm:$0xff]  ;;  %v2746_v29 = vld [vmem:[#allocation10 + $0xa8] sm:$0xff] }
 0x379   : > { %v2711_v49 = vmax.f32 %v2583_v38, 0.0  ;;  %v2718_v51 = vmax.f32 %v2590_v41, 0.0  ;;  %v2724_v55 = vmax.f32 %v2596_v46, 0.0  ;;  %v2750_v33 = vld [vmem:[#allocation10 + $0xc8] sm:$0xff]  ;;  %v2756_v38 = vld [vmem:[#allocation10 + $0xf8] sm:$0xff] }
 0x37b   : > { %3092 = vperm.xlu1 %4040, %v3054_v43   ;;  %v3715_v60 = vpack.c.bf16 %v2715_v50, %v2711_v49  ;;  %v3653_v61 = vpack.c.bf16 %v2722_v13, %v2718_v51  ;;  %v3717_v0 = vpack.c.bf16 %v2724_v55, %v2720_v54 }
 0x37d   : > { %3644 = vmatpush1.bf16.xpose.msra.mxu1 %v3643_v62  ;;  %v2591_v62 = vadd.f32 %v5233_v19, %v2441_v56  ;;  %v2729_v19 = vld [vmem:[#allocation10 + $0x20] sm:$0xff] }
 0x37e   : > { %3708 = vmatpush1.bf16.xpose.msra.mxu0 %v3707_v3  ;;  %3646 = vmatprep.subr.bf16.mxu1 %v3645_v4  ;;  %v2717_v3 = vmax.f32 %v2589_v16, 0.0  ;;  %v2721_v4 = vmax.f32 %v2593_v59, 0.0 }
 0x37f   : > { %3710 = vmatprep.subr.bf16.mxu0 %v3709_v8  ;;  %v2719_v5 = vmax.f32 %v2591_v62, 0.0 }
 0x380   : > { %v3655_v7 = vpack.c.bf16 %v2721_v4, %v2717_v3 }
 0x381   : > { %v3719_v8 = vpack.c.bf16 %v2723_v6, %v2719_v5 }
 0x385   : > { %3648 = vmatpush1.bf16.xpose.msra.mxu1 %v3647_v31  ;;  %v2745_v31 = vld [vmem:[#allocation10 + $0xa0] sm:$0xff] }
 0x386   : > { %3712 = vmatpush1.bf16.xpose.msra.mxu0 %v3711_v35  ;;  %3650 = vmatprep.subr.bf16.mxu1 %v3649_v39  ;;  %v2749_v35 = vld [vmem:[#allocation10 + $0xc0] sm:$0xff] }
 0x387   : > { %3714 = vmatprep.subr.bf16.mxu0 %v3713_v44  ;;  %v2753_v39 = vld [vmem:[#allocation10 + $0xe0] sm:$0xff] }
 0x38d   : > { %3652 = vmatpush1.bf16.xpose.msra.mxu1 %v3651_v58 }
 0x38e   : > { %3716 = vmatpush1.bf16.xpose.msra.mxu0 %v3715_v60  ;;  %3654 = vmatprep.subr.bf16.mxu1 %v3653_v61 }
 0x38f   : > { %3718 = vmatprep.subr.bf16.mxu0 %v3717_v0 }
 0x395   : > { %3656 = vmatpush1.bf16.xpose.msra.mxu1 %v3655_v7 }
 0x396   : > { %3720 = vmatpush1.bf16.xpose.msra.mxu0 %v3719_v8 }
 0x39c   : > { %2870 = vmatmul.mubr.f32.vlgmr.msra.gmra.mrb[0].mxu1 %v2725_v14 }
 0x39d   : > { %2983 = vmatmul.mubr.f32.vlgmr.msra.gmra.mrb[0].mxu0 %v2727_v9  ;;  %2875 = vmatprep.mubr.f32.mxu1 %v2730_v10 }
 0x39e   : > { %2988 = vmatprep.mubr.f32.mxu0 %v2732_v11 }
 0x3a0   : > { %2876 = vmatmul.mubr.f32.gmra.mrb[2].mxu1 %v2729_v19 }
 0x3a1   : > { %2989 = vmatmul.mubr.f32.gmra.mrb[2].mxu0 %v2731_v12  ;;  %2881 = vmatprep.mubr.f32.mxu1 %v2734_v15 }
 0x3a2   : > { %2994 = vmatprep.mubr.f32.mxu0 %v2736_v17 }
 0x3a4   : > { %2882 = vmatmul.mubr.f32.gmra.mrb[4].mxu1 %v2733_v18 }
 0x3a5   : > { %2995 = vmatmul.mubr.f32.gmra.mrb[4].mxu0 %v2735_v20  ;;  %2887 = vmatprep.mubr.f32.mxu1 %v2738_v21 }
 0x3a6   : > { %3000 = vmatprep.mubr.f32.mxu0 %v2740_v22 }
 0x3a8   : > { %2888 = vmatmul.mubr.f32.gmra.mrb[6].mxu1 %v2737_v23 }
 0x3a9   : > { %3001 = vmatmul.mubr.f32.gmra.mrb[6].mxu0 %v2739_v24  ;;  %2893 = vmatprep.mubr.f32.mxu1 %v2742_v25 }
 0x3aa   : > { %3006 = vmatprep.mubr.f32.mxu0 %v2744_v26 }
 0x3ac   : > { %2894 = vmatmul.mubr.f32.gmra.mrb[8].mxu1 %v2741_v27 }
 0x3ad   : > { %3007 = vmatmul.mubr.f32.gmra.mrb[8].mxu0 %v2743_v28  ;;  %2899 = vmatprep.mubr.f32.mxu1 %v2746_v29 }
 0x3ae   : > { %3012 = vmatprep.mubr.f32.mxu0 %v2748_v30 }
 0x3b0   : > { %2900 = vmatmul.mubr.f32.gmra.mrb[10].mxu1 %v2745_v31 }
 0x3b1   : > { %3013 = vmatmul.mubr.f32.gmra.mrb[10].mxu0 %v2747_v32  ;;  %2905 = vmatprep.mubr.f32.mxu1 %v2750_v33 }
 0x3b2   : > { %3018 = vmatprep.mubr.f32.mxu0 %v2752_v34 }
 0x3b4   : > { %2906 = vmatmul.mubr.f32.gmra.mrb[12].mxu1 %v2749_v35 }
 0x3b5   : > { %3019 = vmatmul.mubr.f32.gmra.mrb[12].mxu0 %v2751_v36  ;;  %2911 = vmatprep.mubr.f32.mxu1 %v2754_v37 }
 0x3b6   : > { %3024 = vmatprep.mubr.f32.mxu0 %v2756_v38 }
 0x3b8   : > { %2912 = vmatmul.mubr.f32.gmra.mrb[14].mxu1 %v2753_v39 }
 0x3b9   : > { %3025 = vmatmul.mubr.f32.gmra.mrb[14].mxu0 %v2755_v40 }
 0x3cb   : > { %v2768_v41 = vpop.permute.xlu0 %2767  ;;  %v2778_v42 = vpop.permute.xlu1 %2777 }
 0x3cf   : > { %v2773_v43 = vpop.permute.xlu0 %2772 }
 0x3d1   : > { %v2783_v44 = vpop.permute.xlu1 %2782 }
 0x3d3   : > { %v2788_v45 = vpop.permute.xlu0 %2787 }
 0x3d6   : > { %v3058_v50 = vpop.permute.xlu1 %3057 }
 0x3d7   : > { %v3063_v53 = vpop.permute.xlu0 %3062 }
 0x3da   : > { %v2793_v62 = vpop.permute.xlu1 %2792 }
 0x3db   : > { %v3068_v8 = vpop.permute.xlu0 %3067 }
 0x3de   : > { %v2798_v26 = vpop.permute.xlu1 %2797 }
 0x3e1   : > { %v3073_v33 = vpop.permute.xlu0 %3072 }
 0x46f   : > { %v2871_v46 = vpop.f32.mrb[0].mxu1 }
 0x470   : > { %v2872_v47 = vadd.f32 %v2871_v46, %v2768_v41  ;;  %v2873_v48 = vpop.f32.mrb[1].mxu1  ;;  %v2984_v49 = vpop.f32.mrb[0].mxu0 }
 0x471   : > { %v2874_v51 = vadd.f32 %v2873_v48, %v2768_v41  ;;  %v2986_v13 = vpop.f32.mrb[1].mxu0 }
 0x472   : > { %v2985_v52 = vadd.f32 %v2984_v49, %v2872_v47 }
 0x473   : > { %v2987_v54 = vadd.f32 %v2986_v13, %v2874_v51  ;;  %v2877_v55 = vpop.f32.mrb[2].mxu1 }
 0x474   : > { %v2878_v56 = vadd.f32 %v2877_v55, %v2773_v43  ;;  %v2879_v57 = vpop.f32.mrb[3].mxu1  ;;  %v2990_v58 = vpop.f32.mrb[2].mxu0  ;;  %v3031_v60 = vmax.f32 %v2985_v52, 0.0 }
 0x475   : > { %v2880_v16 = vadd.f32 %v2879_v57, %v2773_v43  ;;  %v2992_v59 = vpop.f32.mrb[3].mxu0  ;;  %v3032_v63 = vmax.f32 %v2987_v54, 0.0  ;;  %v3078_v57 = vpop.permute.xlu0 %3077 }
 0x476   : > { %v2991_v61 = vadd.f32 %v2990_v58, %v2878_v56  ;;  %v3095_v11 = vmul.f32 %v3058_v50, %v3031_v60 }
 0x477   : > { %v2993_v0 = vadd.f32 %v2992_v59, %v2880_v16  ;;  %v2883_v3 = vpop.f32.mrb[4].mxu1  ;;  %v3096_v15 = vmul.f32 %v3058_v50, %v3032_v63  ;;  %v2803_v50 = vpop.permute.xlu1 %2802 }
 0x478   : > { %v3033_v4 = vmax.f32 %v2991_v61, 0.0  ;;  %v2884_v5 = vadd.f32 %v2883_v3, %v2778_v42  ;;  %v2885_v6 = vpop.f32.mrb[5].mxu1  ;;  %v2996_v7 = vpop.f32.mrb[4].mxu0 }
 0x479   : > { %v3034_v14 = vmax.f32 %v2993_v0, 0.0  ;;  %v2886_v9 = vadd.f32 %v2885_v6, %v2778_v42  ;;  %v2998_v10 = vpop.f32.mrb[5].mxu0 }
 0x47a   : > { %v3097_v19 = vmul.f32 %v3063_v53, %v3033_v4  ;;  %v2997_v12 = vadd.f32 %v2996_v7, %v2884_v5 }
 0x47b   : > { %v3098_v17 = vmul.f32 %v3063_v53, %v3034_v14  ;;  %v2999_v18 = vadd.f32 %v2998_v10, %v2886_v9  ;;  %v2889_v20 = vpop.f32.mrb[6].mxu1  ;;  %v3083_v14 = vpop.permute.xlu1 %3082 }
 0x47c   : > { %v3111_v21 = vadd.f32 %v3097_v19, %v3095_v11  ;;  %v3035_v22 = vmax.f32 %v2997_v12, 0.0  ;;  %v2890_v23 = vadd.f32 %v2889_v20, %v2783_v44  ;;  %v2891_v24 = vpop.f32.mrb[7].mxu1  ;;  %v3002_v25 = vpop.f32.mrb[6].mxu0 }
 0x47d   : > { %v3124_v27 = vadd.f32 %v3098_v17, %v3096_v15  ;;  %v3036_v28 = vmax.f32 %v2999_v18, 0.0  ;;  %v2892_v29 = vadd.f32 %v2891_v24, %v2783_v44  ;;  %v3004_v30 = vpop.f32.mrb[7].mxu0 }
 0x47e   : > { %v3099_v31 = vmul.f32 %v3068_v8, %v3035_v22  ;;  %v3003_v32 = vadd.f32 %v3002_v25, %v2890_v23  ;;  %v3088_v25 = vpop.permute.xlu0 %3087 }
 0x47f   : > { %v3100_v34 = vmul.f32 %v3068_v8, %v3036_v28  ;;  %v3005_v35 = vadd.f32 %v3004_v30, %v2892_v29  ;;  %v2895_v36 = vpop.f32.mrb[8].mxu1 }
 0x480   : > { %v3112_v37 = vadd.f32 %v3111_v21, %v3099_v31  ;;  %v3037_v38 = vmax.f32 %v3003_v32, 0.0  ;;  %v2896_v39 = vadd.f32 %v2895_v36, %v2788_v45  ;;  %v2897_v40 = vpop.f32.mrb[9].mxu1  ;;  %v3008_v41 = vpop.f32.mrb[8].mxu0 }
 0x481   : > { %v3125_v42 = vadd.f32 %v3124_v27, %v3100_v34  ;;  %v3038_v43 = vmax.f32 %v3005_v35, 0.0  ;;  %v2898_v46 = vadd.f32 %v2897_v40, %v2788_v45  ;;  %v3010_v47 = vpop.f32.mrb[9].mxu0  ;;  %v3093_v36 = vpop.permute.xlu1 %3092 }
 0x482   : > { %v3101_v48 = vmul.f32 %v3073_v33, %v3037_v38  ;;  %v3009_v49 = vadd.f32 %v3008_v41, %v2896_v39 }
 0x483   : > { %v3102_v44 = vmul.f32 %v3073_v33, %v3038_v43  ;;  %v3011_v51 = vadd.f32 %v3010_v47, %v2898_v46  ;;  %v2901_v13 = vpop.f32.mrb[10].mxu1 }
 0x484   : > { %v3113_v52 = vadd.f32 %v3112_v37, %v3101_v48  ;;  %v3039_v53 = vmax.f32 %v3009_v49, 0.0  ;;  %v2902_v54 = vadd.f32 %v2901_v13, %v2793_v62  ;;  %v2903_v55 = vpop.f32.mrb[11].mxu1  ;;  %v3014_v56 = vpop.f32.mrb[10].mxu0 }
 0x485   : > { %v3126_v58 = vadd.f32 %v3125_v42, %v3102_v44  ;;  %v3040_v16 = vmax.f32 %v3011_v51, 0.0  ;;  %v2904_v59 = vadd.f32 %v2903_v55, %v2793_v62  ;;  %v3016_v60 = vpop.f32.mrb[11].mxu0  ;;  %v4326_v44 = vmov 1966171168  }
 0x486   : > { %v3103_v61 = vmul.f32 %v3078_v57, %v3039_v53  ;;  %v3015_v63 = vadd.f32 %v3014_v56, %v2902_v54  ;;  %v3145_v51 = vunpack.c.l.s4 %v4326_v44  ;;  %v3138_v54 = vstv %s3137_s12 }
 0x487   : > { %v3104_v45 = vmul.f32 %v3078_v57, %v3040_v16  ;;  %v3017_v0 = vadd.f32 %v3016_v60, %v2904_v59  ;;  %v2907_v3 = vpop.f32.mrb[12].mxu1 }
 0x488   : > { %v3114_v4 = vadd.f32 %v3113_v52, %v3103_v61  ;;  %v3041_v5 = vmax.f32 %v3015_v63, 0.0  ;;  %v2908_v6 = vadd.f32 %v2907_v3, %v2798_v26  ;;  %v2909_v7 = vpop.f32.mrb[13].mxu1  ;;  %v3020_v8 = vpop.f32.mrb[12].mxu0  ;;  %v3146_v56 = vunpack.c.0.s8 %v3145_v51 }
 0x489   : > { %v3127_v9 = vadd.f32 %v3126_v58, %v3104_v45  ;;  %v3042_v10 = vmax.f32 %v3017_v0, 0.0  ;;  %v2910_v11 = vadd.f32 %v2909_v7, %v2798_v26  ;;  %v3022_v19 = vpop.f32.mrb[13].mxu0 }
 0x48a   : > { %v3105_v12 = vmul.f32 %v3083_v14, %v3041_v5  ;;  %v3021_v15 = vadd.f32 %v3020_v8, %v2908_v6  ;;  %v3149_v60 = vsub.s32 %v3146_v56, %v5221_v2 }
 0x48b   : > { %v3106_v17 = vmul.f32 %v3083_v14, %v3042_v10  ;;  %v3023_v62 = vadd.f32 %v3022_v19, %v2910_v11  ;;  %v2913_v18 = vpop.f32.mrb[14].mxu1 }
 0x48c   : > { %v3115_v20 = vadd.f32 %v3114_v4, %v3105_v12  ;;  %v3043_v21 = vmax.f32 %v3021_v15, 0.0  ;;  %v2914_v22 = vadd.f32 %v2913_v18, %v2803_v50  ;;  %v2915_v23 = vpop.f32.mrb[15].mxu1  ;;  %v3026_v24 = vpop.f32.mrb[14].mxu0 }
 0x48d   : > { %v3128_v27 = vadd.f32 %v3127_v9, %v3106_v17  ;;  %v3044_v28 = vmax.f32 %v3023_v62, 0.0  ;;  %v2916_v29 = vadd.f32 %v2915_v23, %v2803_v50  ;;  %v3028_v30 = vpop.f32.mrb[15].mxu0 }
 0x48e   : > { %v3107_v31 = vmul.f32 %v3088_v25, %v3043_v21  ;;  %v3027_v32 = vadd.f32 %v3026_v24, %v2914_v22 }
 0x48f   : > { %v3108_v33 = vmul.f32 %v3088_v25, %v3044_v28  ;;  %v3029_v26 = vadd.f32 %v3028_v30, %v2916_v29 }
 0x490   : > { %v3116_v34 = vadd.f32 %v3115_v20, %v3107_v31  ;;  %v3045_v35 = vmax.f32 %v3027_v32, 0.0 }
 0x491   : > { %v3129_v37 = vadd.f32 %v3128_v27, %v3108_v33  ;;  %v3046_v38 = vmax.f32 %v3029_v26, 0.0 }
 0x492   : > { %v3109_v39 = vmul.f32 %v3093_v36, %v3045_v35 }
 0x493   : > { %v3110_v40 = vmul.f32 %v3093_v36, %v3046_v38 }
 0x494   : > { %v3117_v41 = vadd.f32 %v3116_v34, %v3109_v39 }
 0x495   : > { %v3130_v42 = vadd.f32 %v3129_v37, %v3110_v40 }
 0x496   : > { %v3118_v43 = vrot.slane %v3117_v41, 4 }
 0x497   : > { %v3131_v46 = vrot.slane %v3130_v42, 4 }
 0x498   : > { %v3119_v47 = vadd.f32 %v3118_v43, %v3117_v41 }
 0x499   : > { %v3132_v48 = vadd.f32 %v3131_v46, %v3130_v42 }
 0x49a   : > { %v3120_v49 = vrot.slane %v3119_v47, 2 }
 0x49b   : > { %v3133_v50 = vrot.slane %v3132_v48, 2 }
 0x49c   : > { %v3121_v13 = vadd.f32 %v3120_v49, %v3119_v47 }
 0x49d   : > { %v3134_v52 = vadd.f32 %v3133_v50, %v3132_v48 }
 0x49e   : > { %v3122_v53 = vrot.slane %v3121_v13, 1 }
 0x49f   : > { %v3135_v55 = vrot.slane %v3134_v52, 1 }
 0x4a0   : > { %v3123_v57 = vadd.f32 %v3122_v53, %v3121_v13 }
 0x4a1   : > { %v3136_v58 = vadd.f32 %v3135_v55, %v3134_v52 }
 0x4a2   : > { %v3139_v16 = vadd.f32 %v3138_v54, %v3123_v57 }
 0x4a3   : > { %v3140_v59 = vadd.f32 %v3138_v54, %v3136_v58 }
 0x4a5   : > { %v3143_v61 = vcombine.low %v3139_v16, %v3140_v59 }
 0x4a7   : > { %v3150_v63 = vrot.slane %v3143_v61, %v3149_v60 }
 0x4a9   : > { %v3157_v45 = vrot.slane %v3150_v63, %v3149_v60 }
 0x4ab   : > { %3163 = vst.msk [vmem:[%s382_s20] sm:$0x3] %vm3161_vm0, %v3157_v45 }
 0x4ac PF: > { %s5567_s29 = sld [smem:[#allocation21_spill]]  ;;  %s5569_s4 = sld [smem:[#allocation22_spill]] }
 0x4ad   : > { %s5570_s24 = sld [smem:[#allocation31_spill]]  ;;  %s3179_s16 = sshll.u32 %s382_s20, 4  ;;  %s3180_s16 = int_to_ptr.vmem [resolvable:$true] %s3179_s16 }
 0x4ae   : > { %s3165_s6 = scalar_lea.sflag [#allocation6], %s380_s5  ;;  %s4157_s26 = scalar_lea.vmem %s3180_s16, 32 }
 0x4af   : > { %p4158_p0 = scmp.ne.s32.totalorder %s3180_s16, %s4157_s26  ;;  %s4327_s27 = smov [#allocation12]  }
 0x4b0   : > { %s4161_s11 = sshll.u32 %s4327_s27, 4  ;;  %s4162_s11 = int_to_ptr.vmem [resolvable:$false] %s4161_s11 }
 0x4b1   : > { %s4163_s12 = scalar_lea.vmem %s4162_s11, 64  ;;  %p4164_p12 = scmp.lt.s32.totalorder %s3180_s16, %s4162_s11 }
 0x4b2   : > { %s3336_s0 = sshll.u32 %s5567_s29, 5  ;;  %p5571_p9 = scmp.ne.s32.totalorder %s5569_s4, 0 }
 0x4b3   : > { %s5419_s18 = scalar_lea.hbm %s5570_s24, %s3336_s0  ;;  %p4165_p3 = scmp.lt.s32.totalorder %s4163_s12, %s4157_s26 }
 0x4b4   : > { %p4159_p13 = pnand %p4158_p0, %p5571_p9 }
 0x4b5   : > { %p4166_p4 = por %p4165_p3, %p4164_p12 }
 0x4b6   : > { %p4160_p8 = pneg %p4159_p13 }
 0x4b8   : > { %p4167_p7 = pnand %p4166_p4, %p4160_p8 }
 0x4ba   : > { %4170 = shalt.err (!%p4167_p7)
}
 0x4bb   : > { %s4171_s5 = scalar_lea.hbm %s5419_s18, 32  ;;  %s4175_s29 = scalar_lea.hbm %s5570_s24, 64 }
 0x4bc   : > { %p4172_p6 = scmp.ne.s32.totalorder %s5419_s18, %s4171_s5  ;;  %p4176_p5 = scmp.lt.u32.totalorder %s5419_s18, %s5570_s24 }
 0x4bd   : > { %p4177_p11 = scmp.lt.u32.totalorder %s4175_s29, %s4171_s5  ;;  %p4179_p0 = scmp.lt.u32.totalorder %s4171_s5, %s5419_s18 }
 0x4be   : > { %p4173_p1 = pnand %p4172_p6, %p5571_p9 }
 0x4bf   : > { %p4178_p10 = por %p4177_p11, %p4176_p5 }
 0x4c0   : > { %p4174_p2 = pneg %p4173_p1 }
 0x4c1   : > { %p4180_p13 = por %p4179_p0, %p4178_p10 }
 0x4c3   : > { %p4181_p8 = pnand %p4180_p13, %p4174_p2 }
 0x4c5   : > { %4184 = shalt.err (!%p4181_p8)
}
 0x4c6   : > { %3893 = dma.vmem_to_hbm [thread:$0]  (%p5571_p9), %s3180_s16, 32, %s5419_s18, %s3165_s6  }
 0x4c7 PF: > { %s5572_s21 = sld [smem:[#allocation18_spill]]  ;;  %s5573_s23 = sld [smem:[#allocation23_spill]] }
 0x4c8   : > { %p3918_p12 = scmp.ge.s32.totalorder %s4315_s15, 2 }
 0x4cd   : > { %s3191_s26 = sand.u32 1, %s5572_s21   ;;  %p5574_p3 = scmp.ne.s32.totalorder %s5573_s23, 0 }
 0x4ce   : > { %s3192_s27 = scalar_lea.sflag [#allocation6], %s3191_s26 }
 0x4cf   : > { %p3910_p4 = pnand %p3918_p12, %p5574_p3 }
 0x4d1   : > { %4258 = dma.done.wait (!%p3910_p4), %s3192_s27, 32  }
 0x4d2   : > { %4260 = vsyncadd (!%p3910_p4), %s3192_s27, 4294967264  ;;  %s28_s15 = sadd.s32 1, %s4315_s15   ;;  %s5576_s26 = sld [smem:[#allocation19_spill]] }
 0x4d3   : > { %p5447_p7 = scmp.ge.s32.totalorder %s28_s15, 6   ;;  %s5577_s4 = sld [smem:[#allocation24_spill]] }
 0x4d4   : > { %s5578_s18 = sld [smem:[#allocation25_spill]]  ;;  %s5580_s27 = smov %s4271_s28 }
 0x4d5   : > { %s5581_s28 = smov %s4567_s7  ;;  %s5582_s29 = smov %s4279_s30 }
 0x4d6   : > { %s5583_s30 = smov %s4283_s8  ;;  %s5584_s8 = smov %s4625_s22 }
 0x4d7   : > { %s5585_s6 = smov %s4291_s9  ;;  %s5586_s9 = smov %s4295_s10 }
 0x4d8   : > { %s5587_s10 = smov %s4570_s2  ;;  %s5588_s11 = smov %s4307_s13 }
 0x4d9   : > { %s5589_s12 = smov %s4311_s14  ;;  %s5590_s13 = smov %s5577_s4 }
 0x4da   : > { %s5591_s14 = smov %s5578_s18  ;;  %27 = sbr.rel (!%p5447_p7) target bundleno = 21 (0x15), region = 122 }
 0x4e1   :  { %3197 = vsyncpa [#allocation5], 1 }
 0x4e2   :  { %3199 = vsyncpa [#allocation5 + $0x1], 1 }
 0x4e3   :  { %3200 = vsyncpa [#allocation8], 1 }
 0x4e4   :  { %3202 = vsyncpa [#allocation8 + $0x1], 1 }
 0x4e5   :  { %3203 = vsyncpa [#allocation11], 1 }
 0x4e6   :  { %3204 = vsyncpa [#allocation6], 1 }
 0x4e7   :  { %3206 = vsyncpa [#allocation6 + $0x1], 1 }

</bundles_post_ra>
